<compile_context>
chip_gen: v6e
topology: v6e:2x2x1
jax: 0.10.0
libtpu: 0.0.40
codegen_flags: <defaults>
</compile_context>

<pallas_src>
import functools
import math

import jax
import jax.numpy as jnp
from jax.experimental import pallas as pl
from jax.experimental.pallas import tpu as pltpu

B = 1024         # rows per pallas_call (amortizes launch + one-time W1 DMA)
TB = 256         # batch tile per grid step -> grid=(4,)
F_IN = 1000      # efficientnet_b7 classifier out_features
K_PAD = 1024     # contraction dim zero-padded to a lane-aligned multiple of 128
H1 = 256
H2 = 128
BN_EPS = 1e-5


def head_kernel(x_ref, w1_ref, b1_ref, w2_ref, tail_ref, o_ref, *, fold_scale):
    # Linear(1000->256) + ReLU (bf16 operands, f32 MXU accumulation; K zero-padded).
    h = jnp.dot(x_ref[...], w1_ref[...],
                preferred_element_type=jnp.float32) + b1_ref[...]
    h = jnp.maximum(h, 0.0)
    # Linear(256->128) + ReLU.  BN1's eval-mode affine is pre-folded into w2/b2;
    # if BN2's scale is positive it is also ReLU-commuted into w2/b2 on the host.
    h = jnp.dot(h.astype(w2_ref.dtype), w2_ref[...],
                preferred_element_type=jnp.float32) + tail_ref[0:1, :]
    h = jnp.maximum(h, 0.0)
    if not fold_scale:
        h = h * tail_ref[1:2, :]            # BN2 scale / 6 (general path only)
    # + (BN2 shift / 6 + 0.5), clipped to [0, 1]  == BN2 + Hardsigmoid.
    # TODO(synk): emit bf16 here if the consumer tolerates it (halves writeback).
    o_ref[...] = jnp.clip(h + tail_ref[2:3, :], 0.0, 1.0)


def run_head(x, w1t, b1, w2t, tail, *, fold_scale):
    # Constant-block specs keep the weights resident in VMEM across grid steps.
    const = lambda shape: pl.BlockSpec(shape, lambda i: tuple(0 for _ in shape))
    kernel = functools.partial(head_kernel, fold_scale=fold_scale)
    return pl.pallas_call(
        kernel,
        out_shape=jax.ShapeDtypeStruct((B, H2), jnp.float32),
        grid=(B // TB,),
        in_specs=[
            pl.BlockSpec((TB, K_PAD), lambda i: (i, 0)),  # x tile (batch-sharded)
            const((K_PAD, H1)),                           # W1^T (bf16, resident)
            const((1, H1)),                               # b1   (f32)
            const((H1, H2)),                              # W2^T (BN1[,BN2] folded, bf16)
            const((3, H2)),                               # [b2'', scale, shift] (f32)
        ],
        out_specs=pl.BlockSpec((TB, H2), lambda i: (i, 0)),
        compiler_params=pltpu.CompilerParams(
            dimension_semantics=("parallel",)),
    )(x, w1t, b1, w2t, tail)


def init_linear(key, fan_in, fan_out):
    # PyTorch nn.Linear default init: U(-1/sqrt(fan_in), 1/sqrt(fan_in))
    kw, kb = jax.random.split(key)
    bound = 1.0 / math.sqrt(fan_in)
    w = jax.random.uniform(kw, (fan_out, fan_in), jnp.float32, -bound, bound)
    b = jax.random.uniform(kb, (fan_out,), jnp.float32, -bound, bound)
    return w, b


def fold_bn(gamma, beta, running_mean, running_var):
    scale = gamma / jnp.sqrt(running_var + BN_EPS)
    shift = beta - running_mean * scale
    return scale, shift


if __name__ == "__main__":
    key = jax.random.PRNGKey(0)
    kx, k1, k2, kbn1, kbn2 = jax.random.split(key, 5)

    # Backbone output features (stand-in for self.backbone(inp), shape (B, 1000)).
    feats = jax.random.normal(kx, (B, F_IN), jnp.float32)

    # Head parameters (deterministic).
    w1, b1 = init_linear(k1, F_IN, H1)   # (256, 1000), (256,)
    w2, b2 = init_linear(k2, H1, H2)     # (128, 256),  (128,)

    # BatchNorm1d params (eval mode): gamma=1, beta=0, perturbed running stats.
    g1 = jnp.ones((H1,), jnp.float32)
    be1 = jnp.zeros((H1,), jnp.float32)
    m1 = 0.1 * jax.random.normal(kbn1, (H1,), jnp.float32)
    v1 = jnp.ones((H1,), jnp.float32) + 0.05 * jax.random.uniform(kbn1, (H1,))
    g2 = jnp.ones((H2,), jnp.float32)
    be2 = jnp.zeros((H2,), jnp.float32)
    m2 = 0.1 * jax.random.normal(kbn2, (H2,), jnp.float32)
    v2 = jnp.ones((H2,), jnp.float32) + 0.05 * jax.random.uniform(kbn2, (H2,))

    s1, t1 = fold_bn(g1, be1, m1, v1)
    s2, t2 = fold_bn(g2, be2, m2, v2)

    # --- Host-side exact folds ---------------------------------------------
    w2t_folded = s1[:, None] * w2.T            # fold BN1 scale into W2^T  (256, 128)
    b2_folded = b2 + t1 @ w2.T                 # fold BN1 shift into b2    (128,)
    hs_scale = s2 / 6.0                        # BN2 + Hardsigmoid constants
    hs_shift = t2 / 6.0 + 0.5                  # clip(h*hs_scale + hs_shift, 0, 1)

    # ReLU-commute the Hardsigmoid/BN2 scale into W2/b2 when strictly positive
    # (valid because relu(z)*c == relu(z*c) for c > 0).
    fold_scale = bool(jnp.all(hs_scale > 0.0))
    if fold_scale:
        w2t_folded = w2t_folded * hs_scale[None, :]
        b2_folded = b2_folded * hs_scale

    # Zero-pad the contraction dim 1000 -> 1024 (exact: padded lanes contribute 0).
    x_pad = jnp.zeros((B, K_PAD), jnp.float32).at[:, :F_IN].set(feats)
    w1t_pad = jnp.zeros((K_PAD, H1), jnp.float32).at[:F_IN, :].set(w1.T)

    # bf16 streaming for the big operands; f32 accumulation happens in-kernel.
    x_bf16 = x_pad.astype(jnp.bfloat16)
    w1t_bf16 = w1t_pad.astype(jnp.bfloat16)
    w2t_bf16 = w2t_folded.astype(jnp.bfloat16)

    tail = jnp.stack([b2_folded, hs_scale, hs_shift], axis=0)   # (3, 128) f32

    out = run_head(x_bf16, w1t_bf16, b1.reshape(1, H1), w2t_bf16, tail,
                   fold_scale=fold_scale)
    out = jax.block_until_ready(out)

    # Pure-JAX f32 reference of the original (unfolded) head.
    def ref(x):
        h = jnp.maximum(x @ w1.T + b1, 0.0)
        h = h * s1 + t1
        h = jnp.maximum(h @ w2.T + b2, 0.0)
        h = h * s2 + t2
        return jnp.clip(h / 6.0 + 0.5, 0.0, 1.0)

    expected = ref(feats)
    assert out.shape == (B, H2)
    # bf16 weights/activations -> relaxed tolerance (output range is [0, 1]).
    assert jnp.allclose(out, expected, atol=1e-2, rtol=1e-2), "mismatch vs reference"
    print("KERNEL_OK")
</pallas_src>

<mosaic_0001>
module attributes {stable_mosaic.version = 11 : i64} {
  func.func @head_kernel(%arg0: i32, %arg1: memref<256x1024xbf16, #tpu.memory_space<vmem>>, %arg2: memref<1024x256xbf16, #tpu.memory_space<vmem>>, %arg3: memref<1x256xf32, #tpu.memory_space<vmem>>, %arg4: memref<256x128xbf16, #tpu.memory_space<vmem>>, %arg5: memref<3x128xf32, #tpu.memory_space<vmem>>, %arg6: memref<256x128xf32, #tpu.memory_space<vmem>>) attributes {dimension_semantics = [#tpu.dimension_semantics<parallel>], iteration_bounds = array<i64: 4>, scalar_prefetch = 0 : i64, scratch_operands = 0 : i64, tpu.core_type = #tpu.core_type<tc>, window_params = [{transform_indices = @transform_0, window_bounds = array<i64: 256, 1024>}, {pipeline_mode = #tpu.pipeline_mode<synchronous>, transform_indices = @transform_1, window_bounds = array<i64: 1024, 256>}, {pipeline_mode = #tpu.pipeline_mode<synchronous>, transform_indices = @transform_2, window_bounds = array<i64: 1, 256>}, {pipeline_mode = #tpu.pipeline_mode<synchronous>, transform_indices = @transform_3, window_bounds = array<i64: 256, 128>}, {pipeline_mode = #tpu.pipeline_mode<synchronous>, transform_indices = @transform_4, window_bounds = array<i64: 3, 128>}, {transform_indices = @transform_5, window_bounds = array<i64: 256, 128>}]} {
    %c0 = arith.constant 0 : index
    %c0_0 = arith.constant 0 : index
    %0 = vector.load %arg1[%c0, %c0_0] : memref<256x1024xbf16, #tpu.memory_space<vmem>>, vector<256x1024xbf16>
    %c0_1 = arith.constant 0 : index
    %c0_2 = arith.constant 0 : index
    %1 = vector.load %arg2[%c0_1, %c0_2] : memref<1024x256xbf16, #tpu.memory_space<vmem>>, vector<1024x256xbf16>
    %cst = arith.constant dense<0.000000e+00> : vector<256x256xf32>
    %2 = tpu.matmul %0, %1, %cst {dimension_numbers = #tpu.dot_dimension_numbers<[1], [0], [0], [1], [0, 0, 1, 1], [], []>} : vector<256x1024xbf16>, vector<1024x256xbf16>, vector<256x256xf32> -> vector<256x256xf32>
    %c0_3 = arith.constant 0 : index
    %c0_4 = arith.constant 0 : index
    %3 = vector.load %arg3[%c0_3, %c0_4] : memref<1x256xf32, #tpu.memory_space<vmem>>, vector<1x256xf32>
    %4 = vector.broadcast %3 : vector<1x256xf32> to vector<256x256xf32>
    %5 = arith.addf %2, %4 : vector<256x256xf32>
    %cst_5 = arith.constant 0.000000e+00 : f32
    %6 = vector.broadcast %cst_5 : f32 to vector<256x256xf32>
    %7 = arith.maximumf %5, %6 : vector<256x256xf32>
    %8 = arith.truncf %7 : vector<256x256xf32> to vector<256x256xbf16>
    %c0_6 = arith.constant 0 : index
    %c0_7 = arith.constant 0 : index
    %9 = vector.load %arg4[%c0_6, %c0_7] : memref<256x128xbf16, #tpu.memory_space<vmem>>, vector<256x128xbf16>
    %cst_8 = arith.constant dense<0.000000e+00> : vector<256x128xf32>
    %10 = tpu.matmul %8, %9, %cst_8 {dimension_numbers = #tpu.dot_dimension_numbers<[1], [0], [0], [1], [0, 0, 1, 1], [], []>} : vector<256x256xbf16>, vector<256x128xbf16>, vector<256x128xf32> -> vector<256x128xf32>
    %c0_9 = arith.constant 0 : index
    %c0_10 = arith.constant 0 : index
    %11 = vector.load %arg5[%c0_9, %c0_10] : memref<3x128xf32, #tpu.memory_space<vmem>>, vector<1x128xf32>
    %12 = vector.broadcast %11 : vector<1x128xf32> to vector<256x128xf32>
    %13 = arith.addf %10, %12 : vector<256x128xf32>
    %cst_11 = arith.constant 0.000000e+00 : f32
    %14 = vector.broadcast %cst_11 : f32 to vector<256x128xf32>
    %15 = arith.maximumf %13, %14 : vector<256x128xf32>
    %c2 = arith.constant 2 : index
    %c0_12 = arith.constant 0 : index
    %16 = vector.load %arg5[%c2, %c0_12] : memref<3x128xf32, #tpu.memory_space<vmem>>, vector<1x128xf32>
    %17 = vector.broadcast %16 : vector<1x128xf32> to vector<256x128xf32>
    %18 = arith.addf %15, %17 : vector<256x128xf32>
    %cst_13 = arith.constant 0.000000e+00 : f32
    %cst_14 = arith.constant 1.000000e+00 : f32
    %19 = vector.broadcast %cst_13 : f32 to vector<256x128xf32>
    %20 = arith.maximumf %19, %18 : vector<256x128xf32>
    %21 = vector.broadcast %cst_14 : f32 to vector<256x128xf32>
    %22 = arith.minimumf %21, %20 : vector<256x128xf32>
    %c0_15 = arith.constant 0 : index
    %c0_16 = arith.constant 0 : index
    %23 = vector.load %arg6[%c0_15, %c0_16] : memref<256x128xf32, #tpu.memory_space<vmem>>, vector<256x128xf32>
    tpu.vector_store %arg6[%c0_15, %c0_16], %22 {strides = array<i32>} : memref<256x128xf32, #tpu.memory_space<vmem>>, vector<256x128xf32>,
    return
  }
  func.func @transform_0(%arg0: i32) -> (i32, i32) {
    %c0_i32 = arith.constant 0 : i32
    %c0_i32_0 = arith.constant 0 : i32
    return %arg0, %c0_i32 : i32, i32
  }
  func.func @transform_1(%arg0: i32) -> (i32, i32) {
    %c0_i32 = arith.constant 0 : i32
    %c0_i32_0 = arith.constant 0 : i32
    %c0_i32_1 = arith.constant 0 : i32
    return %c0_i32, %c0_i32_0 : i32, i32
  }
  func.func @transform_2(%arg0: i32) -> (i32, i32) {
    %c0_i32 = arith.constant 0 : i32
    %c0_i32_0 = arith.constant 0 : i32
    %c0_i32_1 = arith.constant 0 : i32
    return %c0_i32, %c0_i32_0 : i32, i32
  }
  func.func @transform_3(%arg0: i32) -> (i32, i32) {
    %c0_i32 = arith.constant 0 : i32
    %c0_i32_0 = arith.constant 0 : i32
    %c0_i32_1 = arith.constant 0 : i32
    return %c0_i32, %c0_i32_0 : i32, i32
  }
  func.func @transform_4(%arg0: i32) -> (i32, i32) {
    %c0_i32 = arith.constant 0 : i32
    %c0_i32_0 = arith.constant 0 : i32
    %c0_i32_1 = arith.constant 0 : i32
    return %c0_i32, %c0_i32_0 : i32, i32
  }
  func.func @transform_5(%arg0: i32) -> (i32, i32) {
    %c0_i32 = arith.constant 0 : i32
    %c0_i32_0 = arith.constant 0 : i32
    return %arg0, %c0_i32 : i32, i32
  }
}

</mosaic_0001>

<bundles_post_ra>
// kernel: tpu_custom_call.1
= control target key start
LH: loop header
LB: loop body
LE: loop exit
PB: predicated region body
PF: predicated region fallthrough
CT: control target
= control target key end

     0   :  { %10 = vsyncpa [#allocation3], 0  ;;  %s5368_s0 = inlined_call_operand.hbm [shape: bf16[1024,1024], index: 0, kind: input, shape index: {}]   ;;  %s5369_s1 = inlined_call_operand.hbm [shape: bf16[1024,256], index: 1, kind: input, shape index: {}]   ;;  %s5370_s2 = inlined_call_operand.hbm [shape: f32[1,256], index: 2, kind: input, shape index: {}]   ;;  %s5371_s3 = inlined_call_operand.hbm [shape: bf16[256,128], index: 3, kind: input, shape index: {}]   ;;  %s5372_s4 = inlined_call_operand.hbm [shape: f32[3,128], index: 4, kind: input, shape index: {}]   ;;  %s5373_s5 = inlined_call_operand.hbm [shape: f32[1024,128], index: 5, kind: output, shape index: {}]  }
   0x1   :  { %12 = vsyncpa [#allocation3 + $0x1], 0 }
   0x2   :  { %13 = vsyncpa [#allocation6], 0 }
   0x3   :  { %14 = vsyncpa [#allocation9], 0 }
   0x4   :  { %15 = vsyncpa [#allocation4], 0 }
   0x5   :  { %17 = vsyncpa [#allocation4 + $0x1], 0  ;;  %s4298_s18 = smov 0   ;;  %s4300_s19 = smov 0  }
   0x6   :  { %s4302_s20 = smov 0   ;;  %s4304_s21 = smov 0  }
   0x7 LB: > { %s4319_s22 = sadd.s32 4294967295, %s4252_s21   ;;  %s3301_s23 = sadd.s32 4294967294, %s4252_s21   ;;  %s4252_s21 = sphi %s4304_s21, %s5550_s21   ;;  %s4248_s20 = sphi %s4302_s20, %s5549_s20   ;;  %s4244_s19 = sphi %s4300_s19, %s5548_s19   ;;  %s4240_s18 = sphi %s4298_s18, %s5547_s18  }
   0x8   : > { %p43_p0 = scmp.ne.s32.totalorder %s4244_s19, %s4240_s18  ;;  %p5374_p1 = scmp.eq.s32.totalorder %s4319_s22, 0 }
   0x9   : > { %p157_p3 = scmp.eq.s32.totalorder %s3301_s23, 3  ;;  %p3302_p5 = scmp.ge.s32.totalorder %s4252_s21, 1 }
   0xa   : > { %p4328_p4 = por %p5374_p1, %p43_p0  ;;  %p164_p7 = scmp.lt.s32.totalorder %s4252_s21, 5 }
   0xb   : > { %p4333_p6 = por %p157_p3, %p43_p0  ;;  %s4254_s27 = smov [#allocation5]  }
   0xc   : > { %s5378_s24 = scalar_select %p4328_p4, 1, 0 }
   0xd   : > { %s5379_s25 = scalar_select %p4333_p6, 1, 0 }
   0xe   : > { %p4338_p8 = pnand %p3302_p5, %p164_p7  ;;  %s176_s28 = sshll.u32 %s4254_s27, 4  ;;  %s177_s28 = int_to_ptr.vmem [resolvable:$true] %s176_s28 }
   0xf   : > { %s4255_s30 = smov [#allocation8]   ;;  %s4059_s7 = scalar_lea.vmem %s177_s28, 16384 }
  0x10   : > { %s5380_s26 = scalar_select %p4338_p8, 1, 0 }
  0x11   : > { %p3765_p9 = pneg %p4338_p8  ;;  %s200_s6 = sshll.u32 %s4255_s30, 4  ;;  %s201_s6 = int_to_ptr.vmem [resolvable:$true] %s200_s6 }
  0x12   : > { %p4060_p12 = scmp.ne.s32.totalorder %s177_s28, %s4059_s7  ;;  %p4067_p3 = scmp.lt.s32.totalorder %s177_s28, %s177_s28 }
  0x13   : > { %p4346_p10 = pnand %p3765_p9, %p5374_p1  ;;  %p4068_p5 = scmp.lt.s32.totalorder %s4059_s7, %s4059_s7 }
  0x15   : > { %p4050_p11 = pneg %p4346_p10  ;;  %p4069_p7 = por %p4068_p5, %p4067_p3 }
  0x17   : > { %p4062_p13 = pnand %p4060_p12, %p4050_p11 }
  0x19   : > { %p4063_p0 = pneg %p4062_p13 }
  0x1b   : > { %p4070_p9 = pnand %p4069_p7, %p4063_p0 }
  0x1d   : > { %4073 = shalt.err (!%p4070_p9)
}
  0x1e   : > { %s4256_s8 = smov 128   ;;  %s4257_s9 = smov 8  }
  0x1f   : > { %3768 = dma.hbm_to_vmem [thread:$0]  (!%p4346_p10), %s5369_s1, 16384, %s177_s28, [#allocation6], %s4256_s8, %s4256_s8, %s4257_s9  }
  0x20   : > { %s4085_s12 = scalar_lea.vmem %s201_s6, 2048  ;;  %p4093_p2 = scmp.lt.s32.totalorder %s201_s6, %s201_s6 }
  0x21   : > { %p4086_p1 = scmp.ne.s32.totalorder %s201_s6, %s4085_s12  ;;  %p4094_p6 = scmp.lt.s32.totalorder %s4085_s12, %s4085_s12 }
  0x23   : > { %p4088_p12 = pnand %p4086_p1, %p4050_p11  ;;  %p4095_p3 = por %p4094_p6, %p4093_p2 }
  0x25   : > { %p4089_p13 = pneg %p4088_p12 }
  0x27   : > { %p4096_p0 = pnand %p4095_p3, %p4089_p13 }
  0x29   : > { %4099 = shalt.err (!%p4096_p0)
}
  0x2a   : > { %s4258_s13 = smov 64   ;;  %s4259_s14 = smov 4  }
  0x2b   : > { %3774 = dma.hbm_to_vmem [thread:$0]  (!%p4346_p10), %s5371_s3, 2048, %s201_s6, [#allocation9], %s4258_s13, %s4258_s13, %s4259_s14  }
  0x2c   : > { %s4260_s17 = smov [#allocation7]   ;;  %s4261_s27 = smov [#allocation10]  }
  0x2d   : > { %s190_s23 = sshll.u32 %s4260_s17, 4  ;;  %s214_s28 = sshll.u32 %s4261_s27, 4  ;;  %s191_s23 = int_to_ptr.vmem [resolvable:$true] %s190_s23  ;;  %s215_s28 = int_to_ptr.vmem [resolvable:$true] %s214_s28 }
  0x2e   : > { %s4111_s30 = scalar_lea.vmem %s191_s23, 32  ;;  %p4119_p5 = scmp.lt.s32.totalorder %s191_s23, %s191_s23 }
  0x2f   : > { %p4112_p1 = scmp.ne.s32.totalorder %s191_s23, %s4111_s30  ;;  %p4120_p7 = scmp.lt.s32.totalorder %s4111_s30, %s4111_s30 }
  0x31   : > { %p4114_p2 = pnand %p4112_p1, %p4050_p11  ;;  %p4121_p9 = por %p4120_p7, %p4119_p5 }
  0x33   : > { %p4115_p6 = pneg %p4114_p2 }
  0x35   : > { %p4122_p12 = pnand %p4121_p9, %p4115_p6 }
  0x37   : > { %4125 = shalt.err (!%p4122_p12)
}
  0x38   : > { %3771 = dma.hbm_to_vmem [thread:$0]  (!%p4346_p10), %s5370_s2, 32, %s191_s23, [#allocation6]  }
  0x39   : > { %s4137_s8 = scalar_lea.vmem %s215_s28, 64  ;;  %p4145_p1 = scmp.lt.s32.totalorder %s215_s28, %s215_s28 }
  0x3a   : > { %p4138_p13 = scmp.ne.s32.totalorder %s215_s28, %s4137_s8  ;;  %p4146_p2 = scmp.lt.s32.totalorder %s4137_s8, %s4137_s8 }
  0x3c   : > { %p4140_p3 = pnand %p4138_p13, %p4050_p11  ;;  %p4147_p4 = por %p4146_p2, %p4145_p1 }
  0x3e   : > { %p4141_p0 = pneg %p4140_p3 }
  0x40   : > { %p4148_p8 = pnand %p4147_p4, %p4141_p0 }
  0x42   : > { %4151 = shalt.err (!%p4148_p8)
}
  0x43   : > { %3777 = dma.hbm_to_vmem [thread:$0]  (!%p4346_p10), %s5372_s4, 64, %s215_s28, [#allocation9]  }
  0x44   : > { %s4385_s11 = sadd.s32 1, %s4252_s21   ;;  %s30_s29 = sadd.s32 1, %s4248_s20 }
  0x45   : > { %s27_s12 = ssub.s32 %s4252_s21, %s4385_s11  ;;  %p37_p8 = scmp.ne.s32.totalorder %s4248_s20, %s4244_s19 }
  0x46   : > { %p28_p4 = scmp.eq.s32.totalorder %s27_s12, 0  ;;  %p38_p11 = scmp.eq.s32.totalorder %s4252_s21, 0 }
  0x47   : > { %p5382_p5 = scmp.eq.s32.totalorder %s4319_s22, 3  ;;  %p3790_p9 = scmp.lt.s32.totalorder %s4252_s21, 4 }
  0x48   : > { %s4394_s13 = scalar_select %p28_p4, %s4248_s20, %s30_s29  }
  0x49   : > { %p39_p6 = por %p38_p11, %p37_p8  ;;  %p4398_p7 = por %p5382_p5, %p37_p8 }
  0x4a   : > { %s225_s15 = sand.u32 1, %s4248_s20   ;;  %s3599_s17 = sshll.u32 %s4252_s21, 14 }
  0x4b   : > { %s5383_s14 = scalar_select %p4398_p7, 1, 0 }
  0x4c   : > { %s3308_s16 = sshll.u32 %s225_s15, 10  ;;  %s4408_s28 = scalar_lea.hbm %s5368_s0, %s3599_s17 }
  0x4d   : > { %s229_s30 = scalar_lea.vmem [#allocation2], %s3308_s16  ;;  %p4412_p10 = pnand %p3790_p9, %p39_p6 }
  0x4e   : > { %s237_s6 = sshll.u32 %s229_s30, 4  ;;  %s4416_s8 = scalar_lea.sflag [#allocation3], %s225_s15  ;;  %s4410_s6 = int_to_ptr.vmem [resolvable:$true] %s237_s6 }
  0x4f   : > { %s4152_s9 = scalar_lea.hbm %s4408_s28, 16384  ;;  %p4154_p13 = pneg %p4412_p10 }
  0x50   : > { %p4153_p12 = scmp.ne.s32.totalorder %s4408_s28, %s4152_s9  ;;  %s4157_s29 = scalar_lea.hbm %s5368_s0, 65536 }
  0x51   : > { %p4158_p1 = scmp.lt.s32.totalorder %s4408_s28, %s5368_s0  ;;  %p4159_p2 = scmp.lt.s32.totalorder %s4157_s29, %s4152_s9 }
  0x52   : > { %p4155_p3 = pnand %p4154_p13, %p4153_p12 }
  0x53   : > { %p4160_p4 = por %p4159_p2, %p4158_p1 }
  0x54   : > { %p4156_p0 = pneg %p4155_p3 }
  0x56   : > { %p4161_p8 = pnand %p4160_p4, %p4156_p0 }
  0x58   : > { %4164 = shalt.err (!%p4161_p8)
}
  0x59   : > { %s4165_s15 = scalar_lea.vmem %s4410_s6, 16384  ;;  %s4262_s23 = smov [#allocation2]  }
  0x5a   : > { %p4166_p11 = scmp.ne.s32.totalorder %s4410_s6, %s4165_s15  ;;  %s4170_s27 = sshll.u32 %s4262_s23, 4  ;;  %s4171_s27 = int_to_ptr.vmem [resolvable:$false] %s4170_s27 }
  0x5b   : > { %s4172_s30 = scalar_lea.vmem %s4171_s27, 32768  ;;  %p4173_p9 = scmp.lt.s32.totalorder %s4410_s6, %s4171_s27 }
  0x5c   : > { %p4168_p6 = pnand %p4166_p11, %p4154_p13  ;;  %p4174_p12 = scmp.lt.s32.totalorder %s4172_s30, %s4165_s15 }
  0x5e   : > { %p4169_p5 = pneg %p4168_p6  ;;  %p4175_p3 = por %p4174_p12, %p4173_p9 }
  0x60   : > { %p4176_p7 = pnand %p4175_p3, %p4169_p5 }
  0x62   : > { %4179 = shalt.err (!%p4176_p7)
}
  0x63   : > { %s4263_s9 = smov 512   ;;  %s4264_s10 = smov 32  }
  0x64   : > { %3781 = dma.hbm_to_vmem [thread:$0]  (!%p4412_p10), %s4408_s28, 16384, %s4410_s6, %s4416_s8, %s4263_s9, %s4263_s9, %s4264_s10  }
  0x65   : > { %p5385_p13 = scmp.ne.s32.totalorder %s5380_s26, 0 }
  0x67   : > { %249 = sbr.rel (%p5385_p13) target bundleno = 927 (0x39f), region = 40 }
  0x6c   : > { %s4440_s12 = sand.u32 1, %s4244_s19   ;;  %p5386_p7 = scmp.ne.s32.totalorder %s5378_s24, 0 }
  0x6d   : > { %s3313_s29 = sshll.u32 %s4440_s12, 10  ;;  %s252_s16 = scalar_lea.sflag [#allocation3], %s4440_s12 }
  0x6e   : > { %s4444_s17 = scalar_lea.vmem [#allocation2], %s3313_s29 }
  0x6f   : > { %4223 = dma.done.wait (%p5386_p7), %s252_s16, 16384  }
  0x70   : > { %4225 = vsyncadd (%p5386_p7), %s252_s16, 4294950912  ;;  %p5387_p10 = scmp.eq.s32.totalorder %s4319_s22, 0 }
  0x72   : > { %4227 = dma.done.wait (%p5387_p10), [#allocation6], 16416   ;;  %p5388_p0 = pmov %p5387_p10 }
  0x74   : > { %4229 = vsyncadd (%p5388_p0), [#allocation6], 4294950880  ;;  %p5389_p1 = pmov %p5388_p0 }
  0x75   : > { %p5390_p2 = pmov %p5388_p0 }
  0x76   : > { %4231 = dma.done.wait (%p5389_p1), [#allocation9], 2112  }
  0x77   : > { %4233 = vsyncadd (%p5390_p2), [#allocation9], 4294965184  ;;  %v3840_v0 = vld [vmem:[#allocation5 + $0x74] ss:$8 sps:$4 sm:$0xff]   ;;  %v3842_v1 = vld [vmem:[#allocation5 + $0x70] ss:$8 sps:$4 sm:$0xff]  }
  0x78   : > { %3713 = vmatprep.subr.bf16.mxu1 %v3840_v0  ;;  %1849 = vmatprep.subr.bf16.mxu0 %v3840_v0  ;;  %v3843_v2 = vld [vmem:[#allocation5 + $0x64] ss:$8 sps:$4 sm:$0xff]   ;;  %v3845_v3 = vld [vmem:[#allocation5 + $0x60] ss:$8 sps:$4 sm:$0xff]   ;;  %v3846_v4 = vld [vmem:[#allocation5 + $0x54] ss:$8 sps:$4 sm:$0xff]  }
  0x79   : > { %3729 = vmatpush1.bf16.msra.mxu1 %v3842_v1  ;;  %1850 = vmatpush1.bf16.msra.mxu0 %v3842_v1  ;;  %v3848_v5 = vld [vmem:[#allocation5 + $0x50] ss:$8 sps:$4 sm:$0xff]   ;;  %v3849_v6 = vld [vmem:[#allocation5 + $0x44] ss:$8 sps:$4 sm:$0xff]   ;;  %v3851_v7 = vld [vmem:[#allocation5 + $0x40] ss:$8 sps:$4 sm:$0xff]  }
  0x7a   : > { %3714 = vmatprep.subr.bf16.mxu1 %v3843_v2  ;;  %1851 = vmatprep.subr.bf16.mxu0 %v3843_v2  ;;  %v3852_v8 = vld [vmem:[#allocation5 + $0x34] ss:$8 sps:$4 sm:$0xff]   ;;  %v3854_v9 = vld [vmem:[#allocation5 + $0x30] ss:$8 sps:$4 sm:$0xff]   ;;  %v3855_v10 = vld [vmem:[#allocation5 + $0x24] ss:$8 sps:$4 sm:$0xff]  }
  0x7b   : > { %v3857_v11 = vld [vmem:[#allocation5 + $0x20] ss:$8 sps:$4 sm:$0xff]   ;;  %v3858_v12 = vld [vmem:[#allocation5 + $0x14] ss:$8 sps:$4 sm:$0xff]   ;;  %v3860_v16 = vld [vmem:[#allocation5 + $0x10] ss:$8 sps:$4 sm:$0xff]  }
  0x7c   : > { %v4459_v13 = vld [vmem:[%s4444_s17 + $0x200] sm:$0xff]  ;;  %v3864_v22 = vld [vmem:[#allocation5 + $0xf4] ss:$8 sps:$4 sm:$0xff]   ;;  %v3866_v23 = vld [vmem:[#allocation5 + $0xf0] ss:$8 sps:$4 sm:$0xff]   ;;  %s3318_s24 = sshll.u32 %s4440_s12, 8 }
  0x7d   : > { %3730 = vmatpush1.bf16.msra.mxu1 %v3845_v3  ;;  %1852 = vmatpush1.bf16.msra.mxu0 %v3845_v3  ;;  %v4462_v14 = vld [vmem:[%s4444_s17 + $0x220] sm:$0xff]  ;;  %v3870_v26 = vld [vmem:[#allocation5 + $0xd4] ss:$8 sps:$4 sm:$0xff]   ;;  %v3872_v27 = vld [vmem:[#allocation5 + $0xd0] ss:$8 sps:$4 sm:$0xff]   ;;  %s5226_s26 = scalar_lea.vmem [#allocation11], %s3318_s24 }
  0x7e   : > { %3715 = vmatprep.subr.bf16.mxu1 %v3846_v4  ;;  %1853 = vmatprep.subr.bf16.mxu0 %v3846_v4  ;;  %v3384_v15 = vcombine.high %v4459_v13, %v4462_v14  ;;  %v4467_v17 = vld [vmem:[%s4444_s17] sm:$0xff]  ;;  %v3876_v30 = vld [vmem:[#allocation5 + $0xb4] ss:$8 sps:$4 sm:$0xff]   ;;  %v3878_v31 = vld [vmem:[#allocation5 + $0xb0] ss:$8 sps:$4 sm:$0xff]   ;;  %v3383_v43 = vcombine.low %v4459_v13, %v4462_v14  ;;  %s3600_s28 = sshll.u32 %s4319_s22, 12 }
  0x7f   : > { %v4470_v18 = vld [vmem:[%s4444_s17 + $0x20] sm:$0xff]  ;;  %v3882_v34 = vld [vmem:[#allocation5 + $0x94] ss:$8 sps:$4 sm:$0xff]   ;;  %v3884_v35 = vld [vmem:[#allocation5 + $0x90] ss:$8 sps:$4 sm:$0xff]   ;;  %s3190_s6 = sshll.u32 %s5226_s26, 4  ;;  %s5323_s15 = scalar_lea.hbm %s5373_s5, %s3600_s28  ;;  %s5325_s6 = int_to_ptr.vmem [resolvable:$true] %s3190_s6 }
  0x80   : > { %v3861_v19 = vld [vmem:[#allocation5 + $0x4] ss:$8 sps:$4 sm:$0xff]   ;;  %v3320_v20 = vcombine.high %v4467_v17, %v4470_v18  ;;  %1961 = vmatprep.mubr.bf16.mxu1 %v3384_v15  ;;  %v3863_v21 = vld [vmem:[#allocation5] ss:$8 sps:$4 sm:$0xff]   ;;  %v3890_v38 = vld [vmem:[#allocation5 + $0x174] ss:$8 sps:$4 sm:$0xff]   ;;  %v3319_v44 = vcombine.low %v4467_v17, %v4470_v18 }
  0x81   : > { %3731 = vmatpush1.bf16.msra.mxu1 %v3848_v5  ;;  %1854 = vmatpush1.bf16.msra.mxu0 %v3848_v5  ;;  %v3867_v24 = vld [vmem:[#allocation5 + $0xe4] ss:$8 sps:$4 sm:$0xff]   ;;  %v3869_v25 = vld [vmem:[#allocation5 + $0xe0] ss:$8 sps:$4 sm:$0xff]   ;;  %v3893_v39 = vld [vmem:[#allocation5 + $0x274] ss:$8 sps:$4 sm:$0xff]  }
  0x82   : > { %3716 = vmatprep.subr.bf16.mxu1 %v3849_v6  ;;  %1855 = vmatprep.subr.bf16.mxu0 %v3849_v6  ;;  %v3873_v28 = vld [vmem:[#allocation5 + $0xc4] ss:$8 sps:$4 sm:$0xff]   ;;  %v3875_v29 = vld [vmem:[#allocation5 + $0xc0] ss:$8 sps:$4 sm:$0xff]   ;;  %v3888_v46 = vld [vmem:[#allocation5 + $0x170] ss:$8 sps:$4 sm:$0xff]  }
  0x83   : > { %1881 = vmatprep.mubr.bf16.mxu0 %v3320_v20  ;;  %v3879_v32 = vld [vmem:[#allocation5 + $0xa4] ss:$8 sps:$4 sm:$0xff]   ;;  %v3881_v33 = vld [vmem:[#allocation5 + $0xa0] ss:$8 sps:$4 sm:$0xff]   ;;  %v3891_v47 = vld [vmem:[#allocation5 + $0x270] ss:$8 sps:$4 sm:$0xff]  }
  0x84   : > { %v3885_v36 = vld [vmem:[#allocation5 + $0x84] ss:$8 sps:$4 sm:$0xff]   ;;  %v3887_v37 = vld [vmem:[#allocation5 + $0x80] ss:$8 sps:$4 sm:$0xff]   ;;  %v3902_v54 = vld [vmem:[#allocation5 + $0x154] ss:$8 sps:$4 sm:$0xff]  }
  0x85   : > { %3732 = vmatpush1.bf16.msra.mxu1 %v3851_v7  ;;  %1856 = vmatpush1.bf16.msra.mxu0 %v3851_v7  ;;  %v373_v40 = vld [vmem:[%s4444_s17 + $0x240] sm:$0xff]  ;;  %v3905_v55 = vld [vmem:[#allocation5 + $0x254] ss:$8 sps:$4 sm:$0xff]   ;;  %v3900_v56 = vld [vmem:[#allocation5 + $0x150] ss:$8 sps:$4 sm:$0xff]   ;;  %s3177_s23 = scalar_lea.sflag [#allocation4], %s4440_s12 }
  0x86   : > { %3717 = vmatprep.subr.bf16.mxu1 %v3852_v8  ;;  %1857 = vmatprep.subr.bf16.mxu0 %v3852_v8  ;;  %v377_v41 = vld [vmem:[%s4444_s17 + $0x260] sm:$0xff]  ;;  %v3903_v63 = vld [vmem:[#allocation5 + $0x250] ss:$8 sps:$4 sm:$0xff]   ;;  %v3914_v6 = vld [vmem:[#allocation5 + $0x134] ss:$8 sps:$4 sm:$0xff]   ;;  %s4180_s27 = scalar_lea.vmem %s5325_s6, 4096 }
  0x87   : > { %v309_v42 = vld [vmem:[%s4444_s17 + $0x40] sm:$0xff]  ;;  %v3392_v50 = vcombine.high %v373_v40, %v377_v41  ;;  %v3391_v59 = vcombine.low %v373_v40, %v377_v41  ;;  %v3917_v7 = vld [vmem:[#allocation5 + $0x234] ss:$8 sps:$4 sm:$0xff]   ;;  %v3912_v14 = vld [vmem:[#allocation5 + $0x130] ss:$8 sps:$4 sm:$0xff]   ;;  %p4181_p4 = scmp.ne.s32.totalorder %s5325_s6, %s4180_s27  ;;  %p5545_p8 = scmp.ne.s32.totalorder %s5383_s14, 0 }
  0x88   : > { %v313_v45 = vld [vmem:[%s4444_s17 + $0x60] sm:$0xff]  ;;  %v3915_v15 = vld [vmem:[#allocation5 + $0x230] ss:$8 sps:$4 sm:$0xff]   ;;  %s4265_s22 = smov [#allocation11]  }
  0x89   : > { %3733 = vmatpush1.bf16.msra.mxu1 %v3854_v9  ;;  %1858 = vmatpush1.bf16.msra.mxu0 %v3854_v9  ;;  %v3896_v48 = vld [vmem:[#allocation5 + $0x164] ss:$8 sps:$4 sm:$0xff]   ;;  %v3328_v51 = vcombine.high %v309_v42, %v313_v45  ;;  %v3894_v52 = vld [vmem:[#allocation5 + $0x160] ss:$8 sps:$4 sm:$0xff]   ;;  %v3327_v60 = vcombine.low %v309_v42, %v313_v45  ;;  %p4182_p11 = pnand %p4181_p4, %p5545_p8  ;;  %s4184_s30 = sshll.u32 %s4265_s22, 4  ;;  %s4185_s30 = int_to_ptr.vmem [resolvable:$false] %s4184_s30 }
  0x8a   : > { %3718 = vmatprep.subr.bf16.mxu1 %v3855_v10  ;;  %1859 = vmatprep.subr.bf16.mxu0 %v3855_v10  ;;  %v3899_v49 = vld [vmem:[#allocation5 + $0x264] ss:$8 sps:$4 sm:$0xff]   ;;  %v3897_v53 = vld [vmem:[#allocation5 + $0x260] ss:$8 sps:$4 sm:$0xff]   ;;  %s4186_s9 = scalar_lea.vmem %s4185_s30, 8192  ;;  %p4187_p5 = scmp.lt.s32.totalorder %s5325_s6, %s4185_s30 }
  0x8b   : > { %v381_v57 = vld [vmem:[%s4444_s17 + $0x280] sm:$0xff]  ;;  %p4183_p6 = pneg %p4182_p11  ;;  %p4188_p9 = scmp.lt.s32.totalorder %s4186_s9, %s4180_s27 }
  0x8c   : > { %v385_v58 = vld [vmem:[%s4444_s17 + $0x2a0] sm:$0xff] }
  0x8d   : > { %3734 = vmatpush1.bf16.msra.mxu1 %v3857_v11  ;;  %1860 = vmatpush1.bf16.msra.mxu0 %v3857_v11  ;;  %v317_v61 = vld [vmem:[%s4444_s17 + $0x80] sm:$0xff]  ;;  %v3400_v2 = vcombine.high %v381_v57, %v385_v58  ;;  %v3399_v11 = vcombine.low %v381_v57, %v385_v58  ;;  %p4189_p12 = por %p4188_p9, %p4187_p5 }
  0x8e   : > { %3719 = vmatprep.subr.bf16.mxu1 %v3858_v12  ;;  %1861 = vmatprep.subr.bf16.mxu0 %v3858_v12  ;;  %v321_v62 = vld [vmem:[%s4444_s17 + $0xa0] sm:$0xff] }
  0x8f   : > { %v3908_v0 = vld [vmem:[#allocation5 + $0x144] ss:$8 sps:$4 sm:$0xff]   ;;  %v3336_v3 = vcombine.high %v317_v61, %v321_v62  ;;  %v3906_v4 = vld [vmem:[#allocation5 + $0x140] ss:$8 sps:$4 sm:$0xff]   ;;  %v3335_v12 = vcombine.low %v317_v61, %v321_v62  ;;  %v3948_v62 = vld [vmem:[#allocation5 + $0x1d0] ss:$8 sps:$4 sm:$0xff]   ;;  %p4190_p3 = pnand %p4189_p12, %p4183_p6 }
  0x90   : > { %v3911_v1 = vld [vmem:[#allocation5 + $0x244] ss:$8 sps:$4 sm:$0xff]   ;;  %v3909_v5 = vld [vmem:[#allocation5 + $0x240] ss:$8 sps:$4 sm:$0xff]  }
  0x91   : > { %3735 = vmatpush1.bf16.msra.mxu1 %v3860_v16  ;;  %1862 = vmatpush1.bf16.msra.mxu0 %v3860_v16  ;;  %v389_v8 = vld [vmem:[%s4444_s17 + $0x2c0] sm:$0xff] }
  0x92   : > { %3720 = vmatprep.subr.bf16.mxu1 %v3861_v19  ;;  %1863 = vmatprep.subr.bf16.mxu0 %v3861_v19  ;;  %v393_v9 = vld [vmem:[%s4444_s17 + $0x2e0] sm:$0xff] }
  0x93   : > { %v325_v10 = vld [vmem:[%s4444_s17 + $0xc0] sm:$0xff]  ;;  %v3408_v18 = vcombine.high %v389_v8, %v393_v9 }
  0x94   : > { %v329_v13 = vld [vmem:[%s4444_s17 + $0xe0] sm:$0xff] }
  0x95   : > { %3736 = vmatpush1.bf16.msra.mxu1 %v3863_v21  ;;  %1864 = vmatpush1.bf16.msra.mxu0 %v3863_v21  ;;  %v3920_v16 = vld [vmem:[#allocation5 + $0x124] ss:$8 sps:$4 sm:$0xff]   ;;  %v3344_v19 = vcombine.high %v325_v10, %v329_v13  ;;  %v3918_v20 = vld [vmem:[#allocation5 + $0x120] ss:$8 sps:$4 sm:$0xff]  }
  0x96   : > { %3721 = vmatprep.subr.bf16.mxu1 %v3864_v22  ;;  %1865 = vmatprep.subr.bf16.mxu0 %v3864_v22  ;;  %v3923_v17 = vld [vmem:[#allocation5 + $0x224] ss:$8 sps:$4 sm:$0xff]   ;;  %v3921_v21 = vld [vmem:[#allocation5 + $0x220] ss:$8 sps:$4 sm:$0xff]   ;;  %v3926_v22 = vld [vmem:[#allocation5 + $0x114] ss:$8 sps:$4 sm:$0xff]  }
  0x97   : > { %v405_v40 = vld [vmem:[%s4444_s17 + $0x340] sm:$0xff] }
  0x98   : > { %v409_v41 = vld [vmem:[%s4444_s17 + $0x360] sm:$0xff] }
  0x99   : > { %3737 = vmatpush2.bf16.msra.mxu1 %v3866_v23  ;;  %1866 = vmatpush2.bf16.msra.mxu0 %v3866_v23  ;;  %v3929_v23 = vld [vmem:[#allocation5 + $0x214] ss:$8 sps:$4 sm:$0xff]   ;;  %v341_v42 = vld [vmem:[%s4444_s17 + $0x140] sm:$0xff] }
  0x9a   : > { %3722 = vmatprep.subr.bf16.mxu1 %v3867_v24  ;;  %1867 = vmatprep.subr.bf16.mxu0 %v3867_v24  ;;  %v397_v24 = vld [vmem:[%s4444_s17 + $0x300] sm:$0xff] }
  0x9b   : > { %v345_v45 = vld [vmem:[%s4444_s17 + $0x160] sm:$0xff] }
  0x9c   : > { %v417_v57 = vld [vmem:[%s4444_s17 + $0x3a0] sm:$0xff] }
  0x9d   : > { %3738 = vmatpush2.bf16.msra.mxu1 %v3869_v25  ;;  %1868 = vmatpush2.bf16.msra.mxu0 %v3869_v25  ;;  %v401_v25 = vld [vmem:[%s4444_s17 + $0x320] sm:$0xff] }
  0x9e   : > { %3723 = vmatprep.subr.bf16.mxu1 %v3870_v26  ;;  %1869 = vmatprep.subr.bf16.mxu0 %v3870_v26  ;;  %v333_v26 = vld [vmem:[%s4444_s17 + $0x100] sm:$0xff] }
  0x9f   : > { %v349_v58 = vld [vmem:[%s4444_s17 + $0x180] sm:$0xff] }
  0xa0   : > { %v353_v61 = vld [vmem:[%s4444_s17 + $0x1a0] sm:$0xff] }
  0xa1   : > { %3739 = vmatpush2.bf16.msra.mxu1 %v3872_v27  ;;  %1870 = vmatpush2.bf16.msra.mxu0 %v3872_v27  ;;  %v3407_v27 = vcombine.low %v389_v8, %v393_v9  ;;  %v421_v8 = vld [vmem:[%s4444_s17 + $0x3c0] sm:$0xff] }
  0xa2   : > { %3724 = vmatprep.subr.bf16.mxu1 %v3873_v28  ;;  %1871 = vmatprep.subr.bf16.mxu0 %v3873_v28  ;;  %v3343_v28 = vcombine.low %v325_v10, %v329_v13  ;;  %v425_v9 = vld [vmem:[%s4444_s17 + $0x3e0] sm:$0xff] }
  0xa3   : > { %v357_v10 = vld [vmem:[%s4444_s17 + $0x1c0] sm:$0xff] }
  0xa4   : > { %v361_v13 = vld [vmem:[%s4444_s17 + $0x1e0] sm:$0xff] }
  0xa5   : > { %3740 = vmatpush2.bf16.msra.mxu1 %v3875_v29  ;;  %1872 = vmatpush2.bf16.msra.mxu0 %v3875_v29  ;;  %v337_v29 = vld [vmem:[%s4444_s17 + $0x120] sm:$0xff] }
  0xa6   : > { %3725 = vmatprep.subr.bf16.mxu1 %v3876_v30  ;;  %1873 = vmatprep.subr.bf16.mxu0 %v3876_v30  ;;  %v3924_v30 = vld [vmem:[#allocation5 + $0x110] ss:$8 sps:$4 sm:$0xff]  }
  0xa9   : > { %3741 = vmatpush2.bf16.msra.mxu1 %v3878_v31  ;;  %1874 = vmatpush2.bf16.msra.mxu0 %v3878_v31  ;;  %v3927_v31 = vld [vmem:[#allocation5 + $0x210] ss:$8 sps:$4 sm:$0xff]  }
  0xaa   : > { %3726 = vmatprep.subr.bf16.mxu1 %v3879_v32  ;;  %1875 = vmatprep.subr.bf16.mxu0 %v3879_v32  ;;  %v3932_v32 = vld [vmem:[#allocation5 + $0x104] ss:$8 sps:$4 sm:$0xff]  }
  0xad   : > { %3742 = vmatpush2.bf16.msra.mxu1 %v3881_v33  ;;  %1876 = vmatpush2.bf16.msra.mxu0 %v3881_v33  ;;  %v3935_v33 = vld [vmem:[#allocation5 + $0x204] ss:$8 sps:$4 sm:$0xff]  }
  0xae   : > { %3727 = vmatprep.subr.bf16.mxu1 %v3882_v34  ;;  %1877 = vmatprep.subr.bf16.mxu0 %v3882_v34  ;;  %v3416_v34 = vcombine.high %v397_v24, %v401_v25 }
  0xb1   : > { %3743 = vmatpush2.bf16.msra.mxu1 %v3884_v35  ;;  %1878 = vmatpush2.bf16.msra.mxu0 %v3884_v35  ;;  %v3352_v35 = vcombine.high %v333_v26, %v337_v29 }
  0xb2   : > { %3728 = vmatprep.subr.bf16.mxu1 %v3885_v36  ;;  %1879 = vmatprep.subr.bf16.mxu0 %v3885_v36  ;;  %v3930_v36 = vld [vmem:[#allocation5 + $0x100] ss:$8 sps:$4 sm:$0xff]  }
  0xb5   : > { %3744 = vmatpush2.bf16.msra.mxu1 %v3887_v37  ;;  %1880 = vmatpush2.bf16.msra.mxu0 %v3887_v37  ;;  %v3933_v37 = vld [vmem:[#allocation5 + $0x200] ss:$8 sps:$4 sm:$0xff]  }
  0xb6   : > { %2042 = vmatprep.subr.bf16.mxu1 %v3890_v38  ;;  %2235 = vmatprep.subr.bf16.mxu0 %v3893_v39  ;;  %v3938_v38 = vld [vmem:[#allocation5 + $0x1f4] ss:$8 sps:$4 sm:$0xff]  }
  0xb7   : > { %v3941_v39 = vld [vmem:[#allocation5 + $0x2f4] ss:$8 sps:$4 sm:$0xff]  }
  0xb8   : > { %1962 = vmatmul.mubr.bf16.vlgmr.msra.gmra.mxu1 %v3383_v43  ;;  %1882 = vmatmul.mubr.bf16.vlgmr.msra.gmra.mxu0 %v3319_v44  ;;  %v3415_v43 = vcombine.low %v397_v24, %v401_v25  ;;  %v3351_v44 = vcombine.low %v333_v26, %v337_v29  ;;  %v302_v24 = vld [vmem:[%s4444_s17 + $0x8] sm:$0xff]  ;;  %v303_v26 = vld [vmem:[%s4444_s17 + $0x10] sm:$0xff] }
  0xb9   : > { %2043 = vmatpush1.bf16.msra.mxu1 %v3888_v46  ;;  %2236 = vmatpush1.bf16.msra.mxu0 %v3891_v47  ;;  %v3936_v46 = vld [vmem:[#allocation5 + $0x1f0] ss:$8 sps:$4 sm:$0xff]   ;;  %v306_v25 = vld [vmem:[%s4444_s17 + $0x28] sm:$0xff] }
  0xba   : > { %2044 = vmatprep.subr.bf16.mxu1 %v3896_v48  ;;  %2237 = vmatprep.subr.bf16.mxu0 %v3899_v49  ;;  %v3939_v47 = vld [vmem:[#allocation5 + $0x2f0] ss:$8 sps:$4 sm:$0xff]   ;;  %v3944_v48 = vld [vmem:[#allocation5 + $0x1e4] ss:$8 sps:$4 sm:$0xff]  }
  0xbb   : > { %1971 = vmatprep.mubr.bf16.mxu1 %v3392_v50  ;;  %1891 = vmatprep.mubr.bf16.mxu0 %v3328_v51  ;;  %v3947_v49 = vld [vmem:[#allocation5 + $0x2e4] ss:$8 sps:$4 sm:$0xff]   ;;  %v3424_v50 = vcombine.high %v405_v40, %v409_v41  ;;  %v3360_v51 = vcombine.high %v341_v42, %v345_v45  ;;  %v3975_v29 = vld [vmem:[#allocation5 + $0x290] ss:$8 sps:$4 sm:$0xff]  }
  0xbd   : > { %2045 = vmatpush1.bf16.msra.mxu1 %v3894_v52  ;;  %2238 = vmatpush1.bf16.msra.mxu0 %v3897_v53  ;;  %v3942_v52 = vld [vmem:[#allocation5 + $0x1e0] ss:$8 sps:$4 sm:$0xff]  }
  0xbe   : > { %2046 = vmatprep.subr.bf16.mxu1 %v3902_v54  ;;  %2239 = vmatprep.subr.bf16.mxu0 %v3905_v55  ;;  %v3945_v53 = vld [vmem:[#allocation5 + $0x2e0] ss:$8 sps:$4 sm:$0xff]   ;;  %v3950_v54 = vld [vmem:[#allocation5 + $0x1d4] ss:$8 sps:$4 sm:$0xff]  }
  0xbf   : > { %v3953_v55 = vld [vmem:[#allocation5 + $0x2d4] ss:$8 sps:$4 sm:$0xff]  }
  0xc0   : > { %1972 = vmatmul.mubr.bf16.gmra.mxu1 %v3391_v59  ;;  %1892 = vmatmul.mubr.bf16.gmra.mxu0 %v3327_v60  ;;  %v3423_v59 = vcombine.low %v405_v40, %v409_v41  ;;  %v3359_v60 = vcombine.low %v341_v42, %v345_v45  ;;  %v314_v40 = vld [vmem:[%s4444_s17 + $0x68] sm:$0xff]  ;;  %v311_v41 = vld [vmem:[%s4444_s17 + $0x50] sm:$0xff] }
  0xc1   : > { %2047 = vmatpush1.bf16.msra.mxu1 %v3900_v56  ;;  %2240 = vmatpush1.bf16.msra.mxu0 %v3903_v63  ;;  %v413_v56 = vld [vmem:[%s4444_s17 + $0x380] sm:$0xff]  ;;  %v3951_v63 = vld [vmem:[#allocation5 + $0x2d0] ss:$8 sps:$4 sm:$0xff]  }
  0xc2   : > { %2048 = vmatprep.subr.bf16.mxu1 %v3908_v0  ;;  %2241 = vmatprep.subr.bf16.mxu0 %v3911_v1  ;;  %v3956_v0 = vld [vmem:[#allocation5 + $0x1c4] ss:$8 sps:$4 sm:$0xff]   ;;  %v3984_v42 = vld [vmem:[#allocation5 + $0x370] ss:$8 sps:$4 sm:$0xff]  }
  0xc3   : > { %1981 = vmatprep.mubr.bf16.mxu1 %v3400_v2  ;;  %1901 = vmatprep.mubr.bf16.mxu0 %v3336_v3  ;;  %v3959_v1 = vld [vmem:[#allocation5 + $0x2c4] ss:$8 sps:$4 sm:$0xff]   ;;  %v3432_v2 = vcombine.high %v413_v56, %v417_v57  ;;  %v3368_v3 = vcombine.high %v349_v58, %v353_v61 }
  0xc5   : > { %2049 = vmatpush1.bf16.msra.mxu1 %v3906_v4  ;;  %2242 = vmatpush1.bf16.msra.mxu0 %v3909_v5  ;;  %v3954_v4 = vld [vmem:[#allocation5 + $0x1c0] ss:$8 sps:$4 sm:$0xff]  }
  0xc6   : > { %2050 = vmatprep.subr.bf16.mxu1 %v3914_v6  ;;  %2243 = vmatprep.subr.bf16.mxu0 %v3917_v7  ;;  %v3957_v5 = vld [vmem:[#allocation5 + $0x2c0] ss:$8 sps:$4 sm:$0xff]   ;;  %v3962_v6 = vld [vmem:[#allocation5 + $0x1b4] ss:$8 sps:$4 sm:$0xff]  }
  0xc7   : > { %v3965_v7 = vld [vmem:[#allocation5 + $0x2b4] ss:$8 sps:$4 sm:$0xff]  }
  0xc8   : > { %1982 = vmatmul.mubr.bf16.gmra.mxu1 %v3399_v11  ;;  %1902 = vmatmul.mubr.bf16.gmra.mxu0 %v3335_v12  ;;  %v3431_v11 = vcombine.low %v413_v56, %v417_v57  ;;  %v3367_v12 = vcombine.low %v349_v58, %v353_v61  ;;  %v326_v61 = vld [vmem:[%s4444_s17 + $0xc8] sm:$0xff] }
  0xc9   : > { %2051 = vmatpush1.bf16.msra.mxu1 %v3912_v14  ;;  %2244 = vmatpush1.bf16.msra.mxu0 %v3915_v15  ;;  %v3960_v14 = vld [vmem:[#allocation5 + $0x1b0] ss:$8 sps:$4 sm:$0xff]  }
  0xca   : > { %2052 = vmatprep.subr.bf16.mxu1 %v3920_v16  ;;  %2245 = vmatprep.subr.bf16.mxu0 %v3923_v17  ;;  %v3963_v15 = vld [vmem:[#allocation5 + $0x2b0] ss:$8 sps:$4 sm:$0xff]   ;;  %v3968_v16 = vld [vmem:[#allocation5 + $0x1a4] ss:$8 sps:$4 sm:$0xff]  }
  0xcb   : > { %1991 = vmatprep.mubr.bf16.mxu1 %v3408_v18  ;;  %1911 = vmatprep.mubr.bf16.mxu0 %v3344_v19  ;;  %v3971_v17 = vld [vmem:[#allocation5 + $0x2a4] ss:$8 sps:$4 sm:$0xff]   ;;  %v3440_v18 = vcombine.high %v421_v8, %v425_v9  ;;  %v3376_v19 = vcombine.high %v357_v10, %v361_v13 }
  0xcd   : > { %2053 = vmatpush1.bf16.msra.mxu1 %v3918_v20  ;;  %2246 = vmatpush1.bf16.msra.mxu0 %v3921_v21  ;;  %v3966_v20 = vld [vmem:[#allocation5 + $0x1a0] ss:$8 sps:$4 sm:$0xff]  }
  0xce   : > { %2054 = vmatprep.subr.bf16.mxu1 %v3926_v22  ;;  %2247 = vmatprep.subr.bf16.mxu0 %v3929_v23  ;;  %v3969_v21 = vld [vmem:[#allocation5 + $0x2a0] ss:$8 sps:$4 sm:$0xff]   ;;  %v3974_v22 = vld [vmem:[#allocation5 + $0x194] ss:$8 sps:$4 sm:$0xff]  }
  0xcf   : > { %v3977_v23 = vld [vmem:[#allocation5 + $0x294] ss:$8 sps:$4 sm:$0xff]  }
  0xd0   : > { %1992 = vmatmul.mubr.bf16.gmra.mxu1 %v3407_v27  ;;  %1912 = vmatmul.mubr.bf16.gmra.mxu0 %v3343_v28  ;;  %v307_v27 = vld [vmem:[%s4444_s17 + $0x30] sm:$0xff] }
  0xd1   : > { %2055 = vmatpush1.bf16.msra.mxu1 %v3924_v30  ;;  %2248 = vmatpush1.bf16.msra.mxu0 %v3927_v31  ;;  %v3972_v28 = vld [vmem:[#allocation5 + $0x190] ss:$8 sps:$4 sm:$0xff]   ;;  %v3439_v30 = vcombine.low %v421_v8, %v425_v9  ;;  %v3375_v31 = vcombine.low %v357_v10, %v361_v13  ;;  %v3323_v45 = vcombine.low %v303_v26, %v307_v27  ;;  %v4001_v8 = vld [vmem:[#allocation5 + $0x324] ss:$8 sps:$4 sm:$0xff]   ;;  %v3999_v13 = vld [vmem:[#allocation5 + $0x320] ss:$8 sps:$4 sm:$0xff]  }
  0xd2   : > { %2056 = vmatprep.subr.bf16.mxu1 %v3932_v32  ;;  %2249 = vmatprep.subr.bf16.mxu0 %v3935_v33  ;;  %v3980_v32 = vld [vmem:[#allocation5 + $0x184] ss:$8 sps:$4 sm:$0xff]  }
  0xd3   : > { %2001 = vmatprep.mubr.bf16.mxu1 %v3416_v34  ;;  %1921 = vmatprep.mubr.bf16.mxu0 %v3352_v35  ;;  %v3983_v33 = vld [vmem:[#allocation5 + $0x284] ss:$8 sps:$4 sm:$0xff]   ;;  %v3978_v34 = vld [vmem:[#allocation5 + $0x180] ss:$8 sps:$4 sm:$0xff]   ;;  %v3322_v35 = vcombine.high %v302_v24, %v306_v25 }
  0xd4   : > { %v334_v9 = vld [vmem:[%s4444_s17 + $0x108] sm:$0xff] }
  0xd5   : > { %2057 = vmatpush1.bf16.msra.mxu1 %v3930_v36  ;;  %2250 = vmatpush1.bf16.msra.mxu0 %v3933_v37  ;;  %v3324_v36 = vcombine.high %v303_v26, %v307_v27  ;;  %v3981_v37 = vld [vmem:[#allocation5 + $0x280] ss:$8 sps:$4 sm:$0xff]   ;;  %v4010_v26 = vld [vmem:[#allocation5 + $0x3f4] ss:$8 sps:$4 sm:$0xff]  }
  0xd6   : > { %2058 = vmatprep.subr.bf16.mxu1 %v3938_v38  ;;  %2251 = vmatprep.subr.bf16.mxu0 %v3941_v39  ;;  %v3986_v38 = vld [vmem:[#allocation5 + $0x374] ss:$8 sps:$4 sm:$0xff]   ;;  %v310_v39 = vld [vmem:[%s4444_s17 + $0x48] sm:$0xff] }
  0xd7   : > { %v338_v10 = vld [vmem:[%s4444_s17 + $0x128] sm:$0xff] }
  0xd8   : > { %2002 = vmatmul.mubr.bf16.gmra.mxu1 %v3415_v43  ;;  %1922 = vmatmul.mubr.bf16.gmra.mxu0 %v3351_v44  ;;  %v315_v43 = vld [vmem:[%s4444_s17 + $0x70] sm:$0xff]  ;;  %v3321_v44 = vcombine.low %v302_v24, %v306_v25  ;;  %v4005_v25 = vld [vmem:[#allocation5 + $0x300] ss:$8 sps:$4 sm:$0xff]   ;;  %v3353_v27 = vcombine.low %v334_v9, %v338_v10 }
  0xd9   : > { %2059 = vmatpush2.bf16.msra.mxu1 %v3936_v46  ;;  %2252 = vmatpush2.bf16.msra.mxu0 %v3939_v47  ;;  %v3330_v46 = vcombine.high %v310_v39, %v314_v40  ;;  %v3989_v47 = vld [vmem:[#allocation5 + $0x364] ss:$8 sps:$4 sm:$0xff]   ;;  %v3331_v56 = vcombine.low %v311_v41, %v315_v43  ;;  %v347_v24 = vld [vmem:[%s4444_s17 + $0x170] sm:$0xff] }
  0xda   : > { %2060 = vmatprep.subr.bf16.mxu1 %v3944_v48  ;;  %2253 = vmatprep.subr.bf16.mxu0 %v3947_v49  ;;  %v3332_v48 = vcombine.high %v311_v41, %v315_v43  ;;  %v3987_v49 = vld [vmem:[#allocation5 + $0x360] ss:$8 sps:$4 sm:$0xff]   ;;  %v4014_v43 = vld [vmem:[#allocation5 + $0x3d0] ss:$8 sps:$4 sm:$0xff]  }
  0xdb   : > { %2011 = vmatprep.mubr.bf16.mxu1 %v3424_v50  ;;  %1931 = vmatprep.mubr.bf16.mxu0 %v3360_v51  ;;  %v318_v50 = vld [vmem:[%s4444_s17 + $0x88] sm:$0xff] }
  0xdc   : > { %v322_v51 = vld [vmem:[%s4444_s17 + $0xa8] sm:$0xff] }
  0xdd   : > { %2061 = vmatpush2.bf16.msra.mxu1 %v3942_v52  ;;  %2254 = vmatpush2.bf16.msra.mxu0 %v3945_v53  ;;  %v3992_v52 = vld [vmem:[#allocation5 + $0x354] ss:$8 sps:$4 sm:$0xff]   ;;  %v3338_v57 = vcombine.high %v318_v50, %v322_v51 }
  0xde   : > { %2062 = vmatprep.subr.bf16.mxu1 %v3950_v54  ;;  %2255 = vmatprep.subr.bf16.mxu0 %v3953_v55  ;;  %v319_v53 = vld [vmem:[%s4444_s17 + $0x90] sm:$0xff]  ;;  %v3329_v55 = vcombine.low %v310_v39, %v314_v40 }
  0xdf   : > { %v323_v54 = vld [vmem:[%s4444_s17 + $0xb0] sm:$0xff] }
  0xe0   : > { %2012 = vmatmul.mubr.bf16.gmra.mxu1 %v3423_v59  ;;  %1932 = vmatmul.mubr.bf16.gmra.mxu0 %v3359_v60  ;;  %v3340_v58 = vcombine.high %v319_v53, %v323_v54  ;;  %v3990_v59 = vld [vmem:[#allocation5 + $0x350] ss:$8 sps:$4 sm:$0xff]   ;;  %v3995_v60 = vld [vmem:[#allocation5 + $0x344] ss:$8 sps:$4 sm:$0xff]  }
  0xe1   : > { %2063 = vmatpush2.bf16.msra.mxu1 %v3948_v62  ;;  %2256 = vmatpush2.bf16.msra.mxu0 %v3951_v63  ;;  %v330_v62 = vld [vmem:[%s4444_s17 + $0xe8] sm:$0xff] }
  0xe2   : > { %2064 = vmatprep.subr.bf16.mxu1 %v3956_v0  ;;  %2257 = vmatprep.subr.bf16.mxu0 %v3959_v1  ;;  %v3993_v63 = vld [vmem:[#allocation5 + $0x340] ss:$8 sps:$4 sm:$0xff]   ;;  %v327_v0 = vld [vmem:[%s4444_s17 + $0xd0] sm:$0xff] }
  0xe3   : > { %2021 = vmatprep.mubr.bf16.mxu1 %v3432_v2  ;;  %1941 = vmatprep.mubr.bf16.mxu0 %v3368_v3  ;;  %v331_v1 = vld [vmem:[%s4444_s17 + $0xf0] sm:$0xff]  ;;  %v3337_v3 = vcombine.low %v318_v50, %v322_v51 }
  0xe4   : > { %v3998_v2 = vld [vmem:[#allocation5 + $0x334] ss:$8 sps:$4 sm:$0xff]  }
  0xe5   : > { %2065 = vmatpush2.bf16.msra.mxu1 %v3954_v4  ;;  %2258 = vmatpush2.bf16.msra.mxu0 %v3957_v5  ;;  %v3339_v4 = vcombine.low %v319_v53, %v323_v54  ;;  %v3346_v5 = vcombine.high %v326_v61, %v330_v62  ;;  %v4022_v50 = vld [vmem:[#allocation5 + $0x3b4] ss:$8 sps:$4 sm:$0xff]  }
  0xe6   : > { %2066 = vmatprep.subr.bf16.mxu1 %v3962_v6  ;;  %2259 = vmatprep.subr.bf16.mxu0 %v3965_v7  ;;  %v3348_v6 = vcombine.high %v327_v0, %v331_v1  ;;  %v3996_v7 = vld [vmem:[#allocation5 + $0x330] ss:$8 sps:$4 sm:$0xff]  }
  0xe8   : > { %2022 = vmatmul.mubr.bf16.gmra.mxu1 %v3431_v11  ;;  %1942 = vmatmul.mubr.bf16.gmra.mxu0 %v3367_v12  ;;  %v335_v11 = vld [vmem:[%s4444_s17 + $0x110] sm:$0xff] }
  0xe9   : > { %2067 = vmatpush2.bf16.msra.mxu1 %v3960_v14  ;;  %2260 = vmatpush2.bf16.msra.mxu0 %v3963_v15  ;;  %v339_v12 = vld [vmem:[%s4444_s17 + $0x130] sm:$0xff]  ;;  %v3345_v15 = vcombine.low %v326_v61, %v330_v62  ;;  %v4023_v61 = vld [vmem:[#allocation5 + $0x3a0] ss:$8 sps:$4 sm:$0xff]  }
  0xea   : > { %2068 = vmatprep.subr.bf16.mxu1 %v3968_v16  ;;  %2261 = vmatprep.subr.bf16.mxu0 %v3971_v17  ;;  %v4004_v14 = vld [vmem:[#allocation5 + $0x314] ss:$8 sps:$4 sm:$0xff]   ;;  %v3347_v16 = vcombine.low %v327_v0, %v331_v1  ;;  %v3354_v17 = vcombine.high %v334_v9, %v338_v10  ;;  %v4029_v9 = vld [vmem:[#allocation5 + $0x380] ss:$8 sps:$4 sm:$0xff]  }
  0xeb   : > { %2031 = vmatprep.mubr.bf16.mxu1 %v3440_v18  ;;  %1951 = vmatprep.mubr.bf16.mxu0 %v3376_v19  ;;  %v3356_v18 = vcombine.high %v335_v11, %v339_v12  ;;  %v4002_v19 = vld [vmem:[#allocation5 + $0x310] ss:$8 sps:$4 sm:$0xff]   ;;  %v4028_v62 = vld [vmem:[#allocation5 + $0x394] ss:$8 sps:$4 sm:$0xff]  }
  0xed   : > { %2069 = vmatpush2.bf16.msra.mxu1 %v3966_v20  ;;  %2262 = vmatpush2.bf16.msra.mxu0 %v3969_v21  ;;  %v4007_v20 = vld [vmem:[#allocation5 + $0x304] ss:$8 sps:$4 sm:$0xff]  }
  0xee   : > { %2070 = vmatprep.subr.bf16.mxu1 %v3974_v22  ;;  %2263 = vmatprep.subr.bf16.mxu0 %v3977_v23  ;;  %v342_v21 = vld [vmem:[%s4444_s17 + $0x148] sm:$0xff]  ;;  %v343_v23 = vld [vmem:[%s4444_s17 + $0x150] sm:$0xff] }
  0xef   : > { %v346_v22 = vld [vmem:[%s4444_s17 + $0x168] sm:$0xff]  ;;  %v3363_v40 = vcombine.low %v343_v23, %v347_v24 }
  0xf0   : > { %2032 = vmatmul.mubr.bf16.gmra.mxu1 %v3439_v30  ;;  %1952 = vmatmul.mubr.bf16.gmra.mxu0 %v3375_v31  ;;  %v3364_v30 = vcombine.high %v343_v23, %v347_v24  ;;  %v4008_v31 = vld [vmem:[#allocation5 + $0x3f0] ss:$8 sps:$4 sm:$0xff]   ;;  %v3361_v39 = vcombine.low %v342_v21, %v346_v22  ;;  %v394_v23 = vld [vmem:[%s4444_s17 + $0x2e8] sm:$0xff] }
  0xf1   : > { %2071 = vmatpush2.bf16.msra.mxu1 %v3972_v28  ;;  %2264 = vmatpush2.bf16.msra.mxu0 %v3975_v29  ;;  %v3355_v28 = vcombine.low %v335_v11, %v339_v12  ;;  %v3362_v29 = vcombine.high %v342_v21, %v346_v22  ;;  %v390_v22 = vld [vmem:[%s4444_s17 + $0x2c8] sm:$0xff]  ;;  %v391_v24 = vld [vmem:[%s4444_s17 + $0x2d0] sm:$0xff] }
  0xf2   : > { %2072 = vmatprep.subr.bf16.mxu1 %v3980_v32  ;;  %2265 = vmatprep.subr.bf16.mxu0 %v3983_v33  ;;  %v4013_v32 = vld [vmem:[#allocation5 + $0x3e4] ss:$8 sps:$4 sm:$0xff]  }
  0xf3   : > { %2074 = vmatprep.mubr.bf16.mxu1 %v3322_v35  ;;  %2267 = vmatprep.mubr.bf16.mxu0 %v3324_v36  ;;  %v350_v33 = vld [vmem:[%s4444_s17 + $0x188] sm:$0xff]  ;;  %v351_v35 = vld [vmem:[%s4444_s17 + $0x190] sm:$0xff] }
  0xf4   : > { %v355_v36 = vld [vmem:[%s4444_s17 + $0x1b0] sm:$0xff] }
  0xf5   : > { %2073 = vmatpush2.bf16.msra.mxu1 %v3978_v34  ;;  %2266 = vmatpush2.bf16.msra.mxu0 %v3981_v37  ;;  %v354_v34 = vld [vmem:[%s4444_s17 + $0x1a8] sm:$0xff] }
  0xf6   : > { %2428 = vmatprep.subr.bf16.mxu1 %v3986_v38  ;;  %v4011_v37 = vld [vmem:[#allocation5 + $0x3e0] ss:$8 sps:$4 sm:$0xff]   ;;  %v4016_v38 = vld [vmem:[#allocation5 + $0x3d4] ss:$8 sps:$4 sm:$0xff]   ;;  %v3370_v41 = vcombine.high %v350_v33, %v354_v34  ;;  %v3369_v51 = vcombine.low %v350_v33, %v354_v34 }
  0xf7   : > { %v402_v33 = vld [vmem:[%s4444_s17 + $0x328] sm:$0xff]  ;;  %v399_v34 = vld [vmem:[%s4444_s17 + $0x310] sm:$0xff] }
  0xf8   : > { %2075 = vmatmul.mubr.bf16.vlgmr.msra.gmra.mxu1 %v3321_v44  ;;  %2268 = vmatmul.mubr.bf16.vlgmr.msra.gmra.mxu0 %v3323_v45  ;;  %v4019_v44 = vld [vmem:[#allocation5 + $0x3c4] ss:$8 sps:$4 sm:$0xff]  }
  0xf9   : > { %2429 = vmatpush1.bf16.msra.mxu1 %v3984_v42  ;;  %2084 = vmatprep.mubr.bf16.mxu1 %v3330_v46  ;;  %v3372_v42 = vcombine.high %v351_v35, %v355_v36  ;;  %v358_v45 = vld [vmem:[%s4444_s17 + $0x1c8] sm:$0xff] }
  0xfa   : > { %2430 = vmatprep.subr.bf16.mxu1 %v3989_v47  ;;  %2277 = vmatprep.mubr.bf16.mxu0 %v3332_v48  ;;  %v362_v46 = vld [vmem:[%s4444_s17 + $0x1e8] sm:$0xff]  ;;  %v359_v47 = vld [vmem:[%s4444_s17 + $0x1d0] sm:$0xff] }
  0xfb   : > { %v363_v48 = vld [vmem:[%s4444_s17 + $0x1f0] sm:$0xff]  ;;  %v3378_v53 = vcombine.high %v358_v45, %v362_v46 }
  0xfc   : > { %v3380_v54 = vcombine.high %v359_v47, %v363_v48  ;;  %v3379_v0 = vcombine.low %v359_v47, %v363_v48  ;;  %v4034_v48 = vld [vmem:[#allocation8 + $0x70] sm:$0xff]  }
  0xfd   : > { %2431 = vmatpush1.bf16.msra.mxu1 %v3987_v49  ;;  %v4017_v49 = vld [vmem:[#allocation5 + $0x3c0] ss:$8 sps:$4 sm:$0xff]  }
  0xfe   : > { %2432 = vmatprep.subr.bf16.mxu1 %v3992_v52  ;;  %v3371_v52 = vcombine.low %v351_v35, %v355_v36  ;;  %v403_v35 = vld [vmem:[%s4444_s17 + $0x330] sm:$0xff]  ;;  %v3409_v36 = vcombine.low %v390_v22, %v394_v23 }
 0x100   : > { %2085 = vmatmul.mubr.bf16.gmra.mxu1 %v3329_v55  ;;  %2278 = vmatmul.mubr.bf16.gmra.mxu0 %v3331_v56  ;;  %v4020_v55 = vld [vmem:[#allocation5 + $0x3b0] ss:$8 sps:$4 sm:$0xff]   ;;  %v4025_v56 = vld [vmem:[#allocation5 + $0x3a4] ss:$8 sps:$4 sm:$0xff]  }
 0x101   : > { %2094 = vmatprep.mubr.bf16.mxu1 %v3338_v57  ;;  %2287 = vmatprep.mubr.bf16.mxu0 %v3340_v58  ;;  %v366_v57 = vld [vmem:[%s4444_s17 + $0x208] sm:$0xff] }
 0x102   : > { %2433 = vmatpush1.bf16.msra.mxu1 %v3990_v59  ;;  %v370_v58 = vld [vmem:[%s4444_s17 + $0x228] sm:$0xff]  ;;  %v367_v59 = vld [vmem:[%s4444_s17 + $0x210] sm:$0xff] }
 0x103   : > { %2434 = vmatprep.subr.bf16.mxu1 %v3995_v60  ;;  %v371_v60 = vld [vmem:[%s4444_s17 + $0x230] sm:$0xff]  ;;  %v3386_v1 = vcombine.high %v366_v57, %v370_v58  ;;  %v3385_v10 = vcombine.low %v366_v57, %v370_v58  ;;  %v422_v58 = vld [vmem:[%s4444_s17 + $0x3c8] sm:$0xff] }
 0x104   : > { %v3387_v11 = vcombine.low %v367_v59, %v371_v60 }
 0x106   : > { %2435 = vmatpush1.bf16.msra.mxu1 %v3993_v63  ;;  %v3377_v63 = vcombine.low %v358_v45, %v362_v46  ;;  %v3419_v45 = vcombine.low %v399_v34, %v403_v35 }
 0x107   : > { %2436 = vmatprep.subr.bf16.mxu1 %v3998_v2  ;;  %v3388_v2 = vcombine.high %v367_v59, %v371_v60  ;;  %v426_v59 = vld [vmem:[%s4444_s17 + $0x3e8] sm:$0xff]  ;;  %v423_v60 = vld [vmem:[%s4444_s17 + $0x3d0] sm:$0xff] }
 0x108   : > { %2095 = vmatmul.mubr.bf16.gmra.mxu1 %v3337_v3  ;;  %2288 = vmatmul.mubr.bf16.gmra.mxu0 %v3339_v4  ;;  %v4026_v3 = vld [vmem:[#allocation5 + $0x390] ss:$8 sps:$4 sm:$0xff]   ;;  %v4031_v4 = vld [vmem:[#allocation5 + $0x384] ss:$8 sps:$4 sm:$0xff]  }
 0x109   : > { %2104 = vmatprep.mubr.bf16.mxu1 %v3346_v5  ;;  %2297 = vmatprep.mubr.bf16.mxu0 %v3348_v6  ;;  %v374_v5 = vld [vmem:[%s4444_s17 + $0x248] sm:$0xff] }
 0x10a   : > { %2437 = vmatpush1.bf16.msra.mxu1 %v3996_v7  ;;  %v378_v6 = vld [vmem:[%s4444_s17 + $0x268] sm:$0xff]  ;;  %v375_v7 = vld [vmem:[%s4444_s17 + $0x250] sm:$0xff] }
 0x10b   : > { %2438 = vmatprep.subr.bf16.mxu1 %v4001_v8  ;;  %v379_v8 = vld [vmem:[%s4444_s17 + $0x270] sm:$0xff]  ;;  %v3394_v12 = vcombine.high %v374_v5, %v378_v6 }
 0x10e   : > { %2439 = vmatpush1.bf16.msra.mxu1 %v3999_v13  ;;  %v3396_v13 = vcombine.high %v375_v7, %v379_v8 }
 0x10f   : > { %2440 = vmatprep.subr.bf16.mxu1 %v4004_v14  ;;  %v382_v14 = vld [vmem:[%s4444_s17 + $0x288] sm:$0xff] }
 0x110   : > { %2105 = vmatmul.mubr.bf16.gmra.mxu1 %v3345_v15  ;;  %2298 = vmatmul.mubr.bf16.gmra.mxu0 %v3347_v16  ;;  %v386_v15 = vld [vmem:[%s4444_s17 + $0x2a8] sm:$0xff]  ;;  %v383_v16 = vld [vmem:[%s4444_s17 + $0x290] sm:$0xff] }
 0x111   : > { %2114 = vmatprep.mubr.bf16.mxu1 %v3354_v17  ;;  %2307 = vmatprep.mubr.bf16.mxu0 %v3356_v18  ;;  %v387_v17 = vld [vmem:[%s4444_s17 + $0x2b0] sm:$0xff]  ;;  %v3393_v18 = vcombine.low %v374_v5, %v378_v6  ;;  %v304_v5 = vld [vmem:[%s4444_s17 + $0x18] sm:$0xff] }
 0x112   : > { %2441 = vmatpush1.bf16.msra.mxu1 %v4002_v19  ;;  %v3395_v19 = vcombine.low %v375_v7, %v379_v8  ;;  %v3404_v21 = vcombine.high %v383_v16, %v387_v17  ;;  %v308_v6 = vld [vmem:[%s4444_s17 + $0x38] sm:$0xff]  ;;  %v3441_v7 = vcombine.low %v422_v58, %v426_v59 }
 0x113   : > { %2442 = vmatprep.subr.bf16.mxu1 %v4007_v20  ;;  %v3402_v20 = vcombine.high %v382_v14, %v386_v15 }
 0x116   : > { %2443 = vmatpush1.bf16.msra.mxu1 %v4005_v25  ;;  %v395_v25 = vld [vmem:[%s4444_s17 + $0x2f0] sm:$0xff] }
 0x117   : > { %2444 = vmatprep.subr.bf16.mxu1 %v4010_v26  ;;  %v3401_v26 = vcombine.low %v382_v14, %v386_v15  ;;  %v316_v14 = vld [vmem:[%s4444_s17 + $0x78] sm:$0xff] }
 0x118   : > { %2115 = vmatmul.mubr.bf16.gmra.mxu1 %v3353_v27  ;;  %2308 = vmatmul.mubr.bf16.gmra.mxu0 %v3355_v28  ;;  %v3403_v27 = vcombine.low %v383_v16, %v387_v17  ;;  %v3410_v28 = vcombine.high %v390_v22, %v394_v23  ;;  %v3325_v16 = vcombine.low %v304_v5, %v308_v6 }
 0x119   : > { %2124 = vmatprep.mubr.bf16.mxu1 %v3362_v29  ;;  %2317 = vmatprep.mubr.bf16.mxu0 %v3364_v30  ;;  %v3412_v29 = vcombine.high %v391_v24, %v395_v25  ;;  %v4032_v30 = vld [vmem:[#allocation8 + $0x78] sm:$0xff]  }
 0x11a   : > { %2445 = vmatpush2.bf16.msra.mxu1 %v4008_v31  ;;  %v4033_v31 = vld [vmem:[#allocation8 + $0x38] sm:$0xff]   ;;  %3601 = vmatprep.subr.bf16.mxu0 %v4032_v30 }
 0x11b   : > { %2446 = vmatprep.subr.bf16.mxu1 %v4013_v32  ;;  %v398_v32 = vld [vmem:[%s4444_s17 + $0x308] sm:$0xff]  ;;  %3602 = vmatpush3.bf16.msra.mxu0 %v4033_v31 }
 0x11c   : > { %3603 = vmatprep.subr.bf16.mxu0 %v4034_v48 }
 0x11e   : > { %2447 = vmatpush2.bf16.msra.mxu1 %v4011_v37  ;;  %v3411_v37 = vcombine.low %v391_v24, %v395_v25 }
 0x11f   : > { %2448 = vmatprep.subr.bf16.mxu1 %v4016_v38  ;;  %v3418_v38 = vcombine.high %v398_v32, %v402_v33 }
 0x120   : > { %2125 = vmatmul.mubr.bf16.gmra.mxu1 %v3361_v39  ;;  %2318 = vmatmul.mubr.bf16.gmra.mxu0 %v3363_v40  ;;  %v3420_v39 = vcombine.high %v399_v34, %v403_v35  ;;  %v406_v40 = vld [vmem:[%s4444_s17 + $0x348] sm:$0xff] }
 0x121   : > { %2134 = vmatprep.mubr.bf16.mxu1 %v3370_v41  ;;  %2327 = vmatprep.mubr.bf16.mxu0 %v3372_v42  ;;  %v410_v41 = vld [vmem:[%s4444_s17 + $0x368] sm:$0xff]  ;;  %v407_v42 = vld [vmem:[%s4444_s17 + $0x350] sm:$0xff] }
 0x122   : > { %2449 = vmatpush2.bf16.msra.mxu1 %v4014_v43  ;;  %v411_v43 = vld [vmem:[%s4444_s17 + $0x370] sm:$0xff]  ;;  %v3426_v46 = vcombine.high %v406_v40, %v410_v41 }
 0x123   : > { %2450 = vmatprep.subr.bf16.mxu1 %v4019_v44  ;;  %v3417_v44 = vcombine.low %v398_v32, %v402_v33  ;;  %v3428_v47 = vcombine.high %v407_v42, %v411_v43 }
 0x126   : > { %2451 = vmatpush2.bf16.msra.mxu1 %v4017_v49  ;;  %v4035_v49 = vld [vmem:[#allocation8 + $0x30] sm:$0xff]  }
 0x127   : > { %2452 = vmatprep.subr.bf16.mxu1 %v4022_v50  ;;  %v414_v50 = vld [vmem:[%s4444_s17 + $0x388] sm:$0xff]  ;;  %3604 = vmatpush3.bf16.msra.mxu0 %v4035_v49 }
 0x128   : > { %2135 = vmatmul.mubr.bf16.gmra.mxu1 %v3369_v51  ;;  %2328 = vmatmul.mubr.bf16.gmra.mxu0 %v3371_v52  ;;  %v418_v51 = vld [vmem:[%s4444_s17 + $0x3a8] sm:$0xff]  ;;  %v415_v52 = vld [vmem:[%s4444_s17 + $0x390] sm:$0xff] }
 0x129   : > { %2144 = vmatprep.mubr.bf16.mxu1 %v3378_v53  ;;  %2337 = vmatprep.mubr.bf16.mxu0 %v3380_v54  ;;  %v419_v53 = vld [vmem:[%s4444_s17 + $0x3b0] sm:$0xff]  ;;  %v3425_v54 = vcombine.low %v406_v40, %v410_v41 }
 0x12a   : > { %2453 = vmatpush2.bf16.msra.mxu1 %v4020_v55  ;;  %v3427_v55 = vcombine.low %v407_v42, %v411_v43  ;;  %v3436_v57 = vcombine.high %v415_v52, %v419_v53  ;;  %v328_v43 = vld [vmem:[%s4444_s17 + $0xd8] sm:$0xff] }
 0x12b   : > { %2454 = vmatprep.subr.bf16.mxu1 %v4025_v56  ;;  %v3434_v56 = vcombine.high %v414_v50, %v418_v51 }
 0x12e   : > { %2455 = vmatpush2.bf16.msra.mxu1 %v4023_v61  ;;  %v427_v61 = vld [vmem:[%s4444_s17 + $0x3f0] sm:$0xff] }
 0x12f   : > { %2456 = vmatprep.subr.bf16.mxu1 %v4028_v62  ;;  %v3433_v62 = vcombine.low %v414_v50, %v418_v51  ;;  %v3443_v8 = vcombine.low %v423_v60, %v427_v61 }
 0x130   : > { %2145 = vmatmul.mubr.bf16.gmra.mxu1 %v3377_v63  ;;  %2338 = vmatmul.mubr.bf16.gmra.mxu0 %v3379_v0  ;;  %v3435_v63 = vcombine.low %v415_v52, %v419_v53  ;;  %v3442_v0 = vcombine.high %v422_v58, %v426_v59 }
 0x131   : > { %2154 = vmatprep.mubr.bf16.mxu1 %v3386_v1  ;;  %2347 = vmatprep.mubr.bf16.mxu0 %v3388_v2  ;;  %v3444_v1 = vcombine.high %v423_v60, %v427_v61  ;;  %v4036_v2 = vld [vmem:[#allocation8 + $0x68] sm:$0xff]   ;;  %v336_v61 = vld [vmem:[%s4444_s17 + $0x118] sm:$0xff] }
 0x132   : > { %2457 = vmatpush2.bf16.msra.mxu1 %v4026_v3  ;;  %v4037_v3 = vld [vmem:[#allocation8 + $0x28] sm:$0xff]   ;;  %3605 = vmatprep.subr.bf16.mxu0 %v4036_v2 }
 0x133   : > { %2458 = vmatprep.subr.bf16.mxu1 %v4031_v4  ;;  %v559_v4 = vlaneseq  ;;  %3606 = vmatpush3.bf16.msra.mxu0 %v4037_v3 }
 0x136   : > { %2459 = vmatpush2.bf16.msra.mxu1 %v4029_v9  ;;  %v3326_v9 = vcombine.high %v304_v5, %v308_v6 }
 0x138   : > { %2155 = vmatmul.mubr.bf16.gmra.mxu1 %v3385_v10  ;;  %2348 = vmatmul.mubr.bf16.gmra.mxu0 %v3387_v11  ;;  %v560_v10 = vshrl.u32 %v559_v4, 7 }
 0x139   : > { %2164 = vmatprep.mubr.bf16.mxu1 %v3394_v12  ;;  %2357 = vmatprep.mubr.bf16.mxu0 %v3396_v13  ;;  %v557_v12 = vld [vmem:[#allocation7] sm:$0x3]  ;;  %v312_v13 = vld [vmem:[%s4444_s17 + $0x58] sm:$0xff] }
 0x13a   : > { %v561_v11 = vsub.s32 0, %v560_v10  ;;  %v565_v15 = vsub.s32 1, %v560_v10  ;;  %v3333_v32 = vcombine.low %v312_v13, %v316_v14 }
 0x13c   : > { %v4574_v17 = vrot.slane %v557_v12, %v561_v11 }
 0x140   : > { %2165 = vmatmul.mubr.bf16.gmra.mxu1 %v3393_v18  ;;  %2358 = vmatmul.mubr.bf16.gmra.mxu0 %v3395_v19  ;;  %v3334_v18 = vcombine.high %v312_v13, %v316_v14  ;;  %v4576_v19 = vrot.slane %v557_v12, %v565_v15  ;;  %v344_v13 = vld [vmem:[%s4444_s17 + $0x158] sm:$0xff] }
 0x141   : > { %2174 = vmatprep.mubr.bf16.mxu1 %v3402_v20  ;;  %2367 = vmatprep.mubr.bf16.mxu0 %v3404_v21  ;;  %v4038_v20 = vld [vmem:[#allocation8 + $0x60] sm:$0xff]   ;;  %v348_v14 = vld [vmem:[%s4444_s17 + $0x178] sm:$0xff] }
 0x142   : > { %v4039_v21 = vld [vmem:[#allocation8 + $0x20] sm:$0xff]   ;;  %3607 = vmatprep.subr.bf16.mxu0 %v4038_v20 }
 0x143   : > { %3608 = vmatpush3.bf16.msra.mxu0 %v4039_v21 }
 0x148   : > { %2175 = vmatmul.mubr.bf16.gmra.mxu1 %v3401_v26  ;;  %2368 = vmatmul.mubr.bf16.gmra.mxu0 %v3403_v27  ;;  %v320_v27 = vld [vmem:[%s4444_s17 + $0x98] sm:$0xff] }
 0x149   : > { %2184 = vmatprep.mubr.bf16.mxu1 %v3410_v28  ;;  %2377 = vmatprep.mubr.bf16.mxu0 %v3412_v29  ;;  %v324_v28 = vld [vmem:[%s4444_s17 + $0xb8] sm:$0xff] }
 0x14a   : > { %v3342_v34 = vcombine.high %v320_v27, %v324_v28  ;;  %v3341_v48 = vcombine.low %v320_v27, %v324_v28 }
 0x150   : > { %2185 = vmatmul.mubr.bf16.gmra.mxu1 %v3409_v36  ;;  %2378 = vmatmul.mubr.bf16.gmra.mxu0 %v3411_v37 }
 0x151   : > { %2194 = vmatprep.mubr.bf16.mxu1 %v3418_v38  ;;  %2387 = vmatprep.mubr.bf16.mxu0 %v3420_v39 }
 0x158   : > { %2195 = vmatmul.mubr.bf16.gmra.mxu1 %v3417_v44  ;;  %2388 = vmatmul.mubr.bf16.gmra.mxu0 %v3419_v45  ;;  %v332_v44 = vld [vmem:[%s4444_s17 + $0xf8] sm:$0xff] }
 0x159   : > { %2204 = vmatprep.mubr.bf16.mxu1 %v3426_v46  ;;  %2397 = vmatprep.mubr.bf16.mxu0 %v3428_v47  ;;  %v3350_v50 = vcombine.high %v328_v43, %v332_v44  ;;  %v3349_v2 = vcombine.low %v328_v43, %v332_v44  ;;  %v352_v44 = vld [vmem:[%s4444_s17 + $0x198] sm:$0xff] }
 0x160   : > { %2205 = vmatmul.mubr.bf16.gmra.mxu1 %v3425_v54  ;;  %2398 = vmatmul.mubr.bf16.gmra.mxu0 %v3427_v55  ;;  %v4040_v54 = vld [vmem:[#allocation8 + $0x58] sm:$0xff]  }
 0x161   : > { %2214 = vmatprep.mubr.bf16.mxu1 %v3434_v56  ;;  %2407 = vmatprep.mubr.bf16.mxu0 %v3436_v57  ;;  %v4041_v55 = vld [vmem:[#allocation8 + $0x18] sm:$0xff]  }
 0x162   : > { %3609 = vmatprep.subr.bf16.mxu0 %v4040_v54  ;;  %v3365_v54 = vcombine.low %v344_v13, %v348_v14 }
 0x163   : > { %3610 = vmatpush3.bf16.msra.mxu0 %v4041_v55 }
 0x168   : > { %2215 = vmatmul.mubr.bf16.gmra.mxu1 %v3433_v62  ;;  %2408 = vmatmul.mubr.bf16.gmra.mxu0 %v3435_v63  ;;  %v340_v62 = vld [vmem:[%s4444_s17 + $0x138] sm:$0xff] }
 0x169   : > { %2224 = vmatprep.mubr.bf16.mxu1 %v3442_v0  ;;  %2417 = vmatprep.mubr.bf16.mxu0 %v3444_v1  ;;  %v3358_v4 = vcombine.high %v336_v61, %v340_v62  ;;  %v3357_v20 = vcombine.low %v336_v61, %v340_v62 }
 0x170   : > { %2225 = vmatmul.mubr.bf16.gmra.mxu1 %v3441_v7  ;;  %2418 = vmatmul.mubr.bf16.gmra.mxu0 %v3443_v8 }
 0x171   : > { %2460 = vmatprep.mubr.bf16.mxu1 %v3326_v9 }
 0x178   : > { %v1963_v22 = vpop.f32.mrf.mxu1  ;;  %2461 = vmatmul.mubr.bf16.vlgmr.msra.gmra.mxu1 %v3325_v16  ;;  %v4578_v23 = vpop.f32.mrf.mxu0 }
 0x179   : > { %v4581_v24 = vadd.f32 %v1963_v22, %v4574_v17  ;;  %2470 = vmatprep.mubr.bf16.mxu1 %v3334_v18  ;;  %v3366_v22 = vcombine.high %v344_v13, %v348_v14  ;;  %v364_v13 = vld [vmem:[%s4444_s17 + $0x1f8] sm:$0xff] }
 0x17a   : > { %v1965_v25 = vpop.f32.mrf.mxu1  ;;  %v4583_v26 = vpop.f32.mrf.mxu0 }
 0x17b   : > { %v4588_v29 = vadd.f32 %v1965_v25, %v4576_v19 }
 0x17c   : > { %v1967_v30 = vpop.f32.mrf.mxu1  ;;  %v4590_v31 = vpop.f32.mrf.mxu0 }
 0x17d   : > { %v4593_v33 = vadd.f32 %v1967_v30, %v4574_v17  ;;  %v4042_v30 = vld [vmem:[#allocation8 + $0x50] sm:$0xff]  }
 0x17e   : > { %v1969_v35 = vpop.f32.mrf.mxu1  ;;  %v4595_v36 = vpop.f32.mrf.mxu0  ;;  %3611 = vmatprep.subr.bf16.mxu0 %v4042_v30 }
 0x17f   : > { %5391 = vst [vmem:[#allocation16_spill] sm:$0xff] %v4595_v36  ;;  %v4598_v37 = vadd.f32 %v1969_v35, %v4576_v19 }
 0x180   : > { %v1973_v38 = vpop.f32.mrf.mxu1  ;;  %2471 = vmatmul.mubr.bf16.gmra.mxu1 %v3333_v32  ;;  %v4600_v39 = vpop.f32.mrf.mxu0  ;;  %v4043_v32 = vld [vmem:[#allocation8 + $0x10] sm:$0xff]  }
 0x181   : > { %v4603_v40 = vadd.f32 %v1973_v38, %v4574_v17  ;;  %2480 = vmatprep.mubr.bf16.mxu1 %v3342_v34  ;;  %3612 = vmatpush3.bf16.msra.mxu0 %v4043_v32 }
 0x182   : > { %v1975_v41 = vpop.f32.mrf.mxu1  ;;  %v4605_v42 = vpop.f32.mrf.mxu0 }
 0x183   : > { %v4610_v45 = vadd.f32 %v1975_v41, %v4576_v19 }
 0x184   : > { %v1977_v46 = vpop.f32.mrf.mxu1  ;;  %v4612_v47 = vpop.f32.mrf.mxu0 }
 0x185   : > { %5392 = vst [vmem:[#allocation17_spill] sm:$0xff] %v4612_v47  ;;  %v4615_v49 = vadd.f32 %v1977_v46, %v4574_v17  ;;  %v356_v46 = vld [vmem:[%s4444_s17 + $0x1b8] sm:$0xff] }
 0x186   : > { %v1979_v51 = vpop.f32.mrf.mxu1  ;;  %v4617_v52 = vpop.f32.mrf.mxu0 }
 0x187   : > { %5393 = vst [vmem:[#allocation18_spill] sm:$0xff] %v4617_v52  ;;  %v4620_v53 = vadd.f32 %v1979_v51, %v4576_v19 }
 0x188   : > { %v1983_v56 = vpop.f32.mrf.mxu1  ;;  %2481 = vmatmul.mubr.bf16.gmra.mxu1 %v3341_v48  ;;  %v4622_v57 = vpop.f32.mrf.mxu0 }
 0x189   : > { %v4625_v58 = vadd.f32 %v1983_v56, %v4574_v17  ;;  %2490 = vmatprep.mubr.bf16.mxu1 %v3350_v50  ;;  %v3374_v56 = vcombine.high %v352_v44, %v356_v46 }
 0x18a   : > { %v1985_v59 = vpop.f32.mrf.mxu1  ;;  %v4627_v60 = vpop.f32.mrf.mxu0 }
 0x18b   : > { %v4632_v63 = vadd.f32 %v1985_v59, %v4576_v19 }
 0x18c   : > { %v1987_v0 = vpop.f32.mrf.mxu1  ;;  %v4634_v1 = vpop.f32.mrf.mxu0 }
 0x18d   : > { %5394 = vst [vmem:[#allocation19_spill] sm:$0xff] %v4634_v1  ;;  %v4637_v3 = vadd.f32 %v1987_v0, %v4574_v17 }
 0x18e   : > { %v1989_v5 = vpop.f32.mrf.mxu1  ;;  %v4639_v6 = vpop.f32.mrf.mxu0 }
 0x18f   : > { %5395 = vst [vmem:[#allocation20_spill] sm:$0xff] %v4639_v6  ;;  %v4642_v7 = vadd.f32 %v1989_v5, %v4576_v19 }
 0x190   : > { %v1993_v8 = vpop.f32.mrf.mxu1  ;;  %2491 = vmatmul.mubr.bf16.gmra.mxu1 %v3349_v2  ;;  %v4644_v9 = vpop.f32.mrf.mxu0 }
 0x191   : > { %v4647_v10 = vadd.f32 %v1993_v8, %v4574_v17  ;;  %2500 = vmatprep.mubr.bf16.mxu1 %v3358_v4 }
 0x192   : > { %v1995_v11 = vpop.f32.mrf.mxu1  ;;  %v4649_v12 = vpop.f32.mrf.mxu0 }
 0x193   : > { %v4654_v15 = vadd.f32 %v1995_v11, %v4576_v19  ;;  %v360_v11 = vld [vmem:[%s4444_s17 + $0x1d8] sm:$0xff] }
 0x194   : > { %v1997_v16 = vpop.f32.mrf.mxu1  ;;  %v4656_v18 = vpop.f32.mrf.mxu0  ;;  %v3382_v30 = vcombine.high %v360_v11, %v364_v13 }
 0x195   : > { %5396 = vst [vmem:[#allocation21_spill] sm:$0xff] %v4656_v18  ;;  %v4659_v21 = vadd.f32 %v1997_v16, %v4574_v17 }
 0x196   : > { %v1999_v25 = vpop.f32.mrf.mxu1  ;;  %v4661_v27 = vpop.f32.mrf.mxu0 }
 0x197   : > { %5397 = vst [vmem:[#allocation22_spill] sm:$0xff] %v4661_v27  ;;  %v4664_v28 = vadd.f32 %v1999_v25, %v4576_v19 }
 0x198   : > { %v2003_v34 = vpop.f32.mrf.mxu1  ;;  %2501 = vmatmul.mubr.bf16.gmra.mxu1 %v3357_v20  ;;  %v4666_v35 = vpop.f32.mrf.mxu0 }
 0x199   : > { %v4669_v38 = vadd.f32 %v2003_v34, %v4574_v17  ;;  %2510 = vmatprep.mubr.bf16.mxu1 %v3366_v22  ;;  %v3373_v22 = vcombine.low %v352_v44, %v356_v46 }
 0x19a   : > { %v2005_v41 = vpop.f32.mrf.mxu1  ;;  %v4671_v43 = vpop.f32.mrf.mxu0 }
 0x19b   : > { %v4676_v48 = vadd.f32 %v2005_v41, %v4576_v19 }
 0x19c   : > { %v2007_v50 = vpop.f32.mrf.mxu1  ;;  %v4678_v51 = vpop.f32.mrf.mxu0 }
 0x19d   : > { %5398 = vst [vmem:[#allocation23_spill] sm:$0xff] %v4678_v51  ;;  %v4681_v55 = vadd.f32 %v2007_v50, %v4574_v17  ;;  %v4044_v50 = vld [vmem:[#allocation8 + $0x48] sm:$0xff]  }
 0x19e   : > { %v2009_v59 = vpop.f32.mrf.mxu1  ;;  %v4683_v61 = vpop.f32.mrf.mxu0  ;;  %3613 = vmatprep.subr.bf16.mxu0 %v4044_v50 }
 0x19f   : > { %5399 = vst [vmem:[#allocation24_spill] sm:$0xff] %v4683_v61  ;;  %v4686_v62 = vadd.f32 %v2009_v59, %v4576_v19 }
 0x1a0   : > { %v2013_v0 = vpop.f32.mrf.mxu1  ;;  %2511 = vmatmul.mubr.bf16.gmra.mxu1 %v3365_v54  ;;  %v4688_v2 = vpop.f32.mrf.mxu0  ;;  %v4045_v54 = vld [vmem:[#allocation8 + $0x8] sm:$0xff]  }
 0x1a1   : > { %v4691_v4 = vadd.f32 %v2013_v0, %v4574_v17  ;;  %2520 = vmatprep.mubr.bf16.mxu1 %v3374_v56  ;;  %3614 = vmatpush3.bf16.msra.mxu0 %v4045_v54 }
 0x1a2   : > { %v2015_v5 = vpop.f32.mrf.mxu1  ;;  %v4693_v8 = vpop.f32.mrf.mxu0 }
 0x1a3   : > { %v4698_v14 = vadd.f32 %v2015_v5, %v4576_v19  ;;  %v368_v5 = vld [vmem:[%s4444_s17 + $0x218] sm:$0xff] }
 0x1a4   : > { %v2017_v16 = vpop.f32.mrf.mxu1  ;;  %v4700_v20 = vpop.f32.mrf.mxu0 }
 0x1a5   : > { %5400 = vst [vmem:[#allocation25_spill] sm:$0xff] %v4700_v20  ;;  %v4703_v25 = vadd.f32 %v2017_v16, %v4574_v17  ;;  %v372_v16 = vld [vmem:[%s4444_s17 + $0x238] sm:$0xff]  ;;  %v3381_v20 = vcombine.low %v360_v11, %v364_v13 }
 0x1a6   : > { %v2019_v32 = vpop.f32.mrf.mxu1  ;;  %v4705_v34 = vpop.f32.mrf.mxu0  ;;  %v376_v13 = vld [vmem:[%s4444_s17 + $0x258] sm:$0xff] }
 0x1a7   : > { %5401 = vst [vmem:[#allocation26_spill] sm:$0xff] %v4705_v34  ;;  %v4708_v41 = vadd.f32 %v2019_v32, %v4576_v19 }
 0x1a8   : > { %v2023_v56 = vpop.f32.mrf.mxu1  ;;  %2521 = vmatmul.mubr.bf16.gmra.mxu1 %v3373_v22  ;;  %v4710_v59 = vpop.f32.mrf.mxu0 }
 0x1a9   : > { %v4713_v44 = vadd.f32 %v2023_v56, %v4574_v17  ;;  %2530 = vmatprep.mubr.bf16.mxu1 %v3382_v30  ;;  %v3390_v30 = vcombine.high %v368_v5, %v372_v16 }
 0x1aa   : > { %v2025_v46 = vpop.f32.mrf.mxu1  ;;  %v4715_v0 = vpop.f32.mrf.mxu0 }
 0x1ab   : > { %v4720_v32 = vadd.f32 %v2025_v46, %v4576_v19 }
 0x1ac   : > { %v2027_v34 = vpop.f32.mrf.mxu1  ;;  %v4722_v22 = vpop.f32.mrf.mxu0 }
 0x1ad   : > { %5402 = vst [vmem:[#allocation27_spill] sm:$0xff] %v4722_v22  ;;  %v4725_v56 = vadd.f32 %v2027_v34, %v4574_v17  ;;  %v380_v34 = vld [vmem:[%s4444_s17 + $0x278] sm:$0xff] }
 0x1ae   : > { %v2029_v50 = vpop.f32.mrf.mxu1  ;;  %v4727_v61 = vpop.f32.mrf.mxu0 }
 0x1af   : > { %5403 = vst [vmem:[#allocation28_spill] sm:$0xff] %v4727_v61  ;;  %v4730_v51 = vadd.f32 %v2029_v50, %v4576_v19  ;;  %v3389_v50 = vcombine.low %v368_v5, %v372_v16  ;;  %v4047_v5 = vld [vmem:[#allocation8] sm:$0xff]  }
 0x1b0   : > { %v2033_v54 = vpop.f32.mrf.mxu1  ;;  %2531 = vmatmul.mubr.bf16.gmra.mxu1 %v3381_v20  ;;  %v4732_v46 = vpop.f32.mrf.mxu0  ;;  %v1884_v20 = vadd.f32 %v4578_v23, %v4574_v17 }
 0x1b1   : > { %v4735_v27 = vadd.f32 %v2033_v54, %v4574_v17  ;;  %2540 = vmatprep.mubr.bf16.mxu1 %v3390_v30  ;;  %v3398_v30 = vcombine.high %v376_v13, %v380_v34 }
 0x1b2   : > { %v2035_v22 = vpop.f32.mrf.mxu1  ;;  %v4737_v11 = vpop.f32.mrf.mxu0 }
 0x1b3   : > { %v4742_v18 = vadd.f32 %v2035_v22, %v4576_v19  ;;  %v1886_v22 = vadd.f32 %v4583_v26, %v4576_v19 }
 0x1b4   : > { %v2037_v61 = vpop.f32.mrf.mxu1  ;;  %v4744_v6 = vpop.f32.mrf.mxu0 }
 0x1b5   : > { %5404 = vst [vmem:[#allocation29_spill] sm:$0xff] %v4742_v18  ;;  %5405 = vst [vmem:[#allocation30_spill] sm:$0xff] %v4744_v6  ;;  %v4749_v1 = vadd.f32 %v2037_v61, %v4574_v17  ;;  %v4046_v6 = vld [vmem:[#allocation8 + $0x40] sm:$0xff]   ;;  %v388_v18 = vld [vmem:[%s4444_s17 + $0x2b8] sm:$0xff] }
 0x1b6   : > { %v2039_v54 = vpop.f32.mrf.mxu1  ;;  %v4751_v52 = vpop.f32.mrf.mxu0  ;;  %3615 = vmatprep.subr.bf16.mxu0 %v4046_v6 }
 0x1b7   : > { %5406 = vst [vmem:[#allocation31_spill] sm:$0xff] %v4749_v1  ;;  %5407 = vst [vmem:[#allocation32_spill] sm:$0xff] %v4751_v52  ;;  %v4756_v47 = vadd.f32 %v2039_v54, %v4576_v19  ;;  %v384_v52 = vld [vmem:[%s4444_s17 + $0x298] sm:$0xff]  ;;  %3616 = vmatpush3.bf16.msra.mxu0 %v4047_v5 }
 0x1b8   : > { %v2076_v16 = vpop.f32.mrf.mxu1  ;;  %2541 = vmatmul.mubr.bf16.gmra.mxu1 %v3389_v50  ;;  %v4758_v23 = vpop.f32.mrf.mxu0  ;;  %v1894_v50 = vadd.f32 %v4600_v39, %v4574_v17 }
 0x1b9   : > { %5408 = vst [vmem:[#allocation33_spill] sm:$0xff] %v4756_v47  ;;  %v4760_v61 = vadd.f32 %v2076_v16, %v1884_v20  ;;  %2550 = vmatprep.mubr.bf16.mxu1 %v3398_v30  ;;  %v3397_v47 = vcombine.low %v376_v13, %v380_v34  ;;  %v3406_v20 = vcombine.high %v384_v52, %v388_v18  ;;  %v392_v13 = vld [vmem:[%s4444_s17 + $0x2d8] sm:$0xff] }
 0x1ba   : > { %v2078_v1 = vpop.f32.mrf.mxu1  ;;  %v4762_v36 = vpop.f32.mrf.mxu0  ;;  %v1896_v30 = vadd.f32 %v4605_v42, %v4576_v19  ;;  %v396_v34 = vld [vmem:[%s4444_s17 + $0x2f8] sm:$0xff]  ;;  %v1904_v42 = vadd.f32 %v4622_v57, %v4574_v17 }
 0x1bb   : > { %5409 = vst [vmem:[#allocation34_spill] sm:$0xff] %v4762_v36  ;;  %v4766_v26 = vadd.f32 %v2078_v1, %v1886_v22 }
 0x1bc   : > { %v4768_v54 = vpop.f32.mrf.mxu1  ;;  %v4774_v6 = vpop.f32.mrf.mxu0 }
 0x1bd   : > { %5410 = vst [vmem:[#allocation35_spill] sm:$0xff] %v4766_v26  ;;  %5412 = vst [vmem:[#allocation37_spill] sm:$0xff] %v4774_v6  ;;  %v3405_v6 = vcombine.low %v384_v52, %v388_v18  ;;  %v400_v52 = vld [vmem:[%s4444_s17 + $0x318] sm:$0xff] }
 0x1be   : > { %v4772_v16 = vpop.f32.mrf.mxu1  ;;  %v4780_v1 = vpop.f32.mrf.mxu0  ;;  %v404_v18 = vld [vmem:[%s4444_s17 + $0x338] sm:$0xff] }
 0x1bf   : > { %5411 = vst [vmem:[#allocation36_spill] sm:$0xff] %v4772_v16  ;;  %v3414_v16 = vcombine.high %v392_v13, %v396_v34 }
 0x1c0   : > { %v2086_v36 = vpop.f32.mrf.mxu1  ;;  %2551 = vmatmul.mubr.bf16.gmra.mxu1 %v3397_v47  ;;  %v4790_v47 = vpop.f32.mrf.mxu0 }
 0x1c1   : > { %v4778_v5 = vadd.f32 %v2086_v36, %v1894_v50  ;;  %2560 = vmatprep.mubr.bf16.mxu1 %v3406_v20  ;;  %5415 = vst [vmem:[#allocation40_spill] sm:$0xff] %v4790_v47  ;;  %v1906_v50 = vadd.f32 %v4627_v60, %v4576_v19  ;;  %v1914_v60 = vadd.f32 %v4644_v9, %v4574_v17 }
 0x1c2   : > { %v2088_v22 = vpop.f32.mrf.mxu1  ;;  %v3422_v47 = vcombine.high %v400_v52, %v404_v18 }
 0x1c3   : > { %5413 = vst [vmem:[#allocation38_spill] sm:$0xff] %v4778_v5  ;;  %v4784_v39 = vadd.f32 %v2088_v22, %v1896_v30  ;;  %v4798_v30 = vpop.f32.mrf.mxu0 }
 0x1c4   : > { %v4786_v26 = vpop.f32.mrf.mxu1 }
 0x1c5   : > { %5414 = vst [vmem:[#allocation39_spill] sm:$0xff] %v4784_v39 }
 0x1c6   : > { %v4792_v36 = vpop.f32.mrf.mxu1 }
 0x1c7   : > { %5416 = vst [vmem:[#allocation41_spill] sm:$0xff] %v4792_v36  ;;  %v3413_v36 = vcombine.low %v392_v13, %v396_v34  ;;  %v408_v13 = vld [vmem:[%s4444_s17 + $0x358] sm:$0xff] }
 0x1c8   : > { %v2096_v20 = vpop.f32.mrf.mxu1  ;;  %2561 = vmatmul.mubr.bf16.gmra.mxu1 %v3405_v6  ;;  %v4808_v6 = vpop.f32.mrf.mxu0  ;;  %v412_v34 = vld [vmem:[%s4444_s17 + $0x378] sm:$0xff] }
 0x1c9   : > { %v4796_v5 = vadd.f32 %v2096_v20, %v1904_v42  ;;  %2570 = vmatprep.mubr.bf16.mxu1 %v3414_v16  ;;  %v1916_v16 = vadd.f32 %v4649_v12, %v4576_v19  ;;  %v1924_v12 = vadd.f32 %v4666_v35, %v4574_v17 }
 0x1ca   : > { %v2098_v22 = vpop.f32.mrf.mxu1 }
 0x1cb   : > { %5417 = vst [vmem:[#allocation42_spill] sm:$0xff] %v4796_v5  ;;  %v4802_v57 = vadd.f32 %v2098_v22, %v1906_v50  ;;  %v4816_v50 = vpop.f32.mrf.mxu0 }
 0x1cc   : > { %v4804_v39 = vpop.f32.mrf.mxu1 }
 0x1cd   : > { %5418 = vst [vmem:[#allocation43_spill] sm:$0xff] %v4802_v57  ;;  %5419 = vst [vmem:[#allocation44_spill] sm:$0xff] %v4804_v39  ;;  %v3430_v39 = vcombine.high %v408_v13, %v412_v34 }
 0x1ce   : > { %v4810_v42 = vpop.f32.mrf.mxu1 }
 0x1cf   : > { %5420 = vst [vmem:[#allocation45_spill] sm:$0xff] %v4810_v42  ;;  %v3421_v42 = vcombine.low %v400_v52, %v404_v18  ;;  %v416_v52 = vld [vmem:[%s4444_s17 + $0x398] sm:$0xff] }
 0x1d0   : > { %v2106_v20 = vpop.f32.mrf.mxu1  ;;  %2571 = vmatmul.mubr.bf16.gmra.mxu1 %v3413_v36  ;;  %v4826_v36 = vpop.f32.mrf.mxu0  ;;  %v420_v18 = vld [vmem:[%s4444_s17 + $0x3b8] sm:$0xff] }
 0x1d1   : > { %v4814_v5 = vadd.f32 %v2106_v20, %v1914_v60  ;;  %2580 = vmatprep.mubr.bf16.mxu1 %v3422_v47  ;;  %v1926_v47 = vadd.f32 %v4671_v43, %v4576_v19  ;;  %v1934_v43 = vadd.f32 %v4688_v2, %v4574_v17 }
 0x1d2   : > { %v2108_v22 = vpop.f32.mrf.mxu1 }
 0x1d3   : > { %5421 = vst [vmem:[#allocation46_spill] sm:$0xff] %v4814_v5  ;;  %v4820_v9 = vadd.f32 %v2108_v22, %v1916_v16  ;;  %v4834_v16 = vpop.f32.mrf.mxu0 }
 0x1d4   : > { %v4822_v57 = vpop.f32.mrf.mxu1 }
 0x1d5   : > { %5422 = vst [vmem:[#allocation47_spill] sm:$0xff] %v4820_v9  ;;  %5423 = vst [vmem:[#allocation48_spill] sm:$0xff] %v4822_v57  ;;  %v3438_v57 = vcombine.high %v416_v52, %v420_v18 }
 0x1d6   : > { %v4828_v60 = vpop.f32.mrf.mxu1 }
 0x1d7   : > { %5424 = vst [vmem:[#allocation49_spill] sm:$0xff] %v4828_v60  ;;  %v3429_v60 = vcombine.low %v408_v13, %v412_v34  ;;  %v424_v13 = vld [vmem:[%s4444_s17 + $0x3d8] sm:$0xff] }
 0x1d8   : > { %v2116_v20 = vpop.f32.mrf.mxu1  ;;  %2581 = vmatmul.mubr.bf16.gmra.mxu1 %v3421_v42  ;;  %v4844_v42 = vpop.f32.mrf.mxu0  ;;  %v428_v34 = vld [vmem:[%s4444_s17 + $0x3f8] sm:$0xff] }
 0x1d9   : > { %v4832_v5 = vadd.f32 %v2116_v20, %v1924_v12  ;;  %2590 = vmatprep.mubr.bf16.mxu1 %v3430_v39  ;;  %5428 = vst [vmem:[#allocation53_spill] sm:$0xff] %v4844_v42  ;;  %v1936_v39 = vadd.f32 %v4693_v8, %v4576_v19  ;;  %v3446_v42 = vcombine.high %v424_v13, %v428_v34 }
 0x1da   : > { %v2118_v22 = vpop.f32.mrf.mxu1 }
 0x1db   : > { %5425 = vst [vmem:[#allocation50_spill] sm:$0xff] %v4832_v5  ;;  %v4838_v35 = vadd.f32 %v2118_v22, %v1926_v47  ;;  %v4852_v47 = vpop.f32.mrf.mxu0 }
 0x1dc   : > { %v4840_v9 = vpop.f32.mrf.mxu1 }
 0x1dd   : > { %5426 = vst [vmem:[#allocation51_spill] sm:$0xff] %v4838_v35  ;;  %5427 = vst [vmem:[#allocation52_spill] sm:$0xff] %v4840_v9  ;;  %v3437_v9 = vcombine.low %v416_v52, %v420_v18  ;;  %v4862_v8 = vpop.f32.mrf.mxu0 }
 0x1de   : > { %v4846_v12 = vpop.f32.mrf.mxu1 }
 0x1df   : > { %5429 = vst [vmem:[#allocation54_spill] sm:$0xff] %v4846_v12  ;;  %v1944_v12 = vadd.f32 %v4710_v59, %v4574_v17  ;;  %v3445_v59 = vcombine.low %v424_v13, %v428_v34 }
 0x1e0   : > { %v2126_v20 = vpop.f32.mrf.mxu1  ;;  %2591 = vmatmul.mubr.bf16.gmra.mxu1 %v3429_v60 }
 0x1e1   : > { %v4850_v5 = vadd.f32 %v2126_v20, %v1934_v43  ;;  %2600 = vmatprep.mubr.bf16.mxu1 %v3438_v57  ;;  %v1946_v57 = vadd.f32 %v4715_v0, %v4576_v19  ;;  %v1956_v0 = vadd.f32 %v4737_v11, %v4576_v19 }
 0x1e2   : > { %v2128_v22 = vpop.f32.mrf.mxu1 }
 0x1e3   : > { %5430 = vst [vmem:[#allocation55_spill] sm:$0xff] %v4850_v5  ;;  %v4856_v35 = vadd.f32 %v2128_v22, %v1936_v39  ;;  %v4870_v39 = vpop.f32.mrf.mxu0 }
 0x1e4   : > { %v4858_v2 = vpop.f32.mrf.mxu1 }
 0x1e5   : > { %5431 = vst [vmem:[#allocation56_spill] sm:$0xff] %v4856_v35  ;;  %v1954_v35 = vadd.f32 %v4732_v46, %v4574_v17 }
 0x1e6   : > { %v4864_v60 = vpop.f32.mrf.mxu1 }
 0x1e7   : > { %5432 = vst [vmem:[#allocation57_spill] sm:$0xff] %v4864_v60  ;;  %v4878_v60 = vpop.f32.mrf.mxu0 }
 0x1e8   : > { %v2136_v43 = vpop.f32.mrf.mxu1  ;;  %2601 = vmatmul.mubr.bf16.gmra.mxu1 %v3437_v9 }
 0x1e9   : > { %v4868_v20 = vadd.f32 %v2136_v43, %v1944_v12  ;;  %2610 = vmatprep.mubr.bf16.mxu1 %v3446_v42  ;;  %v4886_v12 = vpop.f32.mrf.mxu0 }
 0x1ea   : > { %v2138_v22 = vpop.f32.mrf.mxu1 }
 0x1eb   : > { %v4872_v52 = vadd.f32 %v2138_v22, %v1946_v57  ;;  %v4892_v34 = vpop.f32.mrf.mxu0 }
 0x1ec   : > { %v4874_v18 = vpop.f32.mrf.mxu1 }
 0x1ed   : > { %5433 = vst [vmem:[#allocation58_spill] sm:$0xff] %v4872_v52  ;;  %v4899_v11 = vpop.f32.mrf.mxu0 }
 0x1ee   : > { %v4880_v5 = vpop.f32.mrf.mxu1 }
 0x1f0   : > { %v2146_v9 = vpop.f32.mrf.mxu1  ;;  %2611 = vmatmul.mubr.bf16.gmra.mxu1 %v3445_v59 }
 0x1f1   : > { %v4884_v42 = vadd.f32 %v2146_v9, %v1954_v35 }
 0x1f2   : > { %v2148_v57 = vpop.f32.mrf.mxu1 }
 0x1f3   : > { %5434 = vst [vmem:[#allocation59_spill] sm:$0xff] %v4884_v42  ;;  %v4888_v43 = vadd.f32 %v2148_v57, %v1956_v0  ;;  %v4907_v57 = vpop.f32.mrf.mxu0 }
 0x1f4   : > { %v4890_v13 = vpop.f32.mrf.mxu1 }
 0x1f5   : > { %5435 = vst [vmem:[#allocation60_spill] sm:$0xff] %v4888_v43 }
 0x1f6   : > { %v4894_v46 = vpop.f32.mrf.mxu1 }
 0x1f7   : > { %5436 = vst [vmem:[#allocation61_spill] sm:$0xff] %v4894_v46 }
 0x1f8   : > { %v2156_v22 = vpop.f32.mrf.mxu1 }
 0x1f9   : > { %v4897_v52 = vadd.f32 %v2156_v22, %v4581_v24  ;;  %v4915_v22 = vpop.f32.mrf.mxu0 }
 0x1fa   : > { %v2158_v59 = vpop.f32.mrf.mxu1 }
 0x1fb   : > { %5437 = vst [vmem:[#allocation62_spill] sm:$0xff] %v4897_v52  ;;  %v4902_v35 = vadd.f32 %v2158_v59, %v4588_v29 }
 0x1fc   : > { %v2160_v9 = vpop.f32.mrf.mxu1 }
 0x1fd   : > { %v4905_v0 = vadd.f32 %v2160_v9, %v4593_v33  ;;  %v4923_v9 = vpop.f32.mrf.mxu0 }
 0x1fe   : > { %v2162_v43 = vpop.f32.mrf.mxu1 }
 0x1ff   : > { %5438 = vst [vmem:[#allocation63_spill] sm:$0xff] %v4905_v0  ;;  %v4910_v42 = vadd.f32 %v2162_v43, %v4598_v37 }
 0x200   : > { %v2166_v46 = vpop.f32.mrf.mxu1 }
 0x201   : > { %5439 = vst [vmem:[#allocation64_spill] sm:$0xff] %v4910_v42  ;;  %v4913_v24 = vadd.f32 %v2166_v46, %v4603_v40  ;;  %v4931_v46 = vpop.f32.mrf.mxu0 }
 0x202   : > { %v2168_v52 = vpop.f32.mrf.mxu1 }
 0x203   : > { %5440 = vst [vmem:[#allocation65_spill] sm:$0xff] %v4913_v24  ;;  %v4918_v29 = vadd.f32 %v2168_v52, %v4610_v45 }
 0x204   : > { %v2170_v59 = vpop.f32.mrf.mxu1 }
 0x205   : > { %5441 = vst [vmem:[#allocation66_spill] sm:$0xff] %v4918_v29  ;;  %v4921_v33 = vadd.f32 %v2170_v59, %v4615_v49  ;;  %v4939_v59 = vpop.f32.mrf.mxu0 }
 0x206   : > { %v2172_v0 = vpop.f32.mrf.mxu1 }
 0x207   : > { %5442 = vst [vmem:[#allocation67_spill] sm:$0xff] %v4921_v33  ;;  %v4926_v37 = vadd.f32 %v2172_v0, %v4620_v53 }
 0x208   : > { %v2176_v43 = vpop.f32.mrf.mxu1 }
 0x209   : > { %5443 = vst [vmem:[#allocation68_spill] sm:$0xff] %v4926_v37  ;;  %v4929_v40 = vadd.f32 %v2176_v43, %v4625_v58  ;;  %v4947_v43 = vpop.f32.mrf.mxu0 }
 0x20a   : > { %v2178_v24 = vpop.f32.mrf.mxu1 }
 0x20b   : > { %5444 = vst [vmem:[#allocation69_spill] sm:$0xff] %v4929_v40  ;;  %v4934_v45 = vadd.f32 %v2178_v24, %v4632_v63 }
 0x20c   : > { %v2180_v52 = vpop.f32.mrf.mxu1 }
 0x20d   : > { %5445 = vst [vmem:[#allocation70_spill] sm:$0xff] %v4934_v45  ;;  %v4937_v49 = vadd.f32 %v2180_v52, %v4637_v3  ;;  %v4955_v52 = vpop.f32.mrf.mxu0 }
 0x20e   : > { %v2182_v33 = vpop.f32.mrf.mxu1 }
 0x20f   : > { %5446 = vst [vmem:[#allocation71_spill] sm:$0xff] %v4937_v49  ;;  %v4942_v53 = vadd.f32 %v2182_v33, %v4642_v7 }
 0x210   : > { %v2186_v0 = vpop.f32.mrf.mxu1 }
 0x211   : > { %5447 = vst [vmem:[#allocation72_spill] sm:$0xff] %v4942_v53  ;;  %v4945_v58 = vadd.f32 %v2186_v0, %v4647_v10  ;;  %v4963_v0 = vpop.f32.mrf.mxu0 }
 0x212   : > { %v2188_v40 = vpop.f32.mrf.mxu1 }
 0x213   : > { %5448 = vst [vmem:[#allocation73_spill] sm:$0xff] %v4945_v58  ;;  %v4950_v63 = vadd.f32 %v2188_v40, %v4654_v15 }
 0x214   : > { %v2190_v24 = vpop.f32.mrf.mxu1 }
 0x215   : > { %5449 = vst [vmem:[#allocation74_spill] sm:$0xff] %v4950_v63  ;;  %v4953_v3 = vadd.f32 %v2190_v24, %v4659_v21  ;;  %v4971_v24 = vpop.f32.mrf.mxu0 }
 0x216   : > { %v2192_v49 = vpop.f32.mrf.mxu1 }
 0x217   : > { %5450 = vst [vmem:[#allocation75_spill] sm:$0xff] %v4953_v3  ;;  %v4958_v7 = vadd.f32 %v2192_v49, %v4664_v28 }
 0x218   : > { %v2196_v33 = vpop.f32.mrf.mxu1 }
 0x219   : > { %5451 = vst [vmem:[#allocation76_spill] sm:$0xff] %v4958_v7  ;;  %v4961_v10 = vadd.f32 %v2196_v33, %v4669_v38  ;;  %v4979_v33 = vpop.f32.mrf.mxu0  ;;  %v5476_v7 = vld [vmem:[#allocation37_spill] sm:$0xff] }
 0x21a   : > { %v2198_v58 = vpop.f32.mrf.mxu1 }
 0x21b   : > { %5452 = vst [vmem:[#allocation77_spill] sm:$0xff] %v4961_v10  ;;  %v4966_v15 = vadd.f32 %v2198_v58, %v4676_v48 }
 0x21c   : > { %v2200_v40 = vpop.f32.mrf.mxu1 }
 0x21d   : > { %5453 = vst [vmem:[#allocation78_spill] sm:$0xff] %v4966_v15  ;;  %v4969_v21 = vadd.f32 %v2200_v40, %v4681_v55  ;;  %v4987_v40 = vpop.f32.mrf.mxu0 }
 0x21e   : > { %v2202_v3 = vpop.f32.mrf.mxu1 }
 0x21f   : > { %5454 = vst [vmem:[#allocation79_spill] sm:$0xff] %v4969_v21  ;;  %v4974_v28 = vadd.f32 %v2202_v3, %v4686_v62 }
 0x220   : > { %v2206_v49 = vpop.f32.mrf.mxu1 }
 0x221   : > { %5455 = vst [vmem:[#allocation80_spill] sm:$0xff] %v4974_v28  ;;  %v4977_v38 = vadd.f32 %v2206_v49, %v4691_v4  ;;  %v4995_v49 = vpop.f32.mrf.mxu0  ;;  %v5475_v28 = vld [vmem:[#allocation34_spill] sm:$0xff] }
 0x222   : > { %v2208_v10 = vpop.f32.mrf.mxu1 }
 0x223   : > { %5456 = vst [vmem:[#allocation81_spill] sm:$0xff] %v4977_v38  ;;  %v4982_v48 = vadd.f32 %v2208_v10, %v4698_v14 }
 0x224   : > { %v2210_v58 = vpop.f32.mrf.mxu1 }
 0x225   : > { %5457 = vst [vmem:[#allocation82_spill] sm:$0xff] %v4982_v48  ;;  %v4985_v55 = vadd.f32 %v2210_v58, %v4703_v25  ;;  %v5003_v58 = vpop.f32.mrf.mxu0 }
 0x226   : > { %v2212_v21 = vpop.f32.mrf.mxu1 }
 0x227   : > { %5458 = vst [vmem:[#allocation83_spill] sm:$0xff] %v4985_v55  ;;  %v4990_v62 = vadd.f32 %v2212_v21, %v4708_v41 }
 0x228   : > { %v2216_v3 = vpop.f32.mrf.mxu1 }
 0x229   : > { %5459 = vst [vmem:[#allocation84_spill] sm:$0xff] %v4990_v62  ;;  %v4993_v4 = vadd.f32 %v2216_v3, %v4713_v44  ;;  %v5011_v3 = vpop.f32.mrf.mxu0  ;;  %v5468_v62 = vld [vmem:[#allocation31_spill] sm:$0xff] }
 0x22a   : > { %v2218_v38 = vpop.f32.mrf.mxu1 }
 0x22b   : > { %5460 = vst [vmem:[#allocation85_spill] sm:$0xff] %v4993_v4  ;;  %v4998_v14 = vadd.f32 %v2218_v38, %v4720_v32  ;;  %v1888_v32 = vadd.f32 %v4590_v31, %v4574_v17  ;;  %v5465_v38 = vld [vmem:[#allocation29_spill] sm:$0xff]  ;;  %v2270_v31 = vadd.f32 %v4758_v23, %v4760_v61 }
 0x22c   : > { %v2220_v10 = vpop.f32.mrf.mxu1 }
 0x22d   : > { %5461 = vst [vmem:[#allocation86_spill] sm:$0xff] %v4998_v14  ;;  %v5001_v25 = vadd.f32 %v2220_v10, %v4725_v56  ;;  %v5467_v10 = vld [vmem:[#allocation16_spill] sm:$0xff] }
 0x22e   : > { %v2222_v55 = vpop.f32.mrf.mxu1 }
 0x22f   : > { %5462 = vst [vmem:[#allocation87_spill] sm:$0xff] %v5001_v25  ;;  %v5006_v41 = vadd.f32 %v2222_v55, %v4730_v51  ;;  %v1890_v25 = vadd.f32 %v5467_v10, %v4576_v19  ;;  %v5023_v55 = vpop.f32.mrf.mxu0 }
 0x230   : > { %v2226_v21 = vpop.f32.mrf.mxu1 }
 0x231   : > { %5463 = vst [vmem:[#allocation88_spill] sm:$0xff] %v5006_v41  ;;  %v5009_v44 = vadd.f32 %v2226_v21, %v4735_v27  ;;  %v2081_v21 = vadd.f32 %v4768_v54, %v1888_v32 }
 0x232   : > { %v2228_v4 = vpop.f32.mrf.mxu1 }
 0x233   : > { %5464 = vst [vmem:[#allocation89_spill] sm:$0xff] %v5009_v44  ;;  %v5016_v14 = vadd.f32 %v2228_v4, %v5465_v38  ;;  %v5470_v44 = vld [vmem:[#allocation33_spill] sm:$0xff]  ;;  %v5472_v4 = vld [vmem:[#allocation36_spill] sm:$0xff]  ;;  %v2274_v54 = vadd.f32 %v5476_v7, %v2081_v21 }
 0x234   : > { %v2230_v56 = vpop.f32.mrf.mxu1  ;;  %v2083_v38 = vadd.f32 %v5472_v4, %v1890_v25  ;;  %v5480_v21 = vld [vmem:[#allocation41_spill] sm:$0xff] }
 0x235   : > { %5466 = vst [vmem:[#allocation29_spill] sm:$0xff] %v5016_v14  ;;  %v5021_v51 = vadd.f32 %v2230_v56, %v5468_v62  ;;  %v5032_v14 = vpop.f32.mrf.mxu0  ;;  %v5473_v62 = vld [vmem:[#allocation17_spill] sm:$0xff] }
 0x236   : > { %v2232_v27 = vpop.f32.mrf.mxu1  ;;  %v1898_v56 = vadd.f32 %v5473_v62, %v4574_v17  ;;  %v2276_v23 = vadd.f32 %v4780_v1, %v2083_v38  ;;  %v5481_v1 = vld [vmem:[#allocation19_spill] sm:$0xff] }
 0x237   : > { %5469 = vst [vmem:[#allocation16_spill] sm:$0xff] %v5021_v51  ;;  %v5027_v41 = vadd.f32 %v2232_v27, %v5470_v44  ;;  %v5474_v51 = vld [vmem:[#allocation35_spill] sm:$0xff]  ;;  %v5477_v27 = vld [vmem:[#allocation18_spill] sm:$0xff]  ;;  %v5042_v4 = vpop.f32.mrf.mxu0 }
 0x238   : > { %v2462_v48 = vpop.f32.mrf.mxu1  ;;  %v2272_v15 = vadd.f32 %v5475_v28, %v5474_v51  ;;  %v2091_v53 = vadd.f32 %v4786_v26, %v1898_v56  ;;  %v5478_v28 = vld [vmem:[#allocation38_spill] sm:$0xff]  ;;  %v5479_v51 = vld [vmem:[#allocation40_spill] sm:$0xff] }
 0x239   : > { %5471 = vst [vmem:[#allocation31_spill] sm:$0xff] %v5027_v41  ;;  %v2463_v32 = vadd.f32 %v2462_v48, %v2270_v31  ;;  %v1900_v41 = vadd.f32 %v5477_v27, %v4576_v19  ;;  %v2280_v7 = vadd.f32 %v5479_v51, %v5478_v28  ;;  %v5050_v38 = vpop.f32.mrf.mxu0  ;;  %v5484_v28 = vld [vmem:[#allocation44_spill] sm:$0xff] }
 0x23a   : > { %v2464_v10 = vpop.f32.mrf.mxu1 }
 0x23b   : > { %v2465_v61 = vadd.f32 %v2464_v10, %v2272_v15  ;;  %v2621_v62 = vmax.f32 %v2463_v32, 0.0  ;;  %v2093_v31 = vadd.f32 %v5480_v21, %v1900_v41  ;;  %v1908_v15 = vadd.f32 %v5481_v1, %v4574_v17 }
 0x23c   : > { %v2466_v44 = vpop.f32.mrf.mxu1 }
 0x23d   : > { %v2467_v25 = vadd.f32 %v2466_v44, %v2274_v54  ;;  %v2622_v29 = vmax.f32 %v2465_v61, 0.0  ;;  %v5482_v54 = vld [vmem:[#allocation39_spill] sm:$0xff]  ;;  %v2101_v51 = vadd.f32 %v5484_v28, %v1908_v15 }
 0x23e   : > { %v2468_v63 = vpop.f32.mrf.mxu1  ;;  %v2282_v26 = vadd.f32 %v4798_v30, %v5482_v54 }
 0x23f   : > { %v2623_v45 = vmax.f32 %v2467_v25, 0.0  ;;  %v2469_v37 = vadd.f32 %v2468_v63, %v2276_v23  ;;  %v2284_v63 = vadd.f32 %v4808_v6, %v2091_v53  ;;  %v5483_v23 = vld [vmem:[#allocation20_spill] sm:$0xff]  ;;  %v5058_v25 = vpop.f32.mrf.mxu0 }
 0x240   : > { %v2472_v48 = vpop.f32.mrf.mxu1  ;;  %v1910_v41 = vadd.f32 %v5483_v23, %v4576_v19 }
 0x241   : > { %v2685_v27 = vpack.c.bf16 %v2623_v45, %v2621_v62  ;;  %v2624_v42 = vmax.f32 %v2469_v37, 0.0  ;;  %v2473_v32 = vadd.f32 %v2472_v48, %v2280_v7  ;;  %v2286_v45 = vadd.f32 %v4816_v50, %v2093_v31  ;;  %v5486_v7 = vld [vmem:[#allocation45_spill] sm:$0xff] }
 0x242   : > { %v2474_v10 = vpop.f32.mrf.mxu1  ;;  %v2103_v48 = vadd.f32 %v5486_v7, %v1910_v41  ;;  %v5492_v7 = vld [vmem:[#allocation46_spill] sm:$0xff] }
 0x243   : > { %v2686_v56 = vpack.c.bf16 %v2624_v42, %v2622_v29  ;;  %v2475_v37 = vadd.f32 %v2474_v10, %v2282_v26  ;;  %v2625_v30 = vmax.f32 %v2473_v32, 0.0  ;;  %v5485_v42 = vld [vmem:[#allocation42_spill] sm:$0xff]  ;;  %v5487_v10 = vld [vmem:[#allocation21_spill] sm:$0xff]  ;;  %v5066_v26 = vpop.f32.mrf.mxu0 }
 0x244   : > { %v2476_v44 = vpop.f32.mrf.mxu1  ;;  %v2290_v29 = vadd.f32 %v4826_v36, %v5485_v42  ;;  %v1918_v54 = vadd.f32 %v5487_v10, %v4574_v17 }
 0x245   : > { %v2477_v61 = vadd.f32 %v2476_v44, %v2284_v63  ;;  %2882 = vmatprep.mubr.bf16.mxu0 %v2686_v56  ;;  %v2626_v1 = vmax.f32 %v2475_v37, 0.0  ;;  %v5488_v63 = vld [vmem:[#allocation43_spill] sm:$0xff]  ;;  %v5489_v56 = vld [vmem:[#allocation53_spill] sm:$0xff]  ;;  %v2296_v37 = vadd.f32 %v4852_v47, %v2103_v48  ;;  %v5074_v28 = vpop.f32.mrf.mxu0 }
 0x246   : > { %v2478_v62 = vpop.f32.mrf.mxu1  ;;  %2883 = vmatmul.mubr.bf16.vlgmr.msra.gmra.mxu0 %v2685_v27  ;;  %v2292_v15 = vadd.f32 %v4834_v16, %v5488_v63  ;;  %v2294_v32 = vadd.f32 %v5489_v56, %v2101_v51  ;;  %v5495_v56 = vld [vmem:[#allocation47_spill] sm:$0xff] }
 0x247   : > { %v2627_v21 = vmax.f32 %v2477_v61, 0.0  ;;  %v2479_v6 = vadd.f32 %v2478_v62, %v2286_v45  ;;  %v5490_v45 = vld [vmem:[#allocation22_spill] sm:$0xff] }
 0x248   : > { %v2482_v53 = vpop.f32.mrf.mxu1  ;;  %v1920_v41 = vadd.f32 %v5490_v45, %v4576_v19 }
 0x249   : > { %v2687_v50 = vpack.c.bf16 %v2627_v21, %v2625_v30  ;;  %v2628_v31 = vmax.f32 %v2479_v6, 0.0  ;;  %v2483_v23 = vadd.f32 %v2482_v53, %v2290_v29  ;;  %v5491_v21 = vld [vmem:[#allocation48_spill] sm:$0xff]  ;;  %v2300_v29 = vadd.f32 %v4862_v8, %v5492_v7 }
 0x24a   : > { %v2484_v27 = vpop.f32.mrf.mxu1  ;;  %v2111_v6 = vadd.f32 %v5491_v21, %v1918_v54  ;;  %v2302_v54 = vadd.f32 %v4870_v39, %v5495_v56  ;;  %v5497_v21 = vld [vmem:[#allocation52_spill] sm:$0xff] }
 0x24b   : > { %v2688_v44 = vpack.c.bf16 %v2628_v31, %v2626_v1  ;;  %v2485_v61 = vadd.f32 %v2484_v27, %v2292_v15  ;;  %v2629_v16 = vmax.f32 %v2483_v23, 0.0  ;;  %v5493_v1 = vld [vmem:[#allocation49_spill] sm:$0xff]  ;;  %v5494_v27 = vld [vmem:[#allocation23_spill] sm:$0xff]  ;;  %v5082_v15 = vpop.f32.mrf.mxu0 }
 0x24c   : > { %v2486_v36 = vpop.f32.mrf.mxu1  ;;  %v2113_v31 = vadd.f32 %v5493_v1, %v1920_v41  ;;  %v1928_v63 = vadd.f32 %v5494_v27, %v4574_v17 }
 0x24d   : > { %v2487_v62 = vadd.f32 %v2486_v36, %v2294_v32  ;;  %2890 = vmatprep.mubr.bf16.mxu0 %v2688_v44  ;;  %v2630_v10 = vmax.f32 %v2485_v61, 0.0  ;;  %v2304_v32 = vadd.f32 %v4878_v60, %v2111_v6  ;;  %v5496_v36 = vld [vmem:[#allocation24_spill] sm:$0xff]  ;;  %v5498_v6 = vld [vmem:[#allocation50_spill] sm:$0xff] }
 0x24e   : > { %v2488_v30 = vpop.f32.mrf.mxu1  ;;  %2891 = vmatmul.mubr.bf16.gmra.mxu0 %v2687_v50  ;;  %v1930_v45 = vadd.f32 %v5496_v36, %v4576_v19  ;;  %v2306_v41 = vadd.f32 %v4886_v12, %v2113_v31 }
 0x24f   : > { %v2631_v42 = vmax.f32 %v2487_v62, 0.0  ;;  %v2489_v51 = vadd.f32 %v2488_v30, %v2296_v37  ;;  %v5090_v62 = vpop.f32.mrf.mxu0 }
 0x250   : > { %v2492_v53 = vpop.f32.mrf.mxu1 }
 0x251   : > { %v2689_v47 = vpack.c.bf16 %v2631_v42, %v2629_v16  ;;  %v2632_v48 = vmax.f32 %v2489_v51, 0.0  ;;  %v2493_v23 = vadd.f32 %v2492_v53, %v2300_v29  ;;  %v2121_v16 = vadd.f32 %v5497_v21, %v1928_v63  ;;  %v5499_v29 = vld [vmem:[#allocation54_spill] sm:$0xff]  ;;  %v5098_v27 = vpop.f32.mrf.mxu0  ;;  %v5503_v21 = vld [vmem:[#allocation55_spill] sm:$0xff] }
 0x252   : > { %v2494_v50 = vpop.f32.mrf.mxu1  ;;  %v2310_v51 = vadd.f32 %v4892_v34, %v5498_v6  ;;  %v2123_v53 = vadd.f32 %v5499_v29, %v1930_v45 }
 0x253   : > { %v2690_v44 = vpack.c.bf16 %v2632_v48, %v2630_v10  ;;  %v2495_v37 = vadd.f32 %v2494_v50, %v2302_v54  ;;  %v2633_v39 = vmax.f32 %v2493_v23, 0.0  ;;  %v5500_v10 = vld [vmem:[#allocation25_spill] sm:$0xff]  ;;  %v5501_v50 = vld [vmem:[#allocation51_spill] sm:$0xff]  ;;  %v2314_v56 = vadd.f32 %v4907_v57, %v2121_v16 }
 0x254   : > { %v2496_v8 = vpop.f32.mrf.mxu1  ;;  %v1938_v48 = vadd.f32 %v5500_v10, %v4574_v17  ;;  %v2312_v63 = vadd.f32 %v4899_v11, %v5501_v50  ;;  %v2320_v16 = vadd.f32 %v4923_v9, %v5503_v21 }
 0x255   : > { %v2497_v61 = vadd.f32 %v2496_v8, %v2304_v32  ;;  %2898 = vmatprep.mubr.bf16.mxu0 %v2690_v44  ;;  %v2634_v1 = vmax.f32 %v2495_v37, 0.0  ;;  %v5502_v44 = vld [vmem:[#allocation26_spill] sm:$0xff]  ;;  %v2316_v8 = vadd.f32 %v4915_v22, %v2123_v53 }
 0x256   : > { %v2498_v30 = vpop.f32.mrf.mxu1  ;;  %2899 = vmatmul.mubr.bf16.gmra.mxu0 %v2689_v47  ;;  %v1940_v23 = vadd.f32 %v5502_v44, %v4576_v19 }
 0x257   : > { %v2635_v42 = vmax.f32 %v2497_v61, 0.0  ;;  %v2499_v60 = vadd.f32 %v2498_v30, %v2306_v41  ;;  %v5106_v41 = vpop.f32.mrf.mxu0  ;;  %v2131_v61 = vadd.f32 %v4858_v2, %v1938_v48 }
 0x258   : > { %v2502_v7 = vpop.f32.mrf.mxu1 }
 0x259   : > { %v2691_v12 = vpack.c.bf16 %v2635_v42, %v2633_v39  ;;  %v2636_v31 = vmax.f32 %v2499_v60, 0.0  ;;  %v2503_v32 = vadd.f32 %v2502_v7, %v2310_v51  ;;  %v5504_v42 = vld [vmem:[#allocation57_spill] sm:$0xff]  ;;  %v5505_v7 = vld [vmem:[#allocation27_spill] sm:$0xff]  ;;  %v5114_v53 = vpop.f32.mrf.mxu0 }
 0x25a   : > { %v2504_v47 = vpop.f32.mrf.mxu1  ;;  %v2133_v60 = vadd.f32 %v5504_v42, %v1940_v23  ;;  %v1948_v29 = vadd.f32 %v5505_v7, %v4574_v17 }
 0x25b   : > { %v2692_v54 = vpack.c.bf16 %v2636_v31, %v2634_v1  ;;  %v2505_v36 = vadd.f32 %v2504_v47, %v2312_v63  ;;  %v2637_v11 = vmax.f32 %v2503_v32, 0.0  ;;  %v2324_v31 = vadd.f32 %v4939_v59, %v2131_v61  ;;  %v5507_v47 = vld [vmem:[#allocation28_spill] sm:$0xff]  ;;  %v5122_v32 = vpop.f32.mrf.mxu0 }
 0x25c   : > { %v2506_v34 = vpop.f32.mrf.mxu1  ;;  %v1950_v50 = vadd.f32 %v5507_v47, %v4576_v19  ;;  %v2326_v63 = vadd.f32 %v4947_v43, %v2133_v60  ;;  %v2141_v44 = vadd.f32 %v4874_v18, %v1948_v29 }
 0x25d   : > { %v2507_v45 = vadd.f32 %v2506_v34, %v2314_v56  ;;  %2906 = vmatprep.mubr.bf16.mxu0 %v2692_v54  ;;  %v2638_v6 = vmax.f32 %v2505_v36, 0.0 }
 0x25e   : > { %v2508_v37 = vpop.f32.mrf.mxu1  ;;  %2907 = vmatmul.mubr.bf16.gmra.mxu0 %v2691_v12  ;;  %v5506_v12 = vld [vmem:[#allocation56_spill] sm:$0xff] }
 0x25f   : > { %v2639_v30 = vmax.f32 %v2507_v45, 0.0  ;;  %v2509_v57 = vadd.f32 %v2508_v37, %v2316_v8  ;;  %v2322_v2 = vadd.f32 %v4931_v46, %v5506_v12  ;;  %v2330_v8 = vadd.f32 %v4955_v52, %v4868_v20  ;;  %v5510_v52 = vld [vmem:[#allocation32_spill] sm:$0xff]  ;;  %v5511_v12 = vld [vmem:[#allocation59_spill] sm:$0xff] }
 0x260   : > { %v2512_v39 = vpop.f32.mrf.mxu1  ;;  %v2143_v45 = vadd.f32 %v4880_v5, %v1950_v50  ;;  %v1960_v5 = vadd.f32 %v5510_v52, %v4576_v19  ;;  %v5516_v52 = vld [vmem:[#allocation64_spill] sm:$0xff] }
 0x261   : > { %v2693_v22 = vpack.c.bf16 %v2639_v30, %v2637_v11  ;;  %v2640_v51 = vmax.f32 %v2509_v57, 0.0  ;;  %v2513_v48 = vadd.f32 %v2512_v39, %v2320_v16  ;;  %v5508_v11 = vld [vmem:[#allocation30_spill] sm:$0xff]  ;;  %v5130_v57 = vpop.f32.mrf.mxu0  ;;  %v2334_v39 = vadd.f32 %v4971_v24, %v2141_v44 }
 0x262   : > { %v2514_v1 = vpop.f32.mrf.mxu1  ;;  %v1958_v30 = vadd.f32 %v5508_v11, %v4574_v17  ;;  %v5509_v16 = vld [vmem:[#allocation58_spill] sm:$0xff] }
 0x263   : > { %v2694_v10 = vpack.c.bf16 %v2640_v51, %v2638_v6  ;;  %v2515_v56 = vadd.f32 %v2514_v1, %v2322_v2  ;;  %v2641_v46 = vmax.f32 %v2513_v48, 0.0  ;;  %v2332_v18 = vadd.f32 %v4963_v0, %v5509_v16  ;;  %v5138_v17 = vpop.f32.mrf.mxu0 }
 0x264   : > { %v2516_v9 = vpop.f32.mrf.mxu1  ;;  %v2336_v6 = vadd.f32 %v4979_v33, %v2143_v45  ;;  %v2151_v29 = vadd.f32 %v4890_v13, %v1958_v30  ;;  %v2340_v2 = vadd.f32 %v4987_v40, %v5511_v12  ;;  %v2352_v16 = vadd.f32 %v5032_v14, %v4902_v35  ;;  %v5517_v14 = vld [vmem:[#allocation65_spill] sm:$0xff] }
 0x265   : > { %v2517_v54 = vadd.f32 %v2516_v9, %v2324_v31  ;;  %2914 = vmatprep.mubr.bf16.mxu0 %v2694_v10  ;;  %v2642_v37 = vmax.f32 %v2515_v56, 0.0  ;;  %v5512_v10 = vld [vmem:[#allocation61_spill] sm:$0xff]  ;;  %v5144_v47 = vpop.f32.mrf.mxu0 }
 0x266   : > { %v2518_v34 = vpop.f32.mrf.mxu1  ;;  %2915 = vmatmul.mubr.bf16.gmra.mxu0 %v2693_v22  ;;  %v2153_v19 = vadd.f32 %v5512_v10, %v1960_v5  ;;  %v2344_v13 = vadd.f32 %v5003_v58, %v2151_v29  ;;  %v2356_v5 = vadd.f32 %v5050_v38, %v5516_v52 }
 0x267   : > { %v2643_v23 = vmax.f32 %v2517_v54, 0.0  ;;  %v2519_v59 = vadd.f32 %v2518_v34, %v2326_v63  ;;  %v5513_v63 = vld [vmem:[#allocation60_spill] sm:$0xff] }
 0x268   : > { %v2522_v36 = vpop.f32.mrf.mxu1  ;;  %v2342_v56 = vadd.f32 %v4995_v49, %v5513_v63  ;;  %v5520_v63 = vld [vmem:[#allocation68_spill] sm:$0xff] }
 0x269   : > { %v2695_v43 = vpack.c.bf16 %v2643_v23, %v2641_v46  ;;  %v2644_v61 = vmax.f32 %v2519_v59, 0.0  ;;  %v2523_v60 = vadd.f32 %v2522_v36, %v2330_v8  ;;  %v2346_v46 = vadd.f32 %v5011_v3, %v2153_v19  ;;  %v5150_v59 = vpop.f32.mrf.mxu0  ;;  %v5519_v19 = vld [vmem:[#allocation67_spill] sm:$0xff] }
 0x26a   : > { %v2524_v21 = vpop.f32.mrf.mxu1 }
 0x26b   : > { %v2696_v42 = vpack.c.bf16 %v2644_v61, %v2642_v37  ;;  %v2525_v22 = vadd.f32 %v2524_v21, %v2332_v18  ;;  %v2645_v0 = vmax.f32 %v2523_v60, 0.0  ;;  %v5514_v61 = vld [vmem:[#allocation62_spill] sm:$0xff]  ;;  %v5154_v21 = vpop.f32.mrf.mxu0  ;;  %v5515_v18 = vld [vmem:[#allocation63_spill] sm:$0xff] }
 0x26c   : > { %v2526_v20 = vpop.f32.mrf.mxu1  ;;  %v2350_v49 = vadd.f32 %v5023_v55, %v5514_v61 }
 0x26d   : > { %v2527_v51 = vadd.f32 %v2526_v20, %v2334_v39  ;;  %2922 = vmatprep.mubr.bf16.mxu0 %v2696_v42  ;;  %v2646_v48 = vmax.f32 %v2525_v22, 0.0  ;;  %v2354_v39 = vadd.f32 %v5042_v4, %v5515_v18  ;;  %v5162_v22 = vpop.f32.mrf.mxu0  ;;  %v2360_v4 = vadd.f32 %v5058_v25, %v5517_v14  ;;  %v5527_v14 = vld [vmem:[#allocation75_spill] sm:$0xff] }
 0x26e   : > { %v2528_v7 = vpop.f32.mrf.mxu1  ;;  %2923 = vmatmul.mubr.bf16.gmra.mxu0 %v2695_v43 }
 0x26f   : > { %v2647_v1 = vmax.f32 %v2527_v51, 0.0  ;;  %v2529_v24 = vadd.f32 %v2528_v7, %v2336_v6 }
 0x270   : > { %v2532_v31 = vpop.f32.mrf.mxu1 }
 0x271   : > { %v2697_v33 = vpack.c.bf16 %v2647_v1, %v2645_v0  ;;  %v2648_v9 = vmax.f32 %v2529_v24, 0.0  ;;  %v2533_v34 = vadd.f32 %v2532_v31, %v2340_v2  ;;  %v5166_v2 = vpop.f32.mrf.mxu0  ;;  %v5518_v31 = vld [vmem:[#allocation66_spill] sm:$0xff] }
 0x272   : > { %v2534_v50 = vpop.f32.mrf.mxu1  ;;  %v2362_v10 = vadd.f32 %v5066_v26, %v5518_v31 }
 0x273   : > { %v2698_v54 = vpack.c.bf16 %v2648_v9, %v2646_v48  ;;  %v2535_v40 = vadd.f32 %v2534_v50, %v2342_v56  ;;  %v2649_v36 = vmax.f32 %v2533_v34, 0.0  ;;  %v2364_v48 = vadd.f32 %v5074_v28, %v5519_v19 }
 0x274   : > { %v2536_v44 = vpop.f32.mrf.mxu1  ;;  %v2366_v56 = vadd.f32 %v5082_v15, %v5520_v63 }
 0x275   : > { %v2537_v23 = vadd.f32 %v2536_v44, %v2344_v13  ;;  %2930 = vmatprep.mubr.bf16.mxu0 %v2698_v54  ;;  %v2650_v58 = vmax.f32 %v2535_v40, 0.0  ;;  %v5174_v54 = vpop.f32.mrf.mxu0 }
 0x276   : > { %v2538_v8 = vpop.f32.mrf.mxu1  ;;  %2931 = vmatmul.mubr.bf16.gmra.mxu0 %v2697_v33 }
 0x277   : > { %v2651_v45 = vmax.f32 %v2537_v23, 0.0  ;;  %v2539_v37 = vadd.f32 %v2538_v8, %v2346_v46  ;;  %v5521_v23 = vld [vmem:[#allocation69_spill] sm:$0xff] }
 0x278   : > { %v2542_v43 = vpop.f32.mrf.mxu1  ;;  %v2370_v28 = vadd.f32 %v5090_v62, %v5521_v23 }
 0x279   : > { %v2699_v11 = vpack.c.bf16 %v2651_v45, %v2649_v36  ;;  %v2652_v30 = vmax.f32 %v2539_v37, 0.0  ;;  %v2543_v60 = vadd.f32 %v2542_v43, %v2350_v49  ;;  %v5178_v37 = vpop.f32.mrf.mxu0  ;;  %v5522_v43 = vld [vmem:[#allocation70_spill] sm:$0xff]  ;;  %v5523_v49 = vld [vmem:[#allocation71_spill] sm:$0xff] }
 0x27a   : > { %v2544_v3 = vpop.f32.mrf.mxu1  ;;  %v2372_v61 = vadd.f32 %v5098_v27, %v5522_v43  ;;  %v5525_v27 = vld [vmem:[#allocation73_spill] sm:$0xff] }
 0x27b   : > { %v2700_v42 = vpack.c.bf16 %v2652_v30, %v2650_v58  ;;  %v2545_v6 = vadd.f32 %v2544_v3, %v2352_v16  ;;  %v2653_v7 = vmax.f32 %v2543_v60, 0.0  ;;  %v2374_v58 = vadd.f32 %v5106_v41, %v5523_v49  ;;  %v5524_v16 = vld [vmem:[#allocation72_spill] sm:$0xff] }
 0x27c   : > { %v2546_v20 = vpop.f32.mrf.mxu1  ;;  %v2376_v18 = vadd.f32 %v5114_v53, %v5524_v16 }
 0x27d   : > { %v2547_v55 = vadd.f32 %v2546_v20, %v2354_v39  ;;  %2938 = vmatprep.mubr.bf16.mxu0 %v2700_v42  ;;  %v2654_v1 = vmax.f32 %v2545_v6, 0.0  ;;  %v2403_v42 = vpop.f32.mrf.mxu0 }
 0x27e   : > { %v2548_v51 = vpop.f32.mrf.mxu1  ;;  %2939 = vmatmul.mubr.bf16.gmra.mxu0 %v2699_v11 }
 0x27f   : > { %v2655_v29 = vmax.f32 %v2547_v55, 0.0  ;;  %v2549_v0 = vadd.f32 %v2548_v51, %v2356_v5  ;;  %v2380_v55 = vadd.f32 %v5122_v32, %v5525_v27 }
 0x280   : > { %v2552_v35 = vpop.f32.mrf.mxu1 }
 0x281   : > { %v2701_v24 = vpack.c.bf16 %v2655_v29, %v2653_v7  ;;  %v2656_v12 = vmax.f32 %v2549_v0, 0.0  ;;  %v2553_v9 = vadd.f32 %v2552_v35, %v2360_v4  ;;  %v2405_v29 = vpop.f32.mrf.mxu0  ;;  %v5526_v35 = vld [vmem:[#allocation74_spill] sm:$0xff]  ;;  %v2384_v4 = vadd.f32 %v5138_v17, %v5527_v14 }
 0x282   : > { %v2554_v38 = vpop.f32.mrf.mxu1  ;;  %v2382_v53 = vadd.f32 %v5130_v57, %v5526_v35  ;;  %v5529_v57 = vld [vmem:[#allocation77_spill] sm:$0xff] }
 0x283   : > { %v2702_v33 = vpack.c.bf16 %v2656_v12, %v2654_v1  ;;  %v2555_v13 = vadd.f32 %v2554_v38, %v2362_v10  ;;  %v2657_v44 = vmax.f32 %v2553_v9, 0.0  ;;  %v5528_v38 = vld [vmem:[#allocation76_spill] sm:$0xff]  ;;  %v2409_v32 = vpop.f32.mrf.mxu0 }
 0x284   : > { %v2556_v50 = vpop.f32.mrf.mxu1  ;;  %v2386_v31 = vadd.f32 %v5144_v47, %v5528_v38 }
 0x285   : > { %v2557_v25 = vadd.f32 %v2556_v50, %v2364_v48  ;;  %2946 = vmatprep.mubr.bf16.mxu0 %v2702_v33  ;;  %v2658_v8 = vmax.f32 %v2555_v13, 0.0 }
 0x286   : > { %v2558_v34 = vpop.f32.mrf.mxu1  ;;  %2947 = vmatmul.mubr.bf16.gmra.mxu0 %v2701_v24 }
 0x287   : > { %v2659_v46 = vmax.f32 %v2557_v25, 0.0  ;;  %v2559_v40 = vadd.f32 %v2558_v34, %v2366_v56  ;;  %v2390_v56 = vadd.f32 %v5150_v59, %v5529_v57  ;;  %v2411_v34 = vpop.f32.mrf.mxu0 }
 0x288   : > { %v2562_v26 = vpop.f32.mrf.mxu1 }
 0x289   : > { %v2703_v36 = vpack.c.bf16 %v2659_v46, %v2657_v44  ;;  %v2660_v45 = vmax.f32 %v2559_v40, 0.0  ;;  %v2563_v30 = vadd.f32 %v2562_v26, %v2370_v28  ;;  %v5530_v46 = vld [vmem:[#allocation78_spill] sm:$0xff]  ;;  %v5531_v40 = vld [vmem:[#allocation79_spill] sm:$0xff]  ;;  %v2413_v59 = vpop.f32.mrf.mxu0 }
 0x28a   : > { %v2564_v15 = vpop.f32.mrf.mxu1  ;;  %v2392_v47 = vadd.f32 %v5154_v21, %v5530_v46  ;;  %v2394_v26 = vadd.f32 %v5162_v22, %v5531_v40  ;;  %v5533_v21 = vld [vmem:[#allocation81_spill] sm:$0xff] }
 0x28b   : > { %v2704_v11 = vpack.c.bf16 %v2660_v45, %v2658_v8  ;;  %v2565_v39 = vadd.f32 %v2564_v15, %v2372_v61  ;;  %v2661_v20 = vmax.f32 %v2563_v30, 0.0  ;;  %v5541_v40 = vld [vmem:[#allocation89_spill] sm:$0xff] }
 0x28c   : > { %v2566_v3 = vpop.f32.mrf.mxu1 }
 0x28d   : > { %v2567_v62 = vadd.f32 %v2566_v3, %v2374_v58  ;;  %2954 = vmatprep.mubr.bf16.mxu0 %v2704_v11  ;;  %v2662_v41 = vmax.f32 %v2565_v39, 0.0  ;;  %v2400_v3 = vadd.f32 %v5174_v54, %v5533_v21  ;;  %v2415_v39 = vpop.f32.mrf.mxu0 }
 0x28e   : > { %v2568_v60 = vpop.f32.mrf.mxu1  ;;  %2955 = vmatmul.mubr.bf16.gmra.mxu0 %v2703_v36  ;;  %v5532_v36 = vld [vmem:[#allocation80_spill] sm:$0xff] }
 0x28f   : > { %v2663_v52 = vmax.f32 %v2567_v62, 0.0  ;;  %v2569_v5 = vadd.f32 %v2568_v60, %v2376_v18  ;;  %v2396_v45 = vadd.f32 %v5166_v2, %v5532_v36  ;;  %v5534_v60 = vld [vmem:[#allocation82_spill] sm:$0xff] }
 0x290   : > { %v2572_v6 = vpop.f32.mrf.mxu1  ;;  %v2402_v2 = vadd.f32 %v5178_v37, %v5534_v60 }
 0x291   : > { %v2705_v51 = vpack.c.bf16 %v2663_v52, %v2661_v20  ;;  %v2664_v7 = vmax.f32 %v2569_v5, 0.0  ;;  %v2573_v24 = vadd.f32 %v2572_v6, %v2380_v55  ;;  %v5535_v20 = vld [vmem:[#allocation83_spill] sm:$0xff]  ;;  %v5536_v55 = vld [vmem:[#allocation84_spill] sm:$0xff] }
 0x292   : > { %v2574_v0 = vpop.f32.mrf.mxu1  ;;  %v2404_v52 = vadd.f32 %v2403_v42, %v5535_v20 }
 0x293   : > { %v2706_v1 = vpack.c.bf16 %v2664_v7, %v2662_v41  ;;  %v2575_v10 = vadd.f32 %v2574_v0, %v2382_v53  ;;  %v2665_v33 = vmax.f32 %v2573_v24, 0.0  ;;  %v2406_v41 = vadd.f32 %v2405_v29, %v5536_v55  ;;  %v2419_v0 = vpop.f32.mrf.mxu0  ;;  %v5539_v29 = vld [vmem:[#allocation87_spill] sm:$0xff] }
 0x294   : > { %v2576_v12 = vpop.f32.mrf.mxu1 }
 0x295   : > { %v2577_v19 = vadd.f32 %v2576_v12, %v2384_v4  ;;  %2962 = vmatprep.mubr.bf16.mxu0 %v2706_v1  ;;  %v2666_v17 = vmax.f32 %v2575_v10, 0.0  ;;  %v5537_v1 = vld [vmem:[#allocation85_spill] sm:$0xff]  ;;  %v2421_v38 = vpop.f32.mrf.mxu0  ;;  %v5538_v10 = vld [vmem:[#allocation86_spill] sm:$0xff] }
 0x296   : > { %v2578_v48 = vpop.f32.mrf.mxu1  ;;  %2963 = vmatmul.mubr.bf16.gmra.mxu0 %v2705_v51  ;;  %v2410_v24 = vadd.f32 %v2409_v32, %v5537_v1 }
 0x297   : > { %v2667_v9 = vmax.f32 %v2577_v19, 0.0  ;;  %v2579_v50 = vadd.f32 %v2578_v48, %v2386_v31  ;;  %v2412_v19 = vadd.f32 %v2411_v34, %v5538_v10  ;;  %v2414_v48 = vadd.f32 %v2413_v59, %v5539_v29 }
 0x298   : > { %v2582_v63 = vpop.f32.mrf.mxu1 }
 0x299   : > { %v2707_v13 = vpack.c.bf16 %v2667_v9, %v2665_v33  ;;  %v2668_v25 = vmax.f32 %v2579_v50, 0.0  ;;  %v2583_v28 = vadd.f32 %v2582_v63, %v2390_v56  ;;  %v5540_v63 = vld [vmem:[#allocation88_spill] sm:$0xff] }
 0x29a   : > { %v2584_v44 = vpop.f32.mrf.mxu1  ;;  %v2416_v57 = vadd.f32 %v2415_v39, %v5540_v63 }
 0x29b   : > { %v2708_v23 = vpack.c.bf16 %v2668_v25, %v2666_v17  ;;  %v2585_v15 = vadd.f32 %v2584_v44, %v2392_v47  ;;  %v2669_v49 = vmax.f32 %v2583_v28, 0.0 }
 0x29c   : > { %v2586_v8 = vpop.f32.mrf.mxu1 }
 0x29d   : > { %v2587_v43 = vadd.f32 %v2586_v8, %v2394_v26  ;;  %2970 = vmatprep.mubr.bf16.mxu0 %v2708_v23  ;;  %v2670_v22 = vmax.f32 %v2585_v15, 0.0  ;;  %v2420_v26 = vadd.f32 %v2419_v0, %v5541_v40 }
 0x29e   : > { %v2588_v61 = vpop.f32.mrf.mxu1  ;;  %2971 = vmatmul.mubr.bf16.gmra.mxu0 %v2707_v13  ;;  %v2423_v13 = vpop.f32.mrf.mxu0 }
 0x29f   : > { %v2671_v58 = vmax.f32 %v2587_v43, 0.0  ;;  %v2589_v11 = vadd.f32 %v2588_v61, %v2396_v45  ;;  %v5542_v45 = vld [vmem:[#allocation29_spill] sm:$0xff]  ;;  %v5543_v43 = vld [vmem:[#allocation16_spill] sm:$0xff] }
 0x2a0   : > { %v2592_v30 = vpop.f32.mrf.mxu1  ;;  %v2425_v8 = vpop.f32.mrf.mxu0  ;;  %v2422_v15 = vadd.f32 %v2421_v38, %v5542_v45  ;;  %v2424_v59 = vadd.f32 %v2423_v13, %v5543_v43 }
 0x2a1   : > { %v2709_v16 = vpack.c.bf16 %v2671_v58, %v2669_v49  ;;  %v2672_v18 = vmax.f32 %v2589_v11, 0.0  ;;  %v2593_v6 = vadd.f32 %v2592_v30, %v2400_v3  ;;  %v5544_v11 = vld [vmem:[#allocation31_spill] sm:$0xff] }
 0x2a2   : > { %v2594_v62 = vpop.f32.mrf.mxu1  ;;  %v2426_v30 = vadd.f32 %v2425_v8, %v5544_v11 }
 0x2a3   : > { %v2710_v5 = vpack.c.bf16 %v2672_v18, %v2670_v22  ;;  %v2595_v51 = vadd.f32 %v2594_v62, %v2402_v2  ;;  %v2673_v35 = vmax.f32 %v2593_v6, 0.0 }
 0x2a4   : > { %v2596_v27 = vpop.f32.mrf.mxu1 }
 0x2a5   : > { %v2597_v7 = vadd.f32 %v2596_v27, %v2404_v52  ;;  %2978 = vmatprep.mubr.bf16.mxu0 %v2710_v5  ;;  %v2674_v37 = vmax.f32 %v2595_v51, 0.0  ;;  %v5216_v5 = vld [vmem:[#allocation10] ss:$0 sm:$0xff]  ;;  %v5219_v51 = vld [vmem:[#allocation10 + $0x2] ss:$0 sm:$0xff] }
 0x2a6   : > { %v2598_v54 = vpop.f32.mrf.mxu1  ;;  %2979 = vmatmul.mubr.bf16.gmra.mxu0 %v2709_v16 }
 0x2a7   : > { %v2675_v53 = vmax.f32 %v2597_v7, 0.0  ;;  %v2599_v14 = vadd.f32 %v2598_v54, %v2406_v41 }
 0x2a8   : > { %v2602_v4 = vpop.f32.mrf.mxu1 }
 0x2a9   : > { %v2711_v12 = vpack.c.bf16 %v2675_v53, %v2673_v35  ;;  %v2676_v42 = vmax.f32 %v2599_v14, 0.0  ;;  %v2603_v9 = vadd.f32 %v2602_v4, %v2410_v24 }
 0x2aa   : > { %v2604_v31 = vpop.f32.mrf.mxu1 }
 0x2ab   : > { %v2712_v33 = vpack.c.bf16 %v2676_v42, %v2674_v37  ;;  %v2605_v56 = vadd.f32 %v2604_v31, %v2412_v19  ;;  %v2677_v32 = vmax.f32 %v2603_v9, 0.0 }
 0x2ac   : > { %v2606_v50 = vpop.f32.mrf.mxu1 }
 0x2ad   : > { %v2607_v17 = vadd.f32 %v2606_v50, %v2414_v48  ;;  %2986 = vmatprep.mubr.bf16.mxu0 %v2712_v33  ;;  %v2678_v34 = vmax.f32 %v2605_v56, 0.0 }
 0x2ae   : > { %v2608_v25 = vpop.f32.mrf.mxu1  ;;  %2987 = vmatmul.mubr.bf16.gmra.mxu0 %v2711_v12 }
 0x2af   : > { %v2679_v44 = vmax.f32 %v2607_v17, 0.0  ;;  %v2609_v46 = vadd.f32 %v2608_v25, %v2416_v57 }
 0x2b0   : > { %v2612_v47 = vpop.f32.mrf.mxu1 }
 0x2b1   : > { %v2713_v23 = vpack.c.bf16 %v2679_v44, %v2677_v32  ;;  %v2680_v28 = vmax.f32 %v2609_v46, 0.0  ;;  %v2613_v49 = vadd.f32 %v2612_v47, %v2420_v26 }
 0x2b2   : > { %v2614_v36 = vpop.f32.mrf.mxu1 }
 0x2b3   : > { %v2714_v61 = vpack.c.bf16 %v2680_v28, %v2678_v34  ;;  %v2615_v21 = vadd.f32 %v2614_v36, %v2422_v15  ;;  %v2681_v16 = vmax.f32 %v2613_v49, 0.0 }
 0x2b4   : > { %v2616_v58 = vpop.f32.mrf.mxu1 }
 0x2b5   : > { %v2617_v3 = vadd.f32 %v2616_v58, %v2424_v59  ;;  %2994 = vmatprep.mubr.bf16.mxu0 %v2714_v61  ;;  %v2682_v62 = vmax.f32 %v2615_v21, 0.0 }
 0x2b6   : > { %v2618_v22 = vpop.f32.mrf.mxu1  ;;  %2995 = vmatmul.mubr.bf16.gmra.mxu0 %v2713_v23 }
 0x2b7   : > { %v2683_v18 = vmax.f32 %v2617_v3, 0.0  ;;  %v2619_v39 = vadd.f32 %v2618_v22, %v2426_v30 }
 0x2b9   : > { %v2715_v60 = vpack.c.bf16 %v2683_v18, %v2681_v16  ;;  %v2684_v2 = vmax.f32 %v2619_v39, 0.0 }
 0x2bb   : > { %v2716_v20 = vpack.c.bf16 %v2684_v2, %v2682_v62 }
 0x2bd   : > { %3002 = vmatprep.mubr.bf16.mxu0 %v2716_v20 }
 0x2be   : > { %3003 = vmatmul.mubr.bf16.gmra.mxu0 %v2715_v60 }
 0x306   : > { %v3617_v52 = vpop.f32.mrf.mxu0 }
 0x308   : > { %v3618_v6 = vpop.f32.mrf.mxu0 }
 0x309   : > { %v3619_v27 = vadd.f32 %v3618_v6, %v3617_v52 }
 0x30a   : > { %v3620_v55 = vpop.f32.mrf.mxu0 }
 0x30b   : > { %v2885_v41 = vadd.f32 %v3619_v27, %v5216_v5 }
 0x30c   : > { %v3621_v7 = vpop.f32.mrf.mxu0 }
 0x30d   : > { %v3011_v0 = vmax.f32 %v2885_v41, 0.0  ;;  %v3622_v54 = vadd.f32 %v3621_v7, %v3620_v55 }
 0x30e   : > { %v3623_v35 = vpop.f32.mrf.mxu0 }
 0x30f   : > { %v3048_v53 = vadd.f32 %v5219_v51, %v3011_v0  ;;  %v2888_v14 = vadd.f32 %v3622_v54, %v5216_v5 }
 0x310   : > { %v3624_v4 = vpop.f32.mrf.mxu0 }
 0x311   : > { %v3080_v1 = vmax.f32 %v3048_v53, 0.0  ;;  %v3012_v24 = vmax.f32 %v2888_v14, 0.0  ;;  %v3625_v37 = vadd.f32 %v3624_v4, %v3623_v35 }
 0x312   : > { %v3626_v12 = vpop.f32.mrf.mxu0 }
 0x313   : > { %v3112_v42 = vmin.f32 %v3080_v1, 1.0  ;;  %v3049_v38 = vadd.f32 %v5219_v51, %v3012_v24  ;;  %v2893_v31 = vadd.f32 %v3625_v37, %v5216_v5 }
 0x314   : > { %v3627_v10 = vpop.f32.mrf.mxu0 }
 0x315   : > { %3144 = vst [vmem:[%s5226_s26] sm:$0xff] %v3112_v42  ;;  %v3081_v19 = vmax.f32 %v3049_v38, 0.0  ;;  %v3013_v29 = vmax.f32 %v2893_v31, 0.0  ;;  %v3628_v48 = vadd.f32 %v3627_v10, %v3626_v12 }
 0x316   : > { %v3629_v33 = vpop.f32.mrf.mxu0 }
 0x317   : > { %v3113_v9 = vmin.f32 %v3081_v19, 1.0  ;;  %v3050_v50 = vadd.f32 %v5219_v51, %v3013_v29  ;;  %v2896_v63 = vadd.f32 %v3628_v48, %v5216_v5 }
 0x318   : > { %v3630_v57 = vpop.f32.mrf.mxu0 }
 0x319   : > { %3145 = vst [vmem:[%s5226_s26 + $0x8] sm:$0xff] %v3113_v9  ;;  %v3082_v56 = vmax.f32 %v3050_v50, 0.0  ;;  %v3014_v17 = vmax.f32 %v2896_v63, 0.0  ;;  %v3631_v13 = vadd.f32 %v3630_v57, %v3629_v33 }
 0x31a   : > { %v3632_v25 = vpop.f32.mrf.mxu0 }
 0x31b   : > { %v3114_v32 = vmin.f32 %v3082_v56, 1.0  ;;  %v3051_v44 = vadd.f32 %v5219_v51, %v3014_v17  ;;  %v2901_v46 = vadd.f32 %v3631_v13, %v5216_v5 }
 0x31c   : > { %v3633_v47 = vpop.f32.mrf.mxu0 }
 0x31d   : > { %3146 = vst [vmem:[%s5226_s26 + $0x10] sm:$0xff] %v3114_v32  ;;  %v3083_v40 = vmax.f32 %v3051_v44, 0.0  ;;  %v3015_v26 = vmax.f32 %v2901_v46, 0.0  ;;  %v3634_v34 = vadd.f32 %v3633_v47, %v3632_v25 }
 0x31e   : > { %v3635_v23 = vpop.f32.mrf.mxu0 }
 0x31f   : > { %v3115_v28 = vmin.f32 %v3083_v40, 1.0  ;;  %v3052_v8 = vadd.f32 %v5219_v51, %v3015_v26  ;;  %v2904_v36 = vadd.f32 %v3634_v34, %v5216_v5 }
 0x320   : > { %v3636_v45 = vpop.f32.mrf.mxu0 }
 0x321   : > { %3147 = vst [vmem:[%s5226_s26 + $0x18] sm:$0xff] %v3115_v28  ;;  %v3084_v15 = vmax.f32 %v3052_v8, 0.0  ;;  %v3016_v43 = vmax.f32 %v2904_v36, 0.0  ;;  %v3637_v59 = vadd.f32 %v3636_v45, %v3635_v23 }
 0x322   : > { %v3638_v61 = vpop.f32.mrf.mxu0 }
 0x323   : > { %v3116_v49 = vmin.f32 %v3084_v15, 1.0  ;;  %v3053_v58 = vadd.f32 %v5219_v51, %v3016_v43  ;;  %v2909_v11 = vadd.f32 %v3637_v59, %v5216_v5 }
 0x324   : > { %v3639_v30 = vpop.f32.mrf.mxu0 }
 0x325   : > { %3148 = vst [vmem:[%s5226_s26 + $0x20] sm:$0xff] %v3116_v49  ;;  %v3085_v21 = vmax.f32 %v3053_v58, 0.0  ;;  %v3017_v3 = vmax.f32 %v2909_v11, 0.0  ;;  %v3640_v22 = vadd.f32 %v3639_v30, %v3638_v61 }
 0x326   : > { %v3641_v16 = vpop.f32.mrf.mxu0 }
 0x327   : > { %v3117_v18 = vmin.f32 %v3085_v21, 1.0  ;;  %v3054_v39 = vadd.f32 %v5219_v51, %v3017_v3  ;;  %v2912_v62 = vadd.f32 %v3640_v22, %v5216_v5 }
 0x328   : > { %v3642_v60 = vpop.f32.mrf.mxu0 }
 0x329   : > { %3149 = vst [vmem:[%s5226_s26 + $0x28] sm:$0xff] %v3117_v18  ;;  %v3086_v2 = vmax.f32 %v3054_v39, 0.0  ;;  %v3018_v20 = vmax.f32 %v2912_v62, 0.0  ;;  %v3643_v52 = vadd.f32 %v3642_v60, %v3641_v16 }
 0x32a   : > { %v3644_v6 = vpop.f32.mrf.mxu0 }
 0x32b   : > { %v3118_v27 = vmin.f32 %v3086_v2, 1.0  ;;  %v3055_v55 = vadd.f32 %v5219_v51, %v3018_v20  ;;  %v2917_v41 = vadd.f32 %v3643_v52, %v5216_v5 }
 0x32c   : > { %v3645_v7 = vpop.f32.mrf.mxu0 }
 0x32d   : > { %3150 = vst [vmem:[%s5226_s26 + $0x30] sm:$0xff] %v3118_v27  ;;  %v3087_v0 = vmax.f32 %v3055_v55, 0.0  ;;  %v3019_v54 = vmax.f32 %v2917_v41, 0.0  ;;  %v3646_v35 = vadd.f32 %v3645_v7, %v3644_v6 }
 0x32e   : > { %v3647_v53 = vpop.f32.mrf.mxu0 }
 0x32f   : > { %v3119_v14 = vmin.f32 %v3087_v0, 1.0  ;;  %v3056_v4 = vadd.f32 %v5219_v51, %v3019_v54  ;;  %v2920_v1 = vadd.f32 %v3646_v35, %v5216_v5 }
 0x330   : > { %v3648_v24 = vpop.f32.mrf.mxu0 }
 0x331   : > { %3151 = vst [vmem:[%s5226_s26 + $0x38] sm:$0xff] %v3119_v14  ;;  %v3088_v37 = vmax.f32 %v3056_v4, 0.0  ;;  %v3020_v12 = vmax.f32 %v2920_v1, 0.0  ;;  %v3649_v42 = vadd.f32 %v3648_v24, %v3647_v53 }
 0x332   : > { %v3650_v38 = vpop.f32.mrf.mxu0 }
 0x333   : > { %v3120_v31 = vmin.f32 %v3088_v37, 1.0  ;;  %v3057_v10 = vadd.f32 %v5219_v51, %v3020_v12  ;;  %v2925_v19 = vadd.f32 %v3649_v42, %v5216_v5 }
 0x334   : > { %v3651_v29 = vpop.f32.mrf.mxu0 }
 0x335   : > { %3152 = vst [vmem:[%s5226_s26 + $0x40] sm:$0xff] %v3120_v31  ;;  %v3089_v48 = vmax.f32 %v3057_v10, 0.0  ;;  %v3021_v33 = vmax.f32 %v2925_v19, 0.0  ;;  %v3652_v9 = vadd.f32 %v3651_v29, %v3650_v38 }
 0x336   : > { %v3653_v50 = vpop.f32.mrf.mxu0 }
 0x337   : > { %v3121_v63 = vmin.f32 %v3089_v48, 1.0  ;;  %v3058_v57 = vadd.f32 %v5219_v51, %v3021_v33  ;;  %v2928_v56 = vadd.f32 %v3652_v9, %v5216_v5 }
 0x338   : > { %v3654_v17 = vpop.f32.mrf.mxu0 }
 0x339   : > { %3153 = vst [vmem:[%s5226_s26 + $0x48] sm:$0xff] %v3121_v63  ;;  %v3090_v13 = vmax.f32 %v3058_v57, 0.0  ;;  %v3022_v25 = vmax.f32 %v2928_v56, 0.0  ;;  %v3655_v32 = vadd.f32 %v3654_v17, %v3653_v50 }
 0x33a   : > { %v3656_v44 = vpop.f32.mrf.mxu0 }
 0x33b   : > { %v3122_v46 = vmin.f32 %v3090_v13, 1.0  ;;  %v3059_v47 = vadd.f32 %v5219_v51, %v3022_v25  ;;  %v2933_v40 = vadd.f32 %v3655_v32, %v5216_v5 }
 0x33c   : > { %v3657_v26 = vpop.f32.mrf.mxu0 }
 0x33d   : > { %3154 = vst [vmem:[%s5226_s26 + $0x50] sm:$0xff] %v3122_v46  ;;  %v3091_v34 = vmax.f32 %v3059_v47, 0.0  ;;  %v3023_v23 = vmax.f32 %v2933_v40, 0.0  ;;  %v3658_v28 = vadd.f32 %v3657_v26, %v3656_v44 }
 0x33e   : > { %v3659_v8 = vpop.f32.mrf.mxu0 }
 0x33f   : > { %v3123_v36 = vmin.f32 %v3091_v34, 1.0  ;;  %v3060_v45 = vadd.f32 %v5219_v51, %v3023_v23  ;;  %v2936_v15 = vadd.f32 %v3658_v28, %v5216_v5 }
 0x340   : > { %v3660_v43 = vpop.f32.mrf.mxu0 }
 0x341   : > { %3155 = vst [vmem:[%s5226_s26 + $0x58] sm:$0xff] %v3123_v36  ;;  %v3092_v59 = vmax.f32 %v3060_v45, 0.0  ;;  %v3024_v61 = vmax.f32 %v2936_v15, 0.0  ;;  %v3661_v49 = vadd.f32 %v3660_v43, %v3659_v8 }
 0x342   : > { %v3662_v58 = vpop.f32.mrf.mxu0 }
 0x343   : > { %v3124_v11 = vmin.f32 %v3092_v59, 1.0  ;;  %v3061_v30 = vadd.f32 %v5219_v51, %v3024_v61  ;;  %v2941_v21 = vadd.f32 %v3661_v49, %v5216_v5 }
 0x344   : > { %v3663_v3 = vpop.f32.mrf.mxu0 }
 0x345   : > { %3156 = vst [vmem:[%s5226_s26 + $0x60] sm:$0xff] %v3124_v11  ;;  %v3093_v22 = vmax.f32 %v3061_v30, 0.0  ;;  %v3025_v16 = vmax.f32 %v2941_v21, 0.0  ;;  %v3664_v18 = vadd.f32 %v3663_v3, %v3662_v58 }
 0x346   : > { %v3665_v39 = vpop.f32.mrf.mxu0 }
 0x347   : > { %v3125_v62 = vmin.f32 %v3093_v22, 1.0  ;;  %v3062_v60 = vadd.f32 %v5219_v51, %v3025_v16  ;;  %v2944_v2 = vadd.f32 %v3664_v18, %v5216_v5 }
 0x348   : > { %v3666_v20 = vpop.f32.mrf.mxu0 }
 0x349   : > { %3157 = vst [vmem:[%s5226_s26 + $0x68] sm:$0xff] %v3125_v62  ;;  %v3094_v52 = vmax.f32 %v3062_v60, 0.0  ;;  %v3026_v6 = vmax.f32 %v2944_v2, 0.0  ;;  %v3667_v27 = vadd.f32 %v3666_v20, %v3665_v39 }
 0x34a   : > { %v3668_v55 = vpop.f32.mrf.mxu0 }
 0x34b   : > { %v3126_v41 = vmin.f32 %v3094_v52, 1.0  ;;  %v3063_v7 = vadd.f32 %v5219_v51, %v3026_v6  ;;  %v2949_v0 = vadd.f32 %v3667_v27, %v5216_v5 }
 0x34c   : > { %v3669_v54 = vpop.f32.mrf.mxu0 }
 0x34d   : > { %3158 = vst [vmem:[%s5226_s26 + $0x70] sm:$0xff] %v3126_v41  ;;  %v3095_v35 = vmax.f32 %v3063_v7, 0.0  ;;  %v3027_v53 = vmax.f32 %v2949_v0, 0.0  ;;  %v3670_v14 = vadd.f32 %v3669_v54, %v3668_v55 }
 0x34e   : > { %v3671_v4 = vpop.f32.mrf.mxu0 }
 0x34f   : > { %v3127_v1 = vmin.f32 %v3095_v35, 1.0  ;;  %v3064_v24 = vadd.f32 %v5219_v51, %v3027_v53  ;;  %v2952_v37 = vadd.f32 %v3670_v14, %v5216_v5 }
 0x350   : > { %v3672_v12 = vpop.f32.mrf.mxu0 }
 0x351   : > { %3159 = vst [vmem:[%s5226_s26 + $0x78] sm:$0xff] %v3127_v1  ;;  %v3096_v42 = vmax.f32 %v3064_v24, 0.0  ;;  %v3028_v38 = vmax.f32 %v2952_v37, 0.0  ;;  %v3673_v31 = vadd.f32 %v3672_v12, %v3671_v4 }
 0x352   : > { %v3674_v10 = vpop.f32.mrf.mxu0 }
 0x353   : > { %v3128_v19 = vmin.f32 %v3096_v42, 1.0  ;;  %v3065_v29 = vadd.f32 %v5219_v51, %v3028_v38  ;;  %v2957_v48 = vadd.f32 %v3673_v31, %v5216_v5 }
 0x354   : > { %v3675_v33 = vpop.f32.mrf.mxu0 }
 0x355   : > { %3160 = vst [vmem:[%s5226_s26 + $0x80] sm:$0xff] %v3128_v19  ;;  %v3097_v9 = vmax.f32 %v3065_v29, 0.0  ;;  %v3029_v50 = vmax.f32 %v2957_v48, 0.0  ;;  %v3676_v63 = vadd.f32 %v3675_v33, %v3674_v10 }
 0x356   : > { %v3677_v57 = vpop.f32.mrf.mxu0 }
 0x357   : > { %v3129_v56 = vmin.f32 %v3097_v9, 1.0  ;;  %v3066_v17 = vadd.f32 %v5219_v51, %v3029_v50  ;;  %v2960_v13 = vadd.f32 %v3676_v63, %v5216_v5 }
 0x358   : > { %v3678_v25 = vpop.f32.mrf.mxu0 }
 0x359   : > { %3161 = vst [vmem:[%s5226_s26 + $0x88] sm:$0xff] %v3129_v56  ;;  %v3098_v32 = vmax.f32 %v3066_v17, 0.0  ;;  %v3030_v44 = vmax.f32 %v2960_v13, 0.0  ;;  %v3679_v46 = vadd.f32 %v3678_v25, %v3677_v57 }
 0x35a   : > { %v3680_v47 = vpop.f32.mrf.mxu0 }
 0x35b   : > { %v3130_v40 = vmin.f32 %v3098_v32, 1.0  ;;  %v3067_v26 = vadd.f32 %v5219_v51, %v3030_v44  ;;  %v2965_v34 = vadd.f32 %v3679_v46, %v5216_v5 }
 0x35c   : > { %v3681_v23 = vpop.f32.mrf.mxu0 }
 0x35d   : > { %3162 = vst [vmem:[%s5226_s26 + $0x90] sm:$0xff] %v3130_v40  ;;  %v3099_v28 = vmax.f32 %v3067_v26, 0.0  ;;  %v3031_v8 = vmax.f32 %v2965_v34, 0.0  ;;  %v3682_v36 = vadd.f32 %v3681_v23, %v3680_v47 }
 0x35e   : > { %v3683_v45 = vpop.f32.mrf.mxu0 }
 0x35f   : > { %v3131_v15 = vmin.f32 %v3099_v28, 1.0  ;;  %v3068_v43 = vadd.f32 %v5219_v51, %v3031_v8  ;;  %v2968_v59 = vadd.f32 %v3682_v36, %v5216_v5 }
 0x360   : > { %v3684_v61 = vpop.f32.mrf.mxu0 }
 0x361   : > { %3163 = vst [vmem:[%s5226_s26 + $0x98] sm:$0xff] %v3131_v15  ;;  %v3100_v49 = vmax.f32 %v3068_v43, 0.0  ;;  %v3032_v58 = vmax.f32 %v2968_v59, 0.0  ;;  %v3685_v11 = vadd.f32 %v3684_v61, %v3683_v45 }
 0x362   : > { %v3686_v30 = vpop.f32.mrf.mxu0 }
 0x363   : > { %v3132_v21 = vmin.f32 %v3100_v49, 1.0  ;;  %v3069_v3 = vadd.f32 %v5219_v51, %v3032_v58  ;;  %v2973_v22 = vadd.f32 %v3685_v11, %v5216_v5 }
 0x364   : > { %v3687_v16 = vpop.f32.mrf.mxu0 }
 0x365   : > { %3164 = vst [vmem:[%s5226_s26 + $0xa0] sm:$0xff] %v3132_v21  ;;  %v3101_v18 = vmax.f32 %v3069_v3, 0.0  ;;  %v3033_v39 = vmax.f32 %v2973_v22, 0.0  ;;  %v3688_v62 = vadd.f32 %v3687_v16, %v3686_v30 }
 0x366   : > { %v3689_v60 = vpop.f32.mrf.mxu0 }
 0x367   : > { %v3133_v2 = vmin.f32 %v3101_v18, 1.0  ;;  %v3070_v20 = vadd.f32 %v5219_v51, %v3033_v39  ;;  %v2976_v52 = vadd.f32 %v3688_v62, %v5216_v5 }
 0x368   : > { %v3690_v6 = vpop.f32.mrf.mxu0 }
 0x369   : > { %3165 = vst [vmem:[%s5226_s26 + $0xa8] sm:$0xff] %v3133_v2  ;;  %v3102_v27 = vmax.f32 %v3070_v20, 0.0  ;;  %v3034_v55 = vmax.f32 %v2976_v52, 0.0  ;;  %v3691_v41 = vadd.f32 %v3690_v6, %v3689_v60 }
 0x36a   : > { %v3692_v7 = vpop.f32.mrf.mxu0 }
 0x36b   : > { %v3134_v0 = vmin.f32 %v3102_v27, 1.0  ;;  %v3071_v54 = vadd.f32 %v5219_v51, %v3034_v55  ;;  %v2981_v35 = vadd.f32 %v3691_v41, %v5216_v5 }
 0x36c   : > { %v3693_v53 = vpop.f32.mrf.mxu0 }
 0x36d   : > { %3166 = vst [vmem:[%s5226_s26 + $0xb0] sm:$0xff] %v3134_v0  ;;  %v3103_v14 = vmax.f32 %v3071_v54, 0.0  ;;  %v3035_v4 = vmax.f32 %v2981_v35, 0.0  ;;  %v3694_v1 = vadd.f32 %v3693_v53, %v3692_v7 }
 0x36e   : > { %v3695_v24 = vpop.f32.mrf.mxu0 }
 0x36f   : > { %v3135_v37 = vmin.f32 %v3103_v14, 1.0  ;;  %v3072_v12 = vadd.f32 %v5219_v51, %v3035_v4  ;;  %v2984_v42 = vadd.f32 %v3694_v1, %v5216_v5 }
 0x370   : > { %v3696_v38 = vpop.f32.mrf.mxu0 }
 0x371   : > { %3167 = vst [vmem:[%s5226_s26 + $0xb8] sm:$0xff] %v3135_v37  ;;  %v3104_v31 = vmax.f32 %v3072_v12, 0.0  ;;  %v3036_v10 = vmax.f32 %v2984_v42, 0.0  ;;  %v3697_v19 = vadd.f32 %v3696_v38, %v3695_v24 }
 0x372   : > { %v3698_v29 = vpop.f32.mrf.mxu0 }
 0x373   : > { %v3136_v48 = vmin.f32 %v3104_v31, 1.0  ;;  %v3073_v33 = vadd.f32 %v5219_v51, %v3036_v10  ;;  %v2989_v9 = vadd.f32 %v3697_v19, %v5216_v5 }
 0x374   : > { %v3699_v50 = vpop.f32.mrf.mxu0 }
 0x375   : > { %3168 = vst [vmem:[%s5226_s26 + $0xc0] sm:$0xff] %v3136_v48  ;;  %v3105_v63 = vmax.f32 %v3073_v33, 0.0  ;;  %v3037_v57 = vmax.f32 %v2989_v9, 0.0  ;;  %v3700_v56 = vadd.f32 %v3699_v50, %v3698_v29 }
 0x376   : > { %v3701_v17 = vpop.f32.mrf.mxu0 }
 0x377   : > { %v3137_v13 = vmin.f32 %v3105_v63, 1.0  ;;  %v3074_v25 = vadd.f32 %v5219_v51, %v3037_v57  ;;  %v2992_v32 = vadd.f32 %v3700_v56, %v5216_v5 }
 0x378   : > { %v3702_v44 = vpop.f32.mrf.mxu0 }
 0x379   : > { %3169 = vst [vmem:[%s5226_s26 + $0xc8] sm:$0xff] %v3137_v13  ;;  %v3106_v46 = vmax.f32 %v3074_v25, 0.0  ;;  %v3038_v47 = vmax.f32 %v2992_v32, 0.0  ;;  %v3703_v40 = vadd.f32 %v3702_v44, %v3701_v17 }
 0x37a   : > { %v3704_v26 = vpop.f32.mrf.mxu0 }
 0x37b   : > { %v3138_v34 = vmin.f32 %v3106_v46, 1.0  ;;  %v3075_v23 = vadd.f32 %v5219_v51, %v3038_v47  ;;  %v2997_v28 = vadd.f32 %v3703_v40, %v5216_v5 }
 0x37c   : > { %v3705_v8 = vpop.f32.mrf.mxu0 }
 0x37d   : > { %3170 = vst [vmem:[%s5226_s26 + $0xd0] sm:$0xff] %v3138_v34  ;;  %v3107_v36 = vmax.f32 %v3075_v23, 0.0  ;;  %v3039_v45 = vmax.f32 %v2997_v28, 0.0  ;;  %v3706_v15 = vadd.f32 %v3705_v8, %v3704_v26 }
 0x37e   : > { %v3707_v43 = vpop.f32.mrf.mxu0 }
 0x37f   : > { %v3139_v59 = vmin.f32 %v3107_v36, 1.0  ;;  %v3076_v61 = vadd.f32 %v5219_v51, %v3039_v45  ;;  %v3000_v49 = vadd.f32 %v3706_v15, %v5216_v5 }
 0x380   : > { %v3708_v58 = vpop.f32.mrf.mxu0 }
 0x381   : > { %3171 = vst [vmem:[%s5226_s26 + $0xd8] sm:$0xff] %v3139_v59  ;;  %v3108_v11 = vmax.f32 %v3076_v61, 0.0  ;;  %v3040_v30 = vmax.f32 %v3000_v49, 0.0  ;;  %v3709_v21 = vadd.f32 %v3708_v58, %v3707_v43 }
 0x382   : > { %v3710_v3 = vpop.f32.mrf.mxu0 }
 0x383   : > { %v3140_v22 = vmin.f32 %v3108_v11, 1.0  ;;  %v3077_v16 = vadd.f32 %v5219_v51, %v3040_v30  ;;  %v3005_v18 = vadd.f32 %v3709_v21, %v5216_v5 }
 0x384   : > { %v3711_v39 = vpop.f32.mrf.mxu0 }
 0x385   : > { %3172 = vst [vmem:[%s5226_s26 + $0xe0] sm:$0xff] %v3140_v22  ;;  %v3109_v62 = vmax.f32 %v3077_v16, 0.0  ;;  %v3041_v60 = vmax.f32 %v3005_v18, 0.0  ;;  %v3712_v2 = vadd.f32 %v3711_v39, %v3710_v3 }
 0x387   : > { %v3141_v20 = vmin.f32 %v3109_v62, 1.0  ;;  %v3078_v52 = vadd.f32 %v5219_v51, %v3041_v60  ;;  %v3008_v6 = vadd.f32 %v3712_v2, %v5216_v5 }
 0x389   : > { %3173 = vst [vmem:[%s5226_s26 + $0xe8] sm:$0xff] %v3141_v20  ;;  %v3110_v27 = vmax.f32 %v3078_v52, 0.0  ;;  %v3042_v55 = vmax.f32 %v3008_v6, 0.0 }
 0x38b   : > { %v3142_v41 = vmin.f32 %v3110_v27, 1.0  ;;  %v3079_v7 = vadd.f32 %v5219_v51, %v3042_v55 }
 0x38d   : > { %3174 = vst [vmem:[%s5226_s26 + $0xf0] sm:$0xff] %v3142_v41  ;;  %v3111_v0 = vmax.f32 %v3079_v7, 0.0 }
 0x38f   : > { %v3143_v5 = vmin.f32 %v3111_v0, 1.0 }
 0x391   : > { %3175 = vst [vmem:[%s5226_s26 + $0xf8] sm:$0xff] %v3143_v5 }
 0x392   : > { %4193 = shalt.err (!%p4190_p3)
}
 0x393   : > { %s4194_s10 = scalar_lea.hbm %s5323_s15, 4096  ;;  %s4198_s17 = scalar_lea.hbm %s5373_s5, 16384 }
 0x394   : > { %p4195_p13 = scmp.ne.s32.totalorder %s5323_s15, %s4194_s10  ;;  %p4199_p0 = scmp.lt.s32.totalorder %s5323_s15, %s5373_s5 }
 0x395   : > { %p4200_p1 = scmp.lt.s32.totalorder %s4198_s17, %s4194_s10 }
 0x396   : > { %p4196_p7 = pnand %p4195_p13, %p5545_p8 }
 0x397   : > { %p4201_p2 = por %p4200_p1, %p4199_p0 }
 0x398   : > { %p4197_p10 = pneg %p4196_p7 }
 0x39a   : > { %p4202_p4 = pnand %p4201_p2, %p4197_p10 }
 0x39c   : > { %4205 = shalt.err (!%p4202_p4)
}
 0x39d   : > { %s4266_s28 = smov 128   ;;  %s4267_s7 = smov 8  }
 0x39e   : > { %3763 = dma.vmem_to_hbm [thread:$0]  (%p5545_p8), %s5325_s6, 4096, %s5323_s15, %s3177_s23, %s4266_s28, %s4266_s28, %s4267_s7  }
 0x39f PF: > { %p3795_p11 = scmp.ge.s32.totalorder %s4252_s21, 2  ;;  %s3205_s8 = sand.u32 1, %s4240_s18  }
 0x3a0   : > { %p5546_p6 = scmp.ne.s32.totalorder %s5379_s25, 0  ;;  %s3206_s27 = scalar_lea.sflag [#allocation4], %s3205_s8 }
 0x3a2   : > { %p3783_p5 = pnand %p3795_p11, %p5546_p6 }
 0x3a4   : > { %p3784_p9 = pneg %p3783_p5 }
 0x3a6   : > { %4235 = dma.done.wait (%p3784_p9), %s3206_s27, 4096  }
 0x3a7   : > { %4237 = vsyncadd (%p3784_p9), %s3206_s27, 4294963200  ;;  %p20_p12 = scmp.ge.s32.totalorder %s4385_s11, 6   ;;  %s5547_s18 = smov %s4244_s19 }
 0x3a8   : > { %s5548_s19 = smov %s4248_s20  ;;  %s5549_s20 = smov %s4394_s13 }
 0x3a9   : > { %s5550_s21 = smov %s4385_s11  ;;  %22 = sbr.rel (!%p20_p12) target bundleno = 7 (0x7), region = 101 }
 0x3ae   :  { %3211 = vsyncpa [#allocation3], 1 }
 0x3af   :  { %3213 = vsyncpa [#allocation3 + $0x1], 1 }
 0x3b0   :  { %3214 = vsyncpa [#allocation6], 1 }
 0x3b1   :  { %3215 = vsyncpa [#allocation9], 1 }
 0x3b2   :  { %3216 = vsyncpa [#allocation4], 1 }
 0x3b3   :  { %3218 = vsyncpa [#allocation4 + $0x1], 1 }

</bundles_post_ra>
